<compile_context>
chip_gen: v7x
topology: tpu7x:2x2x1
jax: 0.10.0
libtpu: 0.0.40
codegen_flags: <defaults>
</compile_context>

<pallas_src>
import functools

import jax
import jax.numpy as jnp
from jax.experimental import pallas as pl
from jax.experimental.pallas import tpu as pltpu


# --------------------------------------------------------------------------
# helpers
# --------------------------------------------------------------------------
def _compiler_params(dimension_semantics, est_bytes):
    # Blocks are double buffered by the pipeline -> 2x estimate + headroom.
    limit = int(min(max(2 * est_bytes + (8 << 20), 16 << 20), 48 << 20))
    return pltpu.CompilerParams(dimension_semantics=dimension_semantics,
                                vmem_limit_bytes=limit)


def _pick_row_block(rows):
    if rows <= 256:
        return rows
    for cand in (256, 128, 64, 32, 16, 8):
        if rows % cand == 0:
            return cand
    return rows


# --------------------------------------------------------------------------
# Kernel 1: Conv2d(stride 1) + bias, fused with either
#   * ReLU                                (batch_norm=False), or
#   * per-channel sum / sum-of-squares    (batch_norm=True; BN applied in pass 2)
# One grid step = one image; the whole contraction is ONE bf16 MXU matmul.
# --------------------------------------------------------------------------
def _conv_kernel(x_ref, w_ref, b_ref, *rest, H, W, Cin, ks, pad, use_bn):
    if use_bn:
        y_ref, stats_ref, xp, pcols = rest
    else:
        y_ref, xp, pcols = rest

    Hc = H + 2 * pad - ks + 1
    Wc = W + 2 * pad - ks + 1
    rows = Hc * Wc

    # zero padding handled in VMEM (no jnp.pad / second HBM copy of the input)
    if pad:
        xp[...] = jnp.zeros_like(xp)
    xp[pad:pad + H, pad:pad + W, :] = x_ref[0]

    # im2col staging: (rows, ks*ks*Cin) patch matrix built from shifted windows
    for dh in range(ks):
        for dw in range(ks):
            t = dh * ks + dw
            pcols[:, t * Cin:(t + 1) * Cin] = (
                xp[dh:dh + Hc, dw:dw + Wc, :].reshape(rows, Cin))

    # single MXU matmul: K = ks*ks*Cin, bf16 operands, f32 accumulation
    acc = jnp.dot(pcols[...].astype(jnp.bfloat16), w_ref[...],
                  preferred_element_type=jnp.float32)        # (rows, Cout) f32
    acc = acc + b_ref[...]                                   # conv bias

    if use_bn:
        # One-pass sufficient statistics, accumulated over the whole batch grid
        # axis (axis is "arbitrary" so the (2, C) block stays VMEM-resident).
        @pl.when(pl.program_id(0) == 0)
        def _init():
            stats_ref[...] = jnp.zeros_like(stats_ref)

        stats_ref[0:1, :] += jnp.sum(acc, axis=0, keepdims=True)
        stats_ref[1:2, :] += jnp.sum(acc * acc, axis=0, keepdims=True)
        y_ref[0] = acc                                       # pre-activation
    else:
        y_ref[0] = jnp.maximum(acc, 0.0)                     # fused ReLU


def conv2d(x, w_mat, b, *, ks, pad, use_bn):
    """x: (N,H,W,Cin) f32; w_mat: (ks*ks*Cin, Cout) bf16; b: (1, Cout) f32."""
    N, H, W, Cin = x.shape
    K, Cout = w_mat.shape
    Hc = H + 2 * pad - ks + 1
    Wc = W + 2 * pad - ks + 1

    kernel = functools.partial(_conv_kernel, H=H, W=W, Cin=Cin, ks=ks, pad=pad,
                               use_bn=use_bn)

    in_specs = [pl.BlockSpec((1, H, W, Cin), lambda n: (n, 0, 0, 0)),
                pl.BlockSpec((K, Cout), lambda n: (0, 0)),
                pl.BlockSpec((1, Cout), lambda n: (0, 0))]
    y_shape = jax.ShapeDtypeStruct((N, Hc * Wc, Cout), jnp.float32)
    y_spec = pl.BlockSpec((1, Hc * Wc, Cout), lambda n: (n, 0, 0))
    scratch = [pltpu.VMEM((H + 2 * pad, W + 2 * pad, Cin), jnp.float32),
               pltpu.VMEM((Hc * Wc, K), jnp.float32)]

    est = (H * W * Cin * 4 + K * Cout * 2 + Cout * 4          # input blocks
           + Hc * Wc * Cout * 4 + 2 * Cout * 4                # output blocks
           + (H + 2 * pad) * (W + 2 * pad) * Cin * 4          # pad scratch
           + Hc * Wc * K * 6 + Hc * Wc * Cout * 4)            # im2col + acc

    if use_bn:
        out_shape = [y_shape, jax.ShapeDtypeStruct((2, Cout), jnp.float32)]
        out_specs = [y_spec, pl.BlockSpec((2, Cout), lambda n: (0, 0))]
        semantics = ("arbitrary",)          # stats accumulate across the batch
    else:
        out_shape = y_shape
        out_specs = y_spec
        semantics = ("parallel",)           # v7x: shard batch over its 2 TCs

    return pl.pallas_call(
        kernel,
        grid=(N,),
        in_specs=in_specs,
        out_specs=out_specs,
        out_shape=out_shape,
        scratch_shapes=scratch,
        compiler_params=_compiler_params(semantics, est),
    )(x, w_mat, b)


# --------------------------------------------------------------------------
# Kernel 2a: per-channel affine (BN scale/shift) + ReLU, lane-dense layout.
# --------------------------------------------------------------------------
def _affine_relu_kernel(y_ref, s_ref, t_ref, o_ref):
    o_ref[0] = jnp.maximum(y_ref[0] * s_ref[...] + t_ref[...], 0.0)


def affine_relu(y, scale_t, shift_t):
    """y: (N, H, W*C); scale_t/shift_t: (1, W*C). Fully lane-dense elementwise."""
    N, Hc, F = y.shape
    th = _pick_row_block(Hc)
    est = 2 * th * F * 4 + 2 * F * 4
    return pl.pallas_call(
        _affine_relu_kernel,
        grid=(N, Hc // th),
        in_specs=[pl.BlockSpec((1, th, F), lambda n, h: (n, h, 0)),
                  pl.BlockSpec((1, F), lambda n, h: (0, 0)),
                  pl.BlockSpec((1, F), lambda n, h: (0, 0))],
        out_specs=pl.BlockSpec((1, th, F), lambda n, h: (n, h, 0)),
        out_shape=jax.ShapeDtypeStruct((N, Hc, F), jnp.float32),
        compiler_params=_compiler_params(("parallel", "parallel"), est),
    )(y, scale_t, shift_t)


# --------------------------------------------------------------------------
# Kernel 2b: per-channel affine + ReLU + fused MaxPool2d(2, 2).
# One grid step consumes two conv rows and produces one pooled row.
# --------------------------------------------------------------------------
def _affine_relu_pool_kernel(y_ref, s_ref, t_ref, o_ref, wbuf):
    y = jnp.maximum(y_ref[0] * s_ref[...] + t_ref[...], 0.0)   # (2, Wc, C)
    wbuf[...] = jnp.maximum(y[0], y[1])                        # vertical max (Wc, C)
    Wc = wbuf.shape[0]
    a = wbuf[pl.ds(0, Wc // 2, stride=2), :]                   # even columns
    b = wbuf[pl.ds(1, Wc // 2, stride=2), :]                   # odd columns
    o_ref[0, 0] = jnp.maximum(a, b)                            # (Wc//2, C)


def affine_relu_pool(y, scale, shift):
    """y: (N, Hc, Wc, C); scale/shift: (1, C). Returns (N, Hc//2, Wc//2, C)."""
    N, Hc, Wc, C = y.shape
    assert Hc % 2 == 0 and Wc % 2 == 0, "2x2/2 max-pool needs even H and W"
    est = 2 * 2 * Wc * C * 4 + 2 * (Wc // 2) * C * 4 + Wc * C * 4 + 4 * C * 4
    return pl.pallas_call(
        _affine_relu_pool_kernel,
        grid=(N, Hc // 2),
        in_specs=[pl.BlockSpec((1, 2, Wc, C), lambda n, h: (n, h, 0, 0)),
                  pl.BlockSpec((1, C), lambda n, h: (0, 0)),
                  pl.BlockSpec((1, C), lambda n, h: (0, 0))],
        out_specs=pl.BlockSpec((1, 1, Wc // 2, C), lambda n, h: (n, h, 0, 0)),
        out_shape=jax.ShapeDtypeStruct((N, Hc // 2, Wc // 2, C), jnp.float32),
        scratch_shapes=[pltpu.VMEM((Wc, C), jnp.float32)],
        compiler_params=_compiler_params(("parallel", "parallel"), est),
    )(y, scale, shift)


# --------------------------------------------------------------------------
# _Block forward
# --------------------------------------------------------------------------
def init_block_params(key, config):
    params = []
    for inc, outc, ks, st, pad in config:
        key, k1, k2 = jax.random.split(key, 3)
        w = jax.random.normal(k1, (outc, inc, ks, ks), jnp.float32) * 0.1  # OIHW
        b = jax.random.normal(k2, (outc,), jnp.float32) * 0.05
        gamma = jnp.ones((outc,), jnp.float32)   # BatchNorm2d default weight
        beta = jnp.zeros((outc,), jnp.float32)   # BatchNorm2d default bias
        params.append((w, b, gamma, beta))
    return params


def block_forward(x_nchw, params, config, batch_norm, eps=1e-5):
    y = jnp.transpose(x_nchw, (0, 2, 3, 1)).astype(jnp.float32)   # NCHW -> NHWC
    n_layers = len(config)
    for idx, ((w, b, gamma, beta), (inc, outc, ks, st, pad)) in enumerate(
            zip(params, config)):
        assert st == 1, "only stride-1 convs are implemented"
        last = idx == n_layers - 1
        N, H, W, _ = y.shape
        Hc = H + 2 * pad - ks + 1
        Wc = W + 2 * pad - ks + 1

        # OIHW -> (KH*KW*Cin, Cout) taps; bf16 operands for the MXU
        w_mat = (jnp.transpose(w, (2, 3, 1, 0))
                 .reshape(ks * ks * inc, outc).astype(jnp.bfloat16))
        b2 = b.reshape(1, outc).astype(jnp.float32)

        if batch_norm:
            y_pre, stats = conv2d(y, w_mat, b2, ks=ks, pad=pad, use_bn=True)
            # global training-mode batch stats (biased variance), one-pass form
            cnt = float(N * Hc * Wc)
            mean = stats[0] / cnt
            var = jnp.maximum(stats[1] / cnt - mean * mean, 0.0)
            scale = gamma * jax.lax.rsqrt(var + eps)
            shift = beta - mean * scale
            if last:      # fuse BN + ReLU + 2x2 max-pool
                y = affine_relu_pool(y_pre.reshape(N, Hc, Wc, outc),
                                     scale.reshape(1, outc),
                                     shift.reshape(1, outc))
            else:         # lane-dense BN + ReLU
                y = affine_relu(y_pre.reshape(N, Hc, Wc * outc),
                                jnp.tile(scale, Wc).reshape(1, Wc * outc),
                                jnp.tile(shift, Wc).reshape(1, Wc * outc))
                y = y.reshape(N, Hc, Wc, outc)
        else:
            y_act = conv2d(y, w_mat, b2, ks=ks, pad=pad, use_bn=False)
            if last:      # pool-only pass (scale=1, shift=0; ReLU is idempotent)
                y = affine_relu_pool(y_act.reshape(N, Hc, Wc, outc),
                                     jnp.ones((1, outc), jnp.float32),
                                     jnp.zeros((1, outc), jnp.float32))
            else:
                y = y_act.reshape(N, Hc, Wc, outc)
    return jnp.transpose(y, (0, 3, 1, 2))                          # NHWC -> NCHW


# --------------------------------------------------------------------------
# Pure-JAX reference (PyTorch module semantics)
# --------------------------------------------------------------------------
def block_reference(x_nchw, params, config, batch_norm, eps=1e-5):
    y = x_nchw.astype(jnp.float32)
    for (w, b, gamma, beta), (inc, outc, ks, st, pad) in zip(params, config):
        y = jax.lax.conv_general_dilated(
            y, w, window_strides=(st, st), padding=[(pad, pad), (pad, pad)],
            dimension_numbers=("NCHW", "OIHW", "NCHW"),
            precision=jax.lax.Precision.HIGHEST)
        y = y + b[None, :, None, None]
        if batch_norm:
            mean = jnp.mean(y, axis=(0, 2, 3), keepdims=True)
            var = jnp.mean(jnp.square(y - mean), axis=(0, 2, 3), keepdims=True)
            y = (y - mean) * jax.lax.rsqrt(var + eps)
            y = y * gamma[None, :, None, None] + beta[None, :, None, None]
        y = jnp.maximum(y, 0.0)
    N, C, H, W = y.shape
    return y.reshape(N, C, H // 2, 2, W // 2, 2).max(axis=(3, 5))


if __name__ == "__main__":
    # VGG-style block: two 3x3 / stride-1 / pad-1 convs, then 2x2 max-pool.
    # NOTE: the PyTorch module builds every BatchNorm2d with
    # num_features=config[-1][1]; this config keeps all out-channels equal so
    # that (quirky) construction is well-defined.
    config = [(4, 8, 3, 1, 1), (8, 8, 3, 1, 1)]
    batch_norm = True

    key = jax.random.PRNGKey(0)
    key, kx = jax.random.split(key)
    x = jax.random.normal(kx, (2, 4, 16, 16), jnp.float32)   # NCHW, like PyTorch
    params = init_block_params(key, config)

    fwd = jax.jit(lambda xx, pp: block_forward(xx, pp, config, batch_norm))
    out = jax.block_until_ready(fwd(x, params))
    ref = jax.block_until_ready(block_reference(x, params, config, batch_norm))

    assert out.shape == ref.shape == (2, 8, 8, 8), out.shape
    max_err = float(jnp.max(jnp.abs(out - ref)))
    # bf16 MXU operands (f32 accumulation) vs. f32 HIGHEST reference.
    assert bool(jnp.allclose(out, ref, rtol=3e-2, atol=3e-2)), max_err
    print("KERNEL_OK")
</pallas_src>

<mosaic_0001>
module attributes {stable_mosaic.version = 11 : i64} {
  func.func @_conv_kernel(%arg0: i32, %arg1: memref<1x16x16x4xf32, #tpu.memory_space<vmem>>, %arg2: memref<36x8xbf16, #tpu.memory_space<vmem>>, %arg3: memref<1x8xf32, #tpu.memory_space<vmem>>, %arg4: memref<1x256x8xf32, #tpu.memory_space<vmem>>, %arg5: memref<2x8xf32, #tpu.memory_space<vmem>>, %arg6: memref<18x18x4xf32, #tpu.memory_space<vmem>>, %arg7: memref<256x36xf32, #tpu.memory_space<vmem>>) attributes {dimension_semantics = [#tpu.dimension_semantics<arbitrary>], iteration_bounds = array<i64: 2>, scalar_prefetch = 0 : i64, scratch_operands = 2 : i64, tpu.core_type = #tpu.core_type<tc>, window_params = [{transform_indices = @transform_0, window_bounds = array<i64: 1, 16, 16, 4>}, {pipeline_mode = #tpu.pipeline_mode<synchronous>, transform_indices = @transform_1, window_bounds = array<i64: 36, 8>}, {pipeline_mode = #tpu.pipeline_mode<synchronous>, transform_indices = @transform_2, window_bounds = array<i64: 1, 8>}, {transform_indices = @transform_3, window_bounds = array<i64: 1, 256, 8>}, {pipeline_mode = #tpu.pipeline_mode<synchronous>, transform_indices = @transform_4, window_bounds = array<i64: 2, 8>}]} {
    %cst = arith.constant 0.000000e+00 : f32
    %0 = vector.broadcast %cst : f32 to vector<18x18x4xf32>
    %c0 = arith.constant 0 : index
    %c0_0 = arith.constant 0 : index
    %c0_1 = arith.constant 0 : index
    %1 = vector.load %arg6[%c0, %c0_0, %c0_1] : memref<18x18x4xf32, #tpu.memory_space<vmem>>, vector<18x18x4xf32>
    tpu.vector_store %arg6[%c0, %c0_0, %c0_1], %0 {strides = array<i32>} : memref<18x18x4xf32, #tpu.memory_space<vmem>>, vector<18x18x4xf32>,
    %c0_2 = arith.constant 0 : index
    %c0_3 = arith.constant 0 : index
    %c0_4 = arith.constant 0 : index
    %c0_5 = arith.constant 0 : index
    %2 = vector.load %arg1[%c0_2, %c0_3, %c0_4, %c0_5] : memref<1x16x16x4xf32, #tpu.memory_space<vmem>>, vector<1x16x16x4xf32>
    %3 = vector.shape_cast %2 : vector<1x16x16x4xf32> to vector<16x16x4xf32>
    %c1 = arith.constant 1 : index
    %c1_6 = arith.constant 1 : index
    %c0_7 = arith.constant 0 : index
    %4 = vector.load %arg6[%c1, %c1_6, %c0_7] : memref<18x18x4xf32, #tpu.memory_space<vmem>>, vector<16x16x4xf32>
    tpu.vector_store %arg6[%c1, %c1_6, %c0_7], %3 {strides = array<i32>} : memref<18x18x4xf32, #tpu.memory_space<vmem>>, vector<16x16x4xf32>,
    %c0_8 = arith.constant 0 : index
    %c0_9 = arith.constant 0 : index
    %c0_10 = arith.constant 0 : index
    %5 = vector.load %arg6[%c0_8, %c0_9, %c0_10] : memref<18x18x4xf32, #tpu.memory_space<vmem>>, vector<16x16x4xf32>
    %6 = vector.shape_cast %5 : vector<16x16x4xf32> to vector<256x4xf32>
    %c0_11 = arith.constant 0 : index
    %c0_12 = arith.constant 0 : index
    %7 = vector.load %arg7[%c0_11, %c0_12] : memref<256x36xf32, #tpu.memory_space<vmem>>, vector<256x4xf32>
    tpu.vector_store %arg7[%c0_11, %c0_12], %6 {strides = array<i32>} : memref<256x36xf32, #tpu.memory_space<vmem>>, vector<256x4xf32>,
    %c0_13 = arith.constant 0 : index
    %c1_14 = arith.constant 1 : index
    %c0_15 = arith.constant 0 : index
    %8 = vector.load %arg6[%c0_13, %c1_14, %c0_15] : memref<18x18x4xf32, #tpu.memory_space<vmem>>, vector<16x16x4xf32>
    %9 = vector.shape_cast %8 : vector<16x16x4xf32> to vector<256x4xf32>
    %c0_16 = arith.constant 0 : index
    %c4 = arith.constant 4 : index
    %10 = vector.load %arg7[%c0_16, %c4] : memref<256x36xf32, #tpu.memory_space<vmem>>, vector<256x4xf32>
    tpu.vector_store %arg7[%c0_16, %c4], %9 {strides = array<i32>} : memref<256x36xf32, #tpu.memory_space<vmem>>, vector<256x4xf32>,
    %c0_17 = arith.constant 0 : index
    %c2 = arith.constant 2 : index
    %c0_18 = arith.constant 0 : index
    %11 = vector.load %arg6[%c0_17, %c2, %c0_18] : memref<18x18x4xf32, #tpu.memory_space<vmem>>, vector<16x16x4xf32>
    %12 = vector.shape_cast %11 : vector<16x16x4xf32> to vector<256x4xf32>
    %c0_19 = arith.constant 0 : index
    %c8 = arith.constant 8 : index
    %13 = vector.load %arg7[%c0_19, %c8] : memref<256x36xf32, #tpu.memory_space<vmem>>, vector<256x4xf32>
    tpu.vector_store %arg7[%c0_19, %c8], %12 {strides = array<i32>} : memref<256x36xf32, #tpu.memory_space<vmem>>, vector<256x4xf32>,
    %c1_20 = arith.constant 1 : index
    %c0_21 = arith.constant 0 : index
    %c0_22 = arith.constant 0 : index
    %14 = vector.load %arg6[%c1_20, %c0_21, %c0_22] : memref<18x18x4xf32, #tpu.memory_space<vmem>>, vector<16x16x4xf32>
    %15 = vector.shape_cast %14 : vector<16x16x4xf32> to vector<256x4xf32>
    %c0_23 = arith.constant 0 : index
    %c12 = arith.constant 12 : index
    %16 = vector.load %arg7[%c0_23, %c12] : memref<256x36xf32, #tpu.memory_space<vmem>>, vector<256x4xf32>
    tpu.vector_store %arg7[%c0_23, %c12], %15 {strides = array<i32>} : memref<256x36xf32, #tpu.memory_space<vmem>>, vector<256x4xf32>,
    %c1_24 = arith.constant 1 : index
    %c1_25 = arith.constant 1 : index
    %c0_26 = arith.constant 0 : index
    %17 = vector.load %arg6[%c1_24, %c1_25, %c0_26] : memref<18x18x4xf32, #tpu.memory_space<vmem>>, vector<16x16x4xf32>
    %18 = vector.shape_cast %17 : vector<16x16x4xf32> to vector<256x4xf32>
    %c0_27 = arith.constant 0 : index
    %c16 = arith.constant 16 : index
    %19 = vector.load %arg7[%c0_27, %c16] : memref<256x36xf32, #tpu.memory_space<vmem>>, vector<256x4xf32>
    tpu.vector_store %arg7[%c0_27, %c16], %18 {strides = array<i32>} : memref<256x36xf32, #tpu.memory_space<vmem>>, vector<256x4xf32>,
    %c1_28 = arith.constant 1 : index
    %c2_29 = arith.constant 2 : index
    %c0_30 = arith.constant 0 : index
    %20 = vector.load %arg6[%c1_28, %c2_29, %c0_30] : memref<18x18x4xf32, #tpu.memory_space<vmem>>, vector<16x16x4xf32>
    %21 = vector.shape_cast %20 : vector<16x16x4xf32> to vector<256x4xf32>
    %c0_31 = arith.constant 0 : index
    %c20 = arith.constant 20 : index
    %22 = vector.load %arg7[%c0_31, %c20] : memref<256x36xf32, #tpu.memory_space<vmem>>, vector<256x4xf32>
    tpu.vector_store %arg7[%c0_31, %c20], %21 {strides = array<i32>} : memref<256x36xf32, #tpu.memory_space<vmem>>, vector<256x4xf32>,
    %c2_32 = arith.constant 2 : index
    %c0_33 = arith.constant 0 : index
    %c0_34 = arith.constant 0 : index
    %23 = vector.load %arg6[%c2_32, %c0_33, %c0_34] : memref<18x18x4xf32, #tpu.memory_space<vmem>>, vector<16x16x4xf32>
    %24 = vector.shape_cast %23 : vector<16x16x4xf32> to vector<256x4xf32>
    %c0_35 = arith.constant 0 : index
    %c24 = arith.constant 24 : index
    %25 = vector.load %arg7[%c0_35, %c24] : memref<256x36xf32, #tpu.memory_space<vmem>>, vector<256x4xf32>
    tpu.vector_store %arg7[%c0_35, %c24], %24 {strides = array<i32>} : memref<256x36xf32, #tpu.memory_space<vmem>>, vector<256x4xf32>,
    %c2_36 = arith.constant 2 : index
    %c1_37 = arith.constant 1 : index
    %c0_38 = arith.constant 0 : index
    %26 = vector.load %arg6[%c2_36, %c1_37, %c0_38] : memref<18x18x4xf32, #tpu.memory_space<vmem>>, vector<16x16x4xf32>
    %27 = vector.shape_cast %26 : vector<16x16x4xf32> to vector<256x4xf32>
    %c0_39 = arith.constant 0 : index
    %c28 = arith.constant 28 : index
    %28 = vector.load %arg7[%c0_39, %c28] : memref<256x36xf32, #tpu.memory_space<vmem>>, vector<256x4xf32>
    tpu.vector_store %arg7[%c0_39, %c28], %27 {strides = array<i32>} : memref<256x36xf32, #tpu.memory_space<vmem>>, vector<256x4xf32>,
    %c2_40 = arith.constant 2 : index
    %c2_41 = arith.constant 2 : index
    %c0_42 = arith.constant 0 : index
    %29 = vector.load %arg6[%c2_40, %c2_41, %c0_42] : memref<18x18x4xf32, #tpu.memory_space<vmem>>, vector<16x16x4xf32>
    %30 = vector.shape_cast %29 : vector<16x16x4xf32> to vector<256x4xf32>
    %c0_43 = arith.constant 0 : index
    %c32 = arith.constant 32 : index
    %31 = vector.load %arg7[%c0_43, %c32] : memref<256x36xf32, #tpu.memory_space<vmem>>, vector<256x4xf32>
    tpu.vector_store %arg7[%c0_43, %c32], %30 {strides = array<i32>} : memref<256x36xf32, #tpu.memory_space<vmem>>, vector<256x4xf32>,
    %c0_44 = arith.constant 0 : index
    %c0_45 = arith.constant 0 : index
    %32 = vector.load %arg7[%c0_44, %c0_45] : memref<256x36xf32, #tpu.memory_space<vmem>>, vector<256x36xf32>
    %33 = arith.truncf %32 : vector<256x36xf32> to vector<256x36xbf16>
    %c0_46 = arith.constant 0 : index
    %c0_47 = arith.constant 0 : index
    %34 = vector.load %arg2[%c0_46, %c0_47] : memref<36x8xbf16, #tpu.memory_space<vmem>>, vector<36x8xbf16>
    %cst_48 = arith.constant dense<0.000000e+00> : vector<256x8xf32>
    %35 = tpu.matmul %33, %34, %cst_48 {dimension_numbers = #tpu.dot_dimension_numbers<[1], [0], [0], [1], [0, 0, 1, 1], [], []>} : vector<256x36xbf16>, vector<36x8xbf16>, vector<256x8xf32> -> vector<256x8xf32>
    %c0_49 = arith.constant 0 : index
    %c0_50 = arith.constant 0 : index
    %36 = vector.load %arg3[%c0_49, %c0_50] : memref<1x8xf32, #tpu.memory_space<vmem>>, vector<1x8xf32>
    %37 = vector.broadcast %36 : vector<1x8xf32> to vector<256x8xf32>
    %38 = arith.addf %35, %37 : vector<256x8xf32>
    %c0_i32 = arith.constant 0 : i32
    %39 = arith.cmpi eq, %arg0, %c0_i32 : i32
    %40 = arith.extui %39 : i1 to i32
    %c0_i32_51 = arith.constant 0 : i32
    %41 = arith.cmpi ne, %40, %c0_i32_51 : i32
    scf.if %41 {
      %cst_65 = arith.constant 0.000000e+00 : f32
      %56 = vector.broadcast %cst_65 : f32 to vector<2x8xf32>
      %c0_66 = arith.constant 0 : index
      %c0_67 = arith.constant 0 : index
      %57 = vector.load %arg5[%c0_66, %c0_67] : memref<2x8xf32, #tpu.memory_space<vmem>>, vector<2x8xf32>
      tpu.vector_store %arg5[%c0_66, %c0_67], %56 {strides = array<i32>} : memref<2x8xf32, #tpu.memory_space<vmem>>, vector<2x8xf32>,
    } else {
    }
    %c0_52 = arith.constant 0 : index
    %c0_53 = arith.constant 0 : index
    %42 = vector.load %arg5[%c0_52, %c0_53] : memref<2x8xf32, #tpu.memory_space<vmem>>, vector<1x8xf32>
    %cst_54 = arith.constant dense<0.000000e+00> : vector<8xf32>
    %43 = vector.multi_reduction <add>, %38, %cst_54 [0] : vector<256x8xf32> to vector<8xf32>
    %44 = vector.shape_cast %43 : vector<8xf32> to vector<1x8xf32>
    %45 = arith.addf %42, %44 : vector<1x8xf32>
    %c0_55 = arith.constant 0 : index
    %c0_56 = arith.constant 0 : index
    %46 = vector.load %arg5[%c0_55, %c0_56] : memref<2x8xf32, #tpu.memory_space<vmem>>, vector<1x8xf32>
    tpu.vector_store %arg5[%c0_55, %c0_56], %45 {strides = array<i32>} : memref<2x8xf32, #tpu.memory_space<vmem>>, vector<1x8xf32>,
    %c1_57 = arith.constant 1 : index
    %c0_58 = arith.constant 0 : index
    %47 = vector.load %arg5[%c1_57, %c0_58] : memref<2x8xf32, #tpu.memory_space<vmem>>, vector<1x8xf32>
    %48 = arith.mulf %38, %38 : vector<256x8xf32>
    %cst_59 = arith.constant dense<0.000000e+00> : vector<8xf32>
    %49 = vector.multi_reduction <add>, %48, %cst_59 [0] : vector<256x8xf32> to vector<8xf32>
    %50 = vector.shape_cast %49 : vector<8xf32> to vector<1x8xf32>
    %51 = arith.addf %47, %50 : vector<1x8xf32>
    %c1_60 = arith.constant 1 : index
    %c0_61 = arith.constant 0 : index
    %52 = vector.load %arg5[%c1_60, %c0_61] : memref<2x8xf32, #tpu.memory_space<vmem>>, vector<1x8xf32>
    tpu.vector_store %arg5[%c1_60, %c0_61], %51 {strides = array<i32>} : memref<2x8xf32, #tpu.memory_space<vmem>>, vector<1x8xf32>,
    %c0_62 = arith.constant 0 : index
    %c0_63 = arith.constant 0 : index
    %c0_64 = arith.constant 0 : index
    %53 = vector.load %arg4[%c0_62, %c0_63, %c0_64] : memref<1x256x8xf32, #tpu.memory_space<vmem>>, vector<1x256x8xf32>
    %54 = vector.shape_cast %53 : vector<1x256x8xf32> to vector<256x8xf32>
    %55 = vector.shape_cast %38 : vector<256x8xf32> to vector<1x256x8xf32>
    tpu.vector_store %arg4[%c0_62, %c0_63, %c0_64], %55 {strides = array<i32>} : memref<1x256x8xf32, #tpu.memory_space<vmem>>, vector<1x256x8xf32>,
    return
  }
  func.func @transform_0(%arg0: i32) -> (i32, i32, i32, i32) {
    %c0_i32 = arith.constant 0 : i32
    %c0_i32_0 = arith.constant 0 : i32
    %c0_i32_1 = arith.constant 0 : i32
    %c0_i32_2 = arith.constant 0 : i32
    return %arg0, %c0_i32, %c0_i32_0, %c0_i32_1 : i32, i32, i32, i32
  }
  func.func @transform_1(%arg0: i32) -> (i32, i32) {
    %c0_i32 = arith.constant 0 : i32
    %c0_i32_0 = arith.constant 0 : i32
    %c0_i32_1 = arith.constant 0 : i32
    return %c0_i32, %c0_i32_0 : i32, i32
  }
  func.func @transform_2(%arg0: i32) -> (i32, i32) {
    %c0_i32 = arith.constant 0 : i32
    %c0_i32_0 = arith.constant 0 : i32
    %c0_i32_1 = arith.constant 0 : i32
    return %c0_i32, %c0_i32_0 : i32, i32
  }
  func.func @transform_3(%arg0: i32) -> (i32, i32, i32) {
    %c0_i32 = arith.constant 0 : i32
    %c0_i32_0 = arith.constant 0 : i32
    %c0_i32_1 = arith.constant 0 : i32
    return %arg0, %c0_i32, %c0_i32_0 : i32, i32, i32
  }
  func.func @transform_4(%arg0: i32) -> (i32, i32) {
    %c0_i32 = arith.constant 0 : i32
    %c0_i32_0 = arith.constant 0 : i32
    %c0_i32_1 = arith.constant 0 : i32
    return %c0_i32, %c0_i32_0 : i32, i32
  }
}

module attributes {stable_mosaic.version = 11 : i64} {
  func.func @_affine_relu_kernel(%arg0: i32, %arg1: i32, %arg2: memref<1x16x128xf32, #tpu.memory_space<vmem>>, %arg3: memref<1x128xf32, #tpu.memory_space<vmem>>, %arg4: memref<1x128xf32, #tpu.memory_space<vmem>>, %arg5: memref<1x16x128xf32, #tpu.memory_space<vmem>>) attributes {dimension_semantics = [#tpu.dimension_semantics<parallel>, #tpu.dimension_semantics<parallel>], iteration_bounds = array<i64: 2, 1>, scalar_prefetch = 0 : i64, scratch_operands = 0 : i64, tpu.core_type = #tpu.core_type<tc>, window_params = [{transform_indices = @transform_0, window_bounds = array<i64: 1, 16, 128>}, {pipeline_mode = #tpu.pipeline_mode<synchronous>, transform_indices = @transform_1, window_bounds = array<i64: 1, 128>}, {pipeline_mode = #tpu.pipeline_mode<synchronous>, transform_indices = @transform_2, window_bounds = array<i64: 1, 128>}, {transform_indices = @transform_3, window_bounds = array<i64: 1, 16, 128>}]} {
    %c0 = arith.constant 0 : index
    %c0_0 = arith.constant 0 : index
    %c0_1 = arith.constant 0 : index
    %0 = vector.load %arg2[%c0, %c0_0, %c0_1] : memref<1x16x128xf32, #tpu.memory_space<vmem>>, vector<1x16x128xf32>
    %1 = vector.shape_cast %0 : vector<1x16x128xf32> to vector<16x128xf32>
    %c0_2 = arith.constant 0 : index
    %c0_3 = arith.constant 0 : index
    %2 = vector.load %arg3[%c0_2, %c0_3] : memref<1x128xf32, #tpu.memory_space<vmem>>, vector<1x128xf32>
    %3 = vector.broadcast %2 : vector<1x128xf32> to vector<16x128xf32>
    %4 = arith.mulf %1, %3 : vector<16x128xf32>
    %c0_4 = arith.constant 0 : index
    %c0_5 = arith.constant 0 : index
    %5 = vector.load %arg4[%c0_4, %c0_5] : memref<1x128xf32, #tpu.memory_space<vmem>>, vector<1x128xf32>
    %6 = vector.broadcast %5 : vector<1x128xf32> to vector<16x128xf32>
    %7 = arith.addf %4, %6 : vector<16x128xf32>
    %cst = arith.constant 0.000000e+00 : f32
    %8 = vector.broadcast %cst : f32 to vector<16x128xf32>
    %9 = arith.maximumf %7, %8 : vector<16x128xf32>
    %c0_6 = arith.constant 0 : index
    %c0_7 = arith.constant 0 : index
    %c0_8 = arith.constant 0 : index
    %10 = vector.load %arg5[%c0_6, %c0_7, %c0_8] : memref<1x16x128xf32, #tpu.memory_space<vmem>>, vector<1x16x128xf32>
    %11 = vector.shape_cast %10 : vector<1x16x128xf32> to vector<16x128xf32>
    %12 = vector.shape_cast %9 : vector<16x128xf32> to vector<1x16x128xf32>
    tpu.vector_store %arg5[%c0_6, %c0_7, %c0_8], %12 {strides = array<i32>} : memref<1x16x128xf32, #tpu.memory_space<vmem>>, vector<1x16x128xf32>,
    return
  }
  func.func @transform_0(%arg0: i32, %arg1: i32) -> (i32, i32, i32) {
    %c0_i32 = arith.constant 0 : i32
    %c0_i32_0 = arith.constant 0 : i32
    return %arg0, %arg1, %c0_i32 : i32, i32, i32
  }
  func.func @transform_1(%arg0: i32, %arg1: i32) -> (i32, i32) {
    %c0_i32 = arith.constant 0 : i32
    %c0_i32_0 = arith.constant 0 : i32
    %c0_i32_1 = arith.constant 0 : i32
    return %c0_i32, %c0_i32_0 : i32, i32
  }
  func.func @transform_2(%arg0: i32, %arg1: i32) -> (i32, i32) {
    %c0_i32 = arith.constant 0 : i32
    %c0_i32_0 = arith.constant 0 : i32
    %c0_i32_1 = arith.constant 0 : i32
    return %c0_i32, %c0_i32_0 : i32, i32
  }
  func.func @transform_3(%arg0: i32, %arg1: i32) -> (i32, i32, i32) {
    %c0_i32 = arith.constant 0 : i32
    %c0_i32_0 = arith.constant 0 : i32
    return %arg0, %arg1, %c0_i32 : i32, i32, i32
  }
}

module attributes {stable_mosaic.version = 11 : i64} {
  func.func @_conv_kernel(%arg0: i32, %arg1: memref<1x16x16x8xf32, #tpu.memory_space<vmem>>, %arg2: memref<72x8xbf16, #tpu.memory_space<vmem>>, %arg3: memref<1x8xf32, #tpu.memory_space<vmem>>, %arg4: memref<1x256x8xf32, #tpu.memory_space<vmem>>, %arg5: memref<2x8xf32, #tpu.memory_space<vmem>>, %arg6: memref<18x18x8xf32, #tpu.memory_space<vmem>>, %arg7: memref<256x72xf32, #tpu.memory_space<vmem>>) attributes {dimension_semantics = [#tpu.dimension_semantics<arbitrary>], iteration_bounds = array<i64: 2>, scalar_prefetch = 0 : i64, scratch_operands = 2 : i64, tpu.core_type = #tpu.core_type<tc>, window_params = [{transform_indices = @transform_0, window_bounds = array<i64: 1, 16, 16, 8>}, {pipeline_mode = #tpu.pipeline_mode<synchronous>, transform_indices = @transform_1, window_bounds = array<i64: 72, 8>}, {pipeline_mode = #tpu.pipeline_mode<synchronous>, transform_indices = @transform_2, window_bounds = array<i64: 1, 8>}, {transform_indices = @transform_3, window_bounds = array<i64: 1, 256, 8>}, {pipeline_mode = #tpu.pipeline_mode<synchronous>, transform_indices = @transform_4, window_bounds = array<i64: 2, 8>}]} {
    %cst = arith.constant 0.000000e+00 : f32
    %0 = vector.broadcast %cst : f32 to vector<18x18x8xf32>
    %c0 = arith.constant 0 : index
    %c0_0 = arith.constant 0 : index
    %c0_1 = arith.constant 0 : index
    %1 = vector.load %arg6[%c0, %c0_0, %c0_1] : memref<18x18x8xf32, #tpu.memory_space<vmem>>, vector<18x18x8xf32>
    tpu.vector_store %arg6[%c0, %c0_0, %c0_1], %0 {strides = array<i32>} : memref<18x18x8xf32, #tpu.memory_space<vmem>>, vector<18x18x8xf32>,
    %c0_2 = arith.constant 0 : index
    %c0_3 = arith.constant 0 : index
    %c0_4 = arith.constant 0 : index
    %c0_5 = arith.constant 0 : index
    %2 = vector.load %arg1[%c0_2, %c0_3, %c0_4, %c0_5] : memref<1x16x16x8xf32, #tpu.memory_space<vmem>>, vector<1x16x16x8xf32>
    %3 = vector.shape_cast %2 : vector<1x16x16x8xf32> to vector<16x16x8xf32>
    %c1 = arith.constant 1 : index
    %c1_6 = arith.constant 1 : index
    %c0_7 = arith.constant 0 : index
    %4 = vector.load %arg6[%c1, %c1_6, %c0_7] : memref<18x18x8xf32, #tpu.memory_space<vmem>>, vector<16x16x8xf32>
    tpu.vector_store %arg6[%c1, %c1_6, %c0_7], %3 {strides = array<i32>} : memref<18x18x8xf32, #tpu.memory_space<vmem>>, vector<16x16x8xf32>,
    %c0_8 = arith.constant 0 : index
    %c0_9 = arith.constant 0 : index
    %c0_10 = arith.constant 0 : index
    %5 = vector.load %arg6[%c0_8, %c0_9, %c0_10] : memref<18x18x8xf32, #tpu.memory_space<vmem>>, vector<16x16x8xf32>
    %6 = vector.shape_cast %5 : vector<16x16x8xf32> to vector<256x8xf32>
    %c0_11 = arith.constant 0 : index
    %c0_12 = arith.constant 0 : index
    %7 = vector.load %arg7[%c0_11, %c0_12] : memref<256x72xf32, #tpu.memory_space<vmem>>, vector<256x8xf32>
    tpu.vector_store %arg7[%c0_11, %c0_12], %6 {strides = array<i32>} : memref<256x72xf32, #tpu.memory_space<vmem>>, vector<256x8xf32>,
    %c0_13 = arith.constant 0 : index
    %c1_14 = arith.constant 1 : index
    %c0_15 = arith.constant 0 : index
    %8 = vector.load %arg6[%c0_13, %c1_14, %c0_15] : memref<18x18x8xf32, #tpu.memory_space<vmem>>, vector<16x16x8xf32>
    %9 = vector.shape_cast %8 : vector<16x16x8xf32> to vector<256x8xf32>
    %c0_16 = arith.constant 0 : index
    %c8 = arith.constant 8 : index
    %10 = vector.load %arg7[%c0_16, %c8] : memref<256x72xf32, #tpu.memory_space<vmem>>, vector<256x8xf32>
    tpu.vector_store %arg7[%c0_16, %c8], %9 {strides = array<i32>} : memref<256x72xf32, #tpu.memory_space<vmem>>, vector<256x8xf32>,
    %c0_17 = arith.constant 0 : index
    %c2 = arith.constant 2 : index
    %c0_18 = arith.constant 0 : index
    %11 = vector.load %arg6[%c0_17, %c2, %c0_18] : memref<18x18x8xf32, #tpu.memory_space<vmem>>, vector<16x16x8xf32>
    %12 = vector.shape_cast %11 : vector<16x16x8xf32> to vector<256x8xf32>
    %c0_19 = arith.constant 0 : index
    %c16 = arith.constant 16 : index
    %13 = vector.load %arg7[%c0_19, %c16] : memref<256x72xf32, #tpu.memory_space<vmem>>, vector<256x8xf32>
    tpu.vector_store %arg7[%c0_19, %c16], %12 {strides = array<i32>} : memref<256x72xf32, #tpu.memory_space<vmem>>, vector<256x8xf32>,
    %c1_20 = arith.constant 1 : index
    %c0_21 = arith.constant 0 : index
    %c0_22 = arith.constant 0 : index
    %14 = vector.load %arg6[%c1_20, %c0_21, %c0_22] : memref<18x18x8xf32, #tpu.memory_space<vmem>>, vector<16x16x8xf32>
    %15 = vector.shape_cast %14 : vector<16x16x8xf32> to vector<256x8xf32>
    %c0_23 = arith.constant 0 : index
    %c24 = arith.constant 24 : index
    %16 = vector.load %arg7[%c0_23, %c24] : memref<256x72xf32, #tpu.memory_space<vmem>>, vector<256x8xf32>
    tpu.vector_store %arg7[%c0_23, %c24], %15 {strides = array<i32>} : memref<256x72xf32, #tpu.memory_space<vmem>>, vector<256x8xf32>,
    %c1_24 = arith.constant 1 : index
    %c1_25 = arith.constant 1 : index
    %c0_26 = arith.constant 0 : index
    %17 = vector.load %arg6[%c1_24, %c1_25, %c0_26] : memref<18x18x8xf32, #tpu.memory_space<vmem>>, vector<16x16x8xf32>
    %18 = vector.shape_cast %17 : vector<16x16x8xf32> to vector<256x8xf32>
    %c0_27 = arith.constant 0 : index
    %c32 = arith.constant 32 : index
    %19 = vector.load %arg7[%c0_27, %c32] : memref<256x72xf32, #tpu.memory_space<vmem>>, vector<256x8xf32>
    tpu.vector_store %arg7[%c0_27, %c32], %18 {strides = array<i32>} : memref<256x72xf32, #tpu.memory_space<vmem>>, vector<256x8xf32>,
    %c1_28 = arith.constant 1 : index
    %c2_29 = arith.constant 2 : index
    %c0_30 = arith.constant 0 : index
    %20 = vector.load %arg6[%c1_28, %c2_29, %c0_30] : memref<18x18x8xf32, #tpu.memory_space<vmem>>, vector<16x16x8xf32>
    %21 = vector.shape_cast %20 : vector<16x16x8xf32> to vector<256x8xf32>
    %c0_31 = arith.constant 0 : index
    %c40 = arith.constant 40 : index
    %22 = vector.load %arg7[%c0_31, %c40] : memref<256x72xf32, #tpu.memory_space<vmem>>, vector<256x8xf32>
    tpu.vector_store %arg7[%c0_31, %c40], %21 {strides = array<i32>} : memref<256x72xf32, #tpu.memory_space<vmem>>, vector<256x8xf32>,
    %c2_32 = arith.constant 2 : index
    %c0_33 = arith.constant 0 : index
    %c0_34 = arith.constant 0 : index
    %23 = vector.load %arg6[%c2_32, %c0_33, %c0_34] : memref<18x18x8xf32, #tpu.memory_space<vmem>>, vector<16x16x8xf32>
    %24 = vector.shape_cast %23 : vector<16x16x8xf32> to vector<256x8xf32>
    %c0_35 = arith.constant 0 : index
    %c48 = arith.constant 48 : index
    %25 = vector.load %arg7[%c0_35, %c48] : memref<256x72xf32, #tpu.memory_space<vmem>>, vector<256x8xf32>
    tpu.vector_store %arg7[%c0_35, %c48], %24 {strides = array<i32>} : memref<256x72xf32, #tpu.memory_space<vmem>>, vector<256x8xf32>,
    %c2_36 = arith.constant 2 : index
    %c1_37 = arith.constant 1 : index
    %c0_38 = arith.constant 0 : index
    %26 = vector.load %arg6[%c2_36, %c1_37, %c0_38] : memref<18x18x8xf32, #tpu.memory_space<vmem>>, vector<16x16x8xf32>
    %27 = vector.shape_cast %26 : vector<16x16x8xf32> to vector<256x8xf32>
    %c0_39 = arith.constant 0 : index
    %c56 = arith.constant 56 : index
    %28 = vector.load %arg7[%c0_39, %c56] : memref<256x72xf32, #tpu.memory_space<vmem>>, vector<256x8xf32>
    tpu.vector_store %arg7[%c0_39, %c56], %27 {strides = array<i32>} : memref<256x72xf32, #tpu.memory_space<vmem>>, vector<256x8xf32>,
    %c2_40 = arith.constant 2 : index
    %c2_41 = arith.constant 2 : index
    %c0_42 = arith.constant 0 : index
    %29 = vector.load %arg6[%c2_40, %c2_41, %c0_42] : memref<18x18x8xf32, #tpu.memory_space<vmem>>, vector<16x16x8xf32>
    %30 = vector.shape_cast %29 : vector<16x16x8xf32> to vector<256x8xf32>
    %c0_43 = arith.constant 0 : index
    %c64 = arith.constant 64 : index
    %31 = vector.load %arg7[%c0_43, %c64] : memref<256x72xf32, #tpu.memory_space<vmem>>, vector<256x8xf32>
    tpu.vector_store %arg7[%c0_43, %c64], %30 {strides = array<i32>} : memref<256x72xf32, #tpu.memory_space<vmem>>, vector<256x8xf32>,
    %c0_44 = arith.constant 0 : index
    %c0_45 = arith.constant 0 : index
    %32 = vector.load %arg7[%c0_44, %c0_45] : memref<256x72xf32, #tpu.memory_space<vmem>>, vector<256x72xf32>
    %33 = arith.truncf %32 : vector<256x72xf32> to vector<256x72xbf16>
    %c0_46 = arith.constant 0 : index
    %c0_47 = arith.constant 0 : index
    %34 = vector.load %arg2[%c0_46, %c0_47] : memref<72x8xbf16, #tpu.memory_space<vmem>>, vector<72x8xbf16>
    %cst_48 = arith.constant dense<0.000000e+00> : vector<256x8xf32>
    %35 = tpu.matmul %33, %34, %cst_48 {dimension_numbers = #tpu.dot_dimension_numbers<[1], [0], [0], [1], [0, 0, 1, 1], [], []>} : vector<256x72xbf16>, vector<72x8xbf16>, vector<256x8xf32> -> vector<256x8xf32>
    %c0_49 = arith.constant 0 : index
    %c0_50 = arith.constant 0 : index
    %36 = vector.load %arg3[%c0_49, %c0_50] : memref<1x8xf32, #tpu.memory_space<vmem>>, vector<1x8xf32>
    %37 = vector.broadcast %36 : vector<1x8xf32> to vector<256x8xf32>
    %38 = arith.addf %35, %37 : vector<256x8xf32>
    %c0_i32 = arith.constant 0 : i32
    %39 = arith.cmpi eq, %arg0, %c0_i32 : i32
    %40 = arith.extui %39 : i1 to i32
    %c0_i32_51 = arith.constant 0 : i32
    %41 = arith.cmpi ne, %40, %c0_i32_51 : i32
    scf.if %41 {
      %cst_65 = arith.constant 0.000000e+00 : f32
      %56 = vector.broadcast %cst_65 : f32 to vector<2x8xf32>
      %c0_66 = arith.constant 0 : index
      %c0_67 = arith.constant 0 : index
      %57 = vector.load %arg5[%c0_66, %c0_67] : memref<2x8xf32, #tpu.memory_space<vmem>>, vector<2x8xf32>
      tpu.vector_store %arg5[%c0_66, %c0_67], %56 {strides = array<i32>} : memref<2x8xf32, #tpu.memory_space<vmem>>, vector<2x8xf32>,
    } else {
    }
    %c0_52 = arith.constant 0 : index
    %c0_53 = arith.constant 0 : index
    %42 = vector.load %arg5[%c0_52, %c0_53] : memref<2x8xf32, #tpu.memory_space<vmem>>, vector<1x8xf32>
    %cst_54 = arith.constant dense<0.000000e+00> : vector<8xf32>
    %43 = vector.multi_reduction <add>, %38, %cst_54 [0] : vector<256x8xf32> to vector<8xf32>
    %44 = vector.shape_cast %43 : vector<8xf32> to vector<1x8xf32>
    %45 = arith.addf %42, %44 : vector<1x8xf32>
    %c0_55 = arith.constant 0 : index
    %c0_56 = arith.constant 0 : index
    %46 = vector.load %arg5[%c0_55, %c0_56] : memref<2x8xf32, #tpu.memory_space<vmem>>, vector<1x8xf32>
    tpu.vector_store %arg5[%c0_55, %c0_56], %45 {strides = array<i32>} : memref<2x8xf32, #tpu.memory_space<vmem>>, vector<1x8xf32>,
    %c1_57 = arith.constant 1 : index
    %c0_58 = arith.constant 0 : index
    %47 = vector.load %arg5[%c1_57, %c0_58] : memref<2x8xf32, #tpu.memory_space<vmem>>, vector<1x8xf32>
    %48 = arith.mulf %38, %38 : vector<256x8xf32>
    %cst_59 = arith.constant dense<0.000000e+00> : vector<8xf32>
    %49 = vector.multi_reduction <add>, %48, %cst_59 [0] : vector<256x8xf32> to vector<8xf32>
    %50 = vector.shape_cast %49 : vector<8xf32> to vector<1x8xf32>
    %51 = arith.addf %47, %50 : vector<1x8xf32>
    %c1_60 = arith.constant 1 : index
    %c0_61 = arith.constant 0 : index
    %52 = vector.load %arg5[%c1_60, %c0_61] : memref<2x8xf32, #tpu.memory_space<vmem>>, vector<1x8xf32>
    tpu.vector_store %arg5[%c1_60, %c0_61], %51 {strides = array<i32>} : memref<2x8xf32, #tpu.memory_space<vmem>>, vector<1x8xf32>,
    %c0_62 = arith.constant 0 : index
    %c0_63 = arith.constant 0 : index
    %c0_64 = arith.constant 0 : index
    %53 = vector.load %arg4[%c0_62, %c0_63, %c0_64] : memref<1x256x8xf32, #tpu.memory_space<vmem>>, vector<1x256x8xf32>
    %54 = vector.shape_cast %53 : vector<1x256x8xf32> to vector<256x8xf32>
    %55 = vector.shape_cast %38 : vector<256x8xf32> to vector<1x256x8xf32>
    tpu.vector_store %arg4[%c0_62, %c0_63, %c0_64], %55 {strides = array<i32>} : memref<1x256x8xf32, #tpu.memory_space<vmem>>, vector<1x256x8xf32>,
    return
  }
  func.func @transform_0(%arg0: i32) -> (i32, i32, i32, i32) {
    %c0_i32 = arith.constant 0 : i32
    %c0_i32_0 = arith.constant 0 : i32
    %c0_i32_1 = arith.constant 0 : i32
    %c0_i32_2 = arith.constant 0 : i32
    return %arg0, %c0_i32, %c0_i32_0, %c0_i32_1 : i32, i32, i32, i32
  }
  func.func @transform_1(%arg0: i32) -> (i32, i32) {
    %c0_i32 = arith.constant 0 : i32
    %c0_i32_0 = arith.constant 0 : i32
    %c0_i32_1 = arith.constant 0 : i32
    return %c0_i32, %c0_i32_0 : i32, i32
  }
  func.func @transform_2(%arg0: i32) -> (i32, i32) {
    %c0_i32 = arith.constant 0 : i32
    %c0_i32_0 = arith.constant 0 : i32
    %c0_i32_1 = arith.constant 0 : i32
    return %c0_i32, %c0_i32_0 : i32, i32
  }
  func.func @transform_3(%arg0: i32) -> (i32, i32, i32) {
    %c0_i32 = arith.constant 0 : i32
    %c0_i32_0 = arith.constant 0 : i32
    %c0_i32_1 = arith.constant 0 : i32
    return %arg0, %c0_i32, %c0_i32_0 : i32, i32, i32
  }
  func.func @transform_4(%arg0: i32) -> (i32, i32) {
    %c0_i32 = arith.constant 0 : i32
    %c0_i32_0 = arith.constant 0 : i32
    %c0_i32_1 = arith.constant 0 : i32
    return %c0_i32, %c0_i32_0 : i32, i32
  }
}

module attributes {stable_mosaic.version = 11 : i64} {
  func.func @_affine_relu_pool_kernel(%arg0: i32, %arg1: i32, %arg2: memref<1x2x16x8xf32, #tpu.memory_space<vmem>>, %arg3: memref<1x8xf32, #tpu.memory_space<vmem>>, %arg4: memref<1x8xf32, #tpu.memory_space<vmem>>, %arg5: memref<1x1x8x8xf32, #tpu.memory_space<vmem>>, %arg6: memref<16x8xf32, #tpu.memory_space<vmem>>) attributes {dimension_semantics = [#tpu.dimension_semantics<parallel>, #tpu.dimension_semantics<parallel>], iteration_bounds = array<i64: 2, 8>, scalar_prefetch = 0 : i64, scratch_operands = 1 : i64, tpu.core_type = #tpu.core_type<tc>, window_params = [{transform_indices = @transform_0, window_bounds = array<i64: 1, 2, 16, 8>}, {pipeline_mode = #tpu.pipeline_mode<synchronous>, transform_indices = @transform_1, window_bounds = array<i64: 1, 8>}, {pipeline_mode = #tpu.pipeline_mode<synchronous>, transform_indices = @transform_2, window_bounds = array<i64: 1, 8>}, {transform_indices = @transform_3, window_bounds = array<i64: 1, 1, 8, 8>}]} {
    %c0 = arith.constant 0 : index
    %c0_0 = arith.constant 0 : index
    %c0_1 = arith.constant 0 : index
    %c0_2 = arith.constant 0 : index
    %0 = vector.load %arg2[%c0, %c0_0, %c0_1, %c0_2] : memref<1x2x16x8xf32, #tpu.memory_space<vmem>>, vector<1x2x16x8xf32>
    %1 = vector.shape_cast %0 : vector<1x2x16x8xf32> to vector<2x16x8xf32>
    %c0_3 = arith.constant 0 : index
    %c0_4 = arith.constant 0 : index
    %2 = vector.load %arg3[%c0_3, %c0_4] : memref<1x8xf32, #tpu.memory_space<vmem>>, vector<1x8xf32>
    %3 = vector.shape_cast %2 : vector<1x8xf32> to vector<1x1x8xf32>
    %4 = vector.broadcast %3 : vector<1x1x8xf32> to vector<2x16x8xf32>
    %5 = arith.mulf %1, %4 : vector<2x16x8xf32>
    %c0_5 = arith.constant 0 : index
    %c0_6 = arith.constant 0 : index
    %6 = vector.load %arg4[%c0_5, %c0_6] : memref<1x8xf32, #tpu.memory_space<vmem>>, vector<1x8xf32>
    %7 = vector.shape_cast %6 : vector<1x8xf32> to vector<1x1x8xf32>
    %8 = vector.broadcast %7 : vector<1x1x8xf32> to vector<2x16x8xf32>
    %9 = arith.addf %5, %8 : vector<2x16x8xf32>
    %cst = arith.constant 0.000000e+00 : f32
    %10 = vector.broadcast %cst : f32 to vector<2x16x8xf32>
    %11 = arith.maximumf %9, %10 : vector<2x16x8xf32>
    %12 = vector.extract_strided_slice %11 {offsets = [0, 0, 0], sizes = [1, 16, 8], strides = [1, 1, 1]} : vector<2x16x8xf32> to vector<1x16x8xf32>
    %13 = vector.shape_cast %12 : vector<1x16x8xf32> to vector<16x8xf32>
    %14 = vector.extract_strided_slice %11 {offsets = [1, 0, 0], sizes = [1, 16, 8], strides = [1, 1, 1]} : vector<2x16x8xf32> to vector<1x16x8xf32>
    %15 = vector.shape_cast %14 : vector<1x16x8xf32> to vector<16x8xf32>
    %16 = arith.maximumf %13, %15 : vector<16x8xf32>
    %c0_7 = arith.constant 0 : index
    %c0_8 = arith.constant 0 : index
    %17 = vector.load %arg6[%c0_7, %c0_8] : memref<16x8xf32, #tpu.memory_space<vmem>>, vector<16x8xf32>
    tpu.vector_store %arg6[%c0_7, %c0_8], %16 {strides = array<i32>} : memref<16x8xf32, #tpu.memory_space<vmem>>, vector<16x8xf32>,
    %c0_9 = arith.constant 0 : index
    %c0_10 = arith.constant 0 : index
    %18 = tpu.strided_load %arg6[%c0_9, %c0_10] {strides = array<i32: 2, 1>} : memref<16x8xf32, #tpu.memory_space<vmem>>, vector<8x8xf32>
    %c1 = arith.constant 1 : index
    %c0_11 = arith.constant 0 : index
    %19 = tpu.strided_load %arg6[%c1, %c0_11] {strides = array<i32: 2, 1>} : memref<16x8xf32, #tpu.memory_space<vmem>>, vector<8x8xf32>
    %20 = arith.maximumf %18, %19 : vector<8x8xf32>
    %c0_12 = arith.constant 0 : index
    %c0_13 = arith.constant 0 : index
    %c0_14 = arith.constant 0 : index
    %c0_15 = arith.constant 0 : index
    %21 = vector.load %arg5[%c0_12, %c0_13, %c0_14, %c0_15] : memref<1x1x8x8xf32, #tpu.memory_space<vmem>>, vector<1x1x8x8xf32>
    %22 = vector.shape_cast %21 : vector<1x1x8x8xf32> to vector<8x8xf32>
    %23 = vector.shape_cast %20 : vector<8x8xf32> to vector<1x1x8x8xf32>
    tpu.vector_store %arg5[%c0_12, %c0_13, %c0_14, %c0_15], %23 {strides = array<i32>} : memref<1x1x8x8xf32, #tpu.memory_space<vmem>>, vector<1x1x8x8xf32>,
    return
  }
  func.func @transform_0(%arg0: i32, %arg1: i32) -> (i32, i32, i32, i32) {
    %c0_i32 = arith.constant 0 : i32
    %c0_i32_0 = arith.constant 0 : i32
    %c0_i32_1 = arith.constant 0 : i32
    return %arg0, %arg1, %c0_i32, %c0_i32_0 : i32, i32, i32, i32
  }
  func.func @transform_1(%arg0: i32, %arg1: i32) -> (i32, i32) {
    %c0_i32 = arith.constant 0 : i32
    %c0_i32_0 = arith.constant 0 : i32
    %c0_i32_1 = arith.constant 0 : i32
    return %c0_i32, %c0_i32_0 : i32, i32
  }
  func.func @transform_2(%arg0: i32, %arg1: i32) -> (i32, i32) {
    %c0_i32 = arith.constant 0 : i32
    %c0_i32_0 = arith.constant 0 : i32
    %c0_i32_1 = arith.constant 0 : i32
    return %c0_i32, %c0_i32_0 : i32, i32
  }
  func.func @transform_3(%arg0: i32, %arg1: i32) -> (i32, i32, i32, i32) {
    %c0_i32 = arith.constant 0 : i32
    %c0_i32_0 = arith.constant 0 : i32
    %c0_i32_1 = arith.constant 0 : i32
    return %arg0, %arg1, %c0_i32, %c0_i32_0 : i32, i32, i32, i32
  }
}

</mosaic_0001>

<bundles_post_ra>
// kernel: tile.13
= control target key start
LH: loop header
LB: loop body
LE: loop exit
PB: predicated region body
PF: predicated region fallthrough
CT: control target
= control target key end

     0   :  { %s28_s0 = inlined_call_operand.vmem [shape: f32[8], index: 0, kind: input, shape index: {}]   ;;  %s29_s1 = inlined_call_operand.vmem [shape: f32[16,8], index: 1, kind: output, shape index: {}]  }
   0x1   :  { %v4_v0 = vld [vmem:[%s28_s0] ss:$0 sm:$0xff] }
   0x2   :  { %5 = vst [vmem:[%s29_s1] sm:$0xff] %v4_v0  ;;  %8 = vst [vmem:[%s29_s1 + $0x8] sm:$0xff] %v4_v0 }

// kernel: tile.14
= control target key start
LH: loop header
LB: loop body
LE: loop exit
PB: predicated region body
PF: predicated region fallthrough
CT: control target
= control target key end

     0   :  { %s131_s10 = smov 120   ;;  %s132_s11 = smov 104   ;;  %vm3_vm0 = vcmask 64512   ;;  %vm9_vm1 = vcmask 1048512   ;;  %vm15_vm2 = vcmask 982912   ;;  %vm21_vm3 = vcmask 917312   ;;  %s207_s0 = inlined_call_operand.vmem [shape: f32[16,8], index: 0, kind: input, shape index: {}]   ;;  %s208_s1 = inlined_call_operand.vmem [shape: f32[1,128], index: 1, kind: output, shape index: {}]  }
   0x1   :  { %v101_v0 = vld [vmem:[%s207_s0 + $0xf] sm:$0x1]   ;;  %v103_v1 = vld [vmem:[%s207_s0 + $0xd] sm:$0x1]   ;;  %v102_v2 = vld [vmem:[%s207_s0 + $0xe] sm:$0x1]  }
   0x2   :  { %7 = vrot.lane.b32.xlu0 %v101_v0, %s131_s10  ;;  %19 = vrot.lane.b32.xlu1 %v103_v1, %s132_s11  ;;  %v104_v3 = vld [vmem:[%s207_s0 + $0xc] sm:$0x1]   ;;  %s133_s16 = smov 112   ;;  %s134_s17 = smov 96   ;;  %v105_v4 = vld [vmem:[%s207_s0 + $0xb] sm:$0x1]  }
   0x3   :  { %v106_v5 = vld [vmem:[%s207_s0 + $0xa] sm:$0x1]   ;;  %v2_v6 = vld [vmem:[%s207_s0] sm:$0x1]   ;;  %s135_s24 = smov 88   ;;  %s136_s25 = smov 80  }
   0x4   :  { %4 = vst.msk [vmem:[#allocation0] sm:$0x1] %vm3_vm0, %v2_v6   ;;  %v107_v7 = vld [vmem:[%s207_s0 + $0x9] sm:$0x1]   ;;  %v108_v8 = vld [vmem:[%s207_s0 + $0x8] sm:$0x1]  }
   0x5   :  { %s137_s30 = smov 72   ;;  %s138_s2 = smov 64   ;;  %v109_v9 = vld [vmem:[%s207_s0 + $0x7] sm:$0x1]   ;;  %v110_v10 = vld [vmem:[%s207_s0 + $0x6] sm:$0x1]  }
   0x6   :  { %13 = vrot.lane.b32.xlu0 %v102_v2, %s133_s16  ;;  %25 = vrot.lane.b32.xlu1 %v104_v3, %s134_s17  ;;  %s139_s7 = smov 56   ;;  %s140_s8 = smov 48   ;;  %v111_v11 = vld [vmem:[%s207_s0 + $0x5] sm:$0x1]   ;;  %v112_v12 = vld [vmem:[%s207_s0 + $0x4] sm:$0x1]  }
   0x7   :  { %s141_s13 = smov 40   ;;  %s142_s14 = smov 32   ;;  %v113_v13 = vld [vmem:[%s207_s0 + $0x3] sm:$0x1]   ;;  %v114_v14 = vld [vmem:[%s207_s0 + $0x2] sm:$0x1]  }
   0x8   :  { %s143_s19 = smov 24   ;;  %s144_s20 = smov 16   ;;  %v115_v15 = vld [vmem:[%s207_s0 + $0x1] sm:$0x1]   ;;  %vm27_vm4 = vcmask 851712   ;;  %vm33_vm5 = vcmask 786112  }
   0x9   :  { %s145_s0 = smov 8   ;;  %vm39_vm6 = vcmask 720512   ;;  %vm45_vm7 = vcmask 654912   ;;  %vm51_vm8 = vcmask 589312   ;;  %vm57_vm9 = vcmask 523712  }
   0xa   :  { %31 = vrot.lane.b32.xlu0 %v105_v4, %s135_s24  ;;  %37 = vrot.lane.b32.xlu1 %v106_v5, %s136_s25  ;;  %vm63_vm10 = vcmask 458112   ;;  %vm69_vm11 = vcmask 392512   ;;  %vm75_vm12 = vcmask 326912   ;;  %vm81_vm13 = vcmask 261312  }
   0xb   :  { %vm87_vm14 = vcmask 195712   ;;  %vm93_vm15 = vcmask 130112  }
   0xe   :  { %43 = vrot.lane.b32.xlu0 %v107_v7, %s137_s30  ;;  %49 = vrot.lane.b32.xlu1 %v108_v8, %s138_s2 }
  0x12   :  { %55 = vrot.lane.b32.xlu0 %v109_v9, %s139_s7  ;;  %61 = vrot.lane.b32.xlu1 %v110_v10, %s140_s8 }
  0x16   :  { %67 = vrot.lane.b32.xlu0 %v111_v11, %s141_s13  ;;  %73 = vrot.lane.b32.xlu1 %v112_v12, %s142_s14 }
  0x1a   :  { %79 = vrot.lane.b32.xlu0 %v113_v13, %s143_s19  ;;  %85 = vrot.lane.b32.xlu1 %v114_v14, %s144_s20 }
  0x1e   :  { %91 = vrot.lane.b32.xlu0 %v115_v15, %s145_s0 }
  0x74   :  { %v8_v16 = vpop.permute.xlu0 %7   ;;  %v20_v17 = vpop.permute.xlu1 %19  }
  0x75   :  { %10 = vst.msk [vmem:[#allocation0] sm:$0x1] %vm9_vm1, %v8_v16  }
  0x78   :  { %v14_v18 = vpop.permute.xlu0 %13   ;;  %v26_v19 = vpop.permute.xlu1 %25  }
  0x79   :  { %16 = vst.msk [vmem:[#allocation0] sm:$0x1] %vm15_vm2, %v14_v18  }
  0x7a   :  { %22 = vst.msk [vmem:[#allocation0] sm:$0x1] %vm21_vm3, %v20_v17  }
  0x7b   :  { %28 = vst.msk [vmem:[#allocation0] sm:$0x1] %vm27_vm4, %v26_v19  }
  0x7c   :  { %v32_v20 = vpop.permute.xlu0 %31   ;;  %v38_v21 = vpop.permute.xlu1 %37  }
  0x7d   :  { %34 = vst.msk [vmem:[#allocation0] sm:$0x1] %vm33_vm5, %v32_v20  }
  0x7e   :  { %40 = vst.msk [vmem:[#allocation0] sm:$0x1] %vm39_vm6, %v38_v21  }
  0x80   :  { %v44_v22 = vpop.permute.xlu0 %43   ;;  %v50_v23 = vpop.permute.xlu1 %49  }
  0x81   :  { %46 = vst.msk [vmem:[#allocation0] sm:$0x1] %vm45_vm7, %v44_v22  }
  0x82   :  { %52 = vst.msk [vmem:[#allocation0] sm:$0x1] %vm51_vm8, %v50_v23  }
  0x84   :  { %v56_v24 = vpop.permute.xlu0 %55   ;;  %v62_v25 = vpop.permute.xlu1 %61  }
  0x85   :  { %58 = vst.msk [vmem:[#allocation0] sm:$0x1] %vm57_vm9, %v56_v24  }
  0x86   :  { %64 = vst.msk [vmem:[#allocation0] sm:$0x1] %vm63_vm10, %v62_v25  }
  0x88   :  { %v68_v26 = vpop.permute.xlu0 %67   ;;  %v74_v27 = vpop.permute.xlu1 %73  }
  0x89   :  { %70 = vst.msk [vmem:[#allocation0] sm:$0x1] %vm69_vm11, %v68_v26  }
  0x8a   :  { %76 = vst.msk [vmem:[#allocation0] sm:$0x1] %vm75_vm12, %v74_v27  }
  0x8c   :  { %v80_v28 = vpop.permute.xlu0 %79   ;;  %v86_v29 = vpop.permute.xlu1 %85  }
  0x8d   :  { %82 = vst.msk [vmem:[#allocation0] sm:$0x1] %vm81_vm13, %v80_v28  }
  0x8e   :  { %88 = vst.msk [vmem:[#allocation0] sm:$0x1] %vm87_vm14, %v86_v29  }
  0x90   :  { %v92_v30 = vpop.permute.xlu0 %91  }
  0x91   :  { %94 = vst.msk [vmem:[#allocation0] sm:$0x1] %vm93_vm15, %v92_v30  }
  0x98   :  { %v98_v31 = vld [vmem:[#allocation0] sm:$0x1] }
  0x99   :  { %100 = vst [vmem:[%s208_s1] sm:$0x1] %v98_v31 }

// kernel: _lambda_.5
= control target key start
LH: loop header
LB: loop body
LE: loop exit
PB: predicated region body
PF: predicated region fallthrough
CT: control target
= control target key end

     0   :  { %s404_s12 = smov 0   ;;  %s406_s13 = smov 0   ;;  %s436_s0 = inlined_call_operand.vmem [shape: f32[2,16,128], index: 0, kind: input, shape index: {}]   ;;  %s437_s1 = inlined_call_operand.vmem [shape: f32[1,128], index: 1, kind: input, shape index: {}]   ;;  %s438_s2 = inlined_call_operand.vmem [shape: f32[1,128], index: 2, kind: input, shape index: {}]   ;;  %s439_s3 = inlined_call_operand.vmem [shape: f32[2,16,128], index: 3, kind: output, shape index: {}]  }
   0x1   :  { %s408_s14 = smov 0  }
   0x2 LB: > { %s25_s15 = sadd.s32 1, %s378_s13  ;;  %p325_p0 = scmp.ge.s32.totalorder %s382_s14, 1  ;;  %s382_s14 = sphi %s408_s14, %s13_s14   ;;  %s378_s13 = sphi %s406_s13, %s441_s13   ;;  %s374_s12 = sphi %s404_s12, %s440_s12  }
   0x3   : > { %p27_p1 = scmp.ge.s32.totalorder %s25_s15, 2  ;;  %p158_p2 = scmp.lt.s32.totalorder %s382_s14, 3 }
   0x5   : > { %s443_s15 = smov (%p27_p1, %s25_s15), 0  ;;  %p159_p3 = pnand %p325_p0, %p158_p2 }
   0x6   : > { %p191_p4 = scmp.lt.s32.totalorder (!%p159_p3), %s374_s12, 1  ;;  %v330_v0 = vld [vmem:[%s437_s1] ss:$0 sm:$0xff] (!%p159_p3) }
   0x7   : > { %162 = sbr.rel (%p159_p3) target bundleno = 25 (0x19), region = 32  ;;  %v331_v3 = vld [vmem:[%s438_s2] ss:$0 sm:$0xff] (!%p159_p3) }
   0xe   : > { %s445_s12 = smov (!%p191_p4, %s374_s12), 1 }
   0xf   : > { %s334_s16 = sshll.u32 %s445_s12, 4 }
  0x10   : > { %s198_s21 = scalar_lea.vmem %s436_s0, %s334_s16  ;;  %s208_s26 = scalar_lea.vmem %s439_s3, %s334_s16 }
  0x11   : > { %v210_v1 = vld [vmem:[%s198_s21] sm:$0xff]  ;;  %v211_v2 = vld [vmem:[%s198_s21 + $0x8] sm:$0xff] }
  0x12   : > { %v219_v4 = vmul.f32 %v330_v0, %v210_v1  ;;  %v220_v5 = vmul.f32 %v330_v0, %v211_v2 }
  0x14   : > { %v228_v6 = vadd.f32 %v331_v3, %v219_v4  ;;  %v229_v7 = vadd.f32 %v331_v3, %v220_v5 }
  0x16   : > { %v230_v8 = vmax.f32 %v228_v6, 0.0  ;;  %v231_v9 = vmax.f32 %v229_v7, 0.0 }
  0x18   : > { %232 = vst [vmem:[%s208_s26] sm:$0xff] %v230_v8  ;;  %233 = vst [vmem:[%s208_s26 + $0x8] sm:$0xff] %v231_v9 }
  0x19 PF: > { %s13_s14 = sadd.s32 1, %s382_s14   ;;  %s440_s12 = smov %s378_s13 }
  0x1a   : > { %p10_p5 = scmp.ge.s32.totalorder %s13_s14, 4   ;;  %s441_s13 = smov %s443_s15 }
  0x1c   :  { %12 = sbr.rel (!%p10_p5) target bundleno = 2 (0x2), region = 62 }

// kernel: _lambda_.7
= control target key start
LH: loop header
LB: loop body
LE: loop exit
PB: predicated region body
PF: predicated region fallthrough
CT: control target
= control target key end

     0   :  { %s454_s12 = smov 0   ;;  %s456_s13 = smov 0   ;;  %s520_s0 = inlined_call_operand.vmem [shape: f32[2,16,16,8], index: 0, kind: input, shape index: {}]   ;;  %s521_s1 = inlined_call_operand.vmem [shape: f32[1,8], index: 1, kind: input, shape index: {}]   ;;  %s522_s2 = inlined_call_operand.vmem [shape: f32[1,8], index: 2, kind: input, shape index: {}]   ;;  %s523_s3 = inlined_call_operand.vmem [shape: f32[2,8,8,8], index: 3, kind: output, shape index: {}]  }
   0x1   :  { %s458_s14 = smov 0   ;;  %s460_s15 = smov 0  }
   0x2   :  { %s462_s16 = smov 0  }
   0x3 LB: > { %s22_s17 = sadd.s32 1, %s424_s14  ;;  %s25_s18 = sadd.s32 1, %s428_s15  ;;  %s432_s16 = sphi %s462_s16, %s13_s16   ;;  %s428_s15 = sphi %s460_s15, %s527_s15   ;;  %s424_s14 = sphi %s458_s14, %s526_s14   ;;  %s420_s13 = sphi %s456_s13, %s525_s13   ;;  %s416_s12 = sphi %s454_s12, %s524_s12  }
   0x4   : > { %p23_p0 = scmp.ge.s32.totalorder %s22_s17, 8  ;;  %p343_p1 = scmp.ge.s32.totalorder %s432_s16, 1 }
   0x5   : > { %p159_p2 = scmp.lt.s32.totalorder %s432_s16, 17 }
   0x6   : > { %s529_s17 = smov (%p23_p0, %s22_s17), 0  ;;  %s531_s18 = smov (!%p23_p0, %s25_s18), %s428_s15 }
   0x7   : > { %p160_p3 = pnand %p343_p1, %p159_p2  ;;  %p27_p4 = scmp.ge.s32.totalorder %s531_s18, 2 }
   0x8   : > { %s344_s19 = sshll.u32 (!%p160_p3), %s416_s12, 1  ;;  %p192_p5 = scmp.lt.s32.totalorder (!%p160_p3), %s420_s13, 1  ;;  %v350_v0 = vld [vmem:[%s521_s1] ss:$0 sm:$0xff] (!%p160_p3)  ;;  %vm242_vm0 = vcmask (!%p160_p3), 64512  }
   0x9   : > { %s533_s18 = smov (%p27_p4, %s531_s18), 0  ;;  %163 = sbr.rel (%p160_p3) target bundleno = 42 (0x2a), region = 32 }
   0xa   : > { %p194_p6 = scmp.lt.s32.totalorder (!%p160_p3), %s344_s19, 15  ;;  %v351_v1 = vld [vmem:[%s522_s2] ss:$0 sm:$0xff] (!%p160_p3)  ;;  %p204_p7 = scmp.lt.s32.totalorder (!%p160_p3), %s416_s12, 7 }
  0x10   : > { %s535_s13 = smov (!%p192_p5, %s420_s13), 1  ;;  %s537_s19 = smov (!%p194_p6, %s344_s19), 15 }
  0x11   : > { %s346_s20 = sshll.u32 %s535_s13, 5  ;;  %s345_s21 = sshll.u32 %s537_s19, 1 }
  0x12   : > { %s198_s22 = sadd.s32 %s346_s20, %s345_s21  ;;  %s539_s12 = smov (!%p204_p7, %s416_s12), 7 }
  0x13   : > { %s347_s23 = sshll.u32 %s198_s22, 3  ;;  %s348_s4 = sshll.u32 %s535_s13, 3 }
  0x14   : > { %s200_s28 = scalar_lea.vmem %s520_s0, %s347_s23  ;;  %s207_s5 = sadd.s32 %s348_s4, %s539_s12 }
  0x15   : > { %v210_v2 = vld [vmem:[%s200_s28] sm:$0xff]  ;;  %v212_v3 = vld [vmem:[%s200_s28 + $0x10] sm:$0xff]  ;;  %v211_v4 = vld [vmem:[%s200_s28 + $0x8] sm:$0xff]  ;;  %s349_s6 = sshll.u32 %s207_s5, 3 }
  0x16   : > { %v221_v5 = vmul.f32 %v350_v0, %v210_v2  ;;  %v223_v6 = vmul.f32 %v350_v0, %v212_v3  ;;  %v213_v7 = vld [vmem:[%s200_s28 + $0x18] sm:$0xff]  ;;  %v222_v8 = vmul.f32 %v350_v0, %v211_v4  ;;  %s209_s9 = scalar_lea.vmem %s523_s3, %s349_s6 }
  0x17   : > { %v224_v9 = vmul.f32 %v350_v0, %v213_v7 }
  0x18   : > { %v232_v10 = vadd.f32 %v351_v1, %v221_v5  ;;  %v234_v11 = vadd.f32 %v351_v1, %v223_v6  ;;  %v233_v12 = vadd.f32 %v351_v1, %v222_v8 }
  0x19   : > { %v235_v13 = vadd.f32 %v351_v1, %v224_v9 }
  0x1a   : > { %v236_v14 = vmax.f32 %v232_v10, 0.0  ;;  %v238_v15 = vmax.f32 %v234_v11, 0.0  ;;  %v237_v16 = vmax.f32 %v233_v12, 0.0 }
  0x1b   : > { %v239_v17 = vmax.f32 %v235_v13, 0.0 }
  0x1c   : > { %v240_v18 = vmax.f32 %v236_v14, %v238_v15 }
  0x1d   : > { %v241_v19 = vmax.f32 %v237_v16, %v239_v17 }
  0x1e   : > { %243 = vst.msk [vmem:[#allocation2] sm:$0xff] %vm242_vm0, %v240_v18 }
  0x1f   : > { %244 = vst.msk [vmem:[#allocation2 + $0x8] sm:$0xff] %vm242_vm0, %v241_v19 }
  0x26   : > { %v245_v20 = vld [vmem:[#allocation2] ss:$2 sm:$0xff]  ;;  %v247_v21 = vld [vmem:[#allocation2 + $0x1] ss:$2 sm:$0xff] }
  0x27   : > { %v248_v22 = vmax.f32 %v245_v20, %v247_v21 }
  0x29   : > { %249 = vst.msk [vmem:[%s209_s9] sm:$0xff] %vm242_vm0, %v248_v22 }
  0x2a PF: > { %s13_s16 = sadd.s32 1, %s432_s16   ;;  %s524_s12 = smov %s424_s14 }
  0x2b   : > { %p10_p8 = scmp.ge.s32.totalorder %s13_s16, 18   ;;  %s525_s13 = smov %s428_s15 }
  0x2c   : > { %s526_s14 = smov %s529_s17  ;;  %s527_s15 = smov %s533_s18 }
  0x2d   :  { %12 = sbr.rel (!%p10_p8) target bundleno = 3 (0x3), region = 63 }

// kernel: _lambda_.4
= control target key start
LH: loop header
LB: loop body
LE: loop exit
PB: predicated region body
PF: predicated region fallthrough
CT: control target
= control target key end

     0   :  { %s2656_s15 = smov 0   ;;  %s4091_s0 = inlined_call_operand.vmem [shape: f32[2,16,16,4], index: 0, kind: input, shape index: {}]   ;;  %s4092_s1 = inlined_call_operand.vmem [shape: bf16[36,8], index: 1, kind: input, shape index: {}]   ;;  %s4093_s2 = inlined_call_operand.vmem [shape: f32[1,8], index: 2, kind: input, shape index: {}]   ;;  %s4094_s3 = inlined_call_operand.vmem [shape: f32[2,256,8], index: 3, kind: output, shape index: {0}]   ;;  %s4095_s4 = inlined_call_operand.vmem [shape: f32[2,8], index: 4, kind: output, shape index: {1}]  }
   0x1 LB: > { %s2662_s16 = sadd.s32 4294967295, %s2619_s15   ;;  %p2497_p0 = scmp.ge.s32.totalorder %s2619_s15, 1  ;;  %s2619_s15 = sphi %s2656_s15, %s15_s15  }
   0x2   : > { %p160_p1 = scmp.lt.s32.totalorder %s2619_s15, 3 }
   0x4   : > { %p161_p2 = pnand %p2497_p0, %p160_p1 }
   0x6   : > { %164 = sbr.rel (%p161_p2) target bundleno = 981 (0x3d5), region = 32 }
   0xd   : > { %vm197_vm0 = vcmask 31744   ;;  %p186_p3 = scmp.lt.s32.totalorder %s2662_s16, 1  ;;  %vm200_vm1 = vcmask 25600   ;;  %v2621_v0 = vmov 0.0   ;;  %s2622_s25 = smov 4   ;;  %vm542_vm2 = vcmask 64544  }
   0xe   : > { %198 = vst.msk [vmem:[#allocation2] sm:$0xff] %vm197_vm0, %v2621_v0  ;;  %199 = vst.msk [vmem:[#allocation2 + $0x8] sm:$0xff] %vm197_vm0, %v2621_v0  ;;  %s2623_s26 = smov 8   ;;  %s2624_s27 = smov 12   ;;  %vm735_vm3 = vcmask 97344   ;;  %vm928_vm4 = vcmask 130144  }
   0xf   : > { %202 = vst.msk [vmem:[#allocation2 + $0x18] sm:$0xff] %vm197_vm0, %v2621_v0  ;;  %203 = vst.msk [vmem:[#allocation2 + $0x20] sm:$0xff] %vm197_vm0, %v2621_v0  ;;  %s187_s17 = scalar_select %p186_p3, %s2662_s16, 1  ;;  %vm2051_vm5 = vcmask 1041408   ;;  %vm1121_vm6 = vcmask 162944   ;;  %vm1314_vm7 = vcmask 195744  }
  0x10   : > { %205 = vst.msk [vmem:[#allocation2 + $0x30] sm:$0xff] %vm197_vm0, %v2621_v0  ;;  %206 = vst.msk [vmem:[#allocation2 + $0x38] sm:$0xff] %vm197_vm0, %v2621_v0  ;;  %s2625_s28 = smov 16   ;;  %s2626_s29 = smov 20   ;;  %vm1508_vm8 = vcmask 228544   ;;  %vm1701_vm9 = vcmask 261344  }
  0x11   : > { %208 = vst.msk [vmem:[#allocation2 + $0x48] sm:$0xff] %vm197_vm0, %v2621_v0  ;;  %209 = vst.msk [vmem:[#allocation2 + $0x50] sm:$0xff] %vm197_vm0, %v2621_v0  ;;  %s2525_s18 = sshll.u32 %s187_s17, 8  ;;  %s2627_s30 = smov 24   ;;  %vm1894_vm10 = vcmask 294144   ;;  %vm2002_vm11 = vcmask 293888  }
  0x12   : > { %211 = vst.msk [vmem:[#allocation2 + $0x60] sm:$0xff] %vm197_vm0, %v2621_v0  ;;  %212 = vst.msk [vmem:[#allocation2 + $0x68] sm:$0xff] %vm197_vm0, %v2621_v0  ;;  %s2727_s21 = scalar_lea.vmem %s4091_s0, %s2525_s18  ;;  %s2732_s24 = scalar_lea.vmem %s4094_s3, %s2525_s18 }
  0x13   : > { %214 = vst.msk [vmem:[#allocation2 + $0x78] sm:$0xff] %vm197_vm0, %v2621_v0  ;;  %215 = vst.msk [vmem:[#allocation2 + $0x80] sm:$0xff] %vm197_vm0, %v2621_v0  ;;  %v253_v1 = vld [vmem:[%s2727_s21] sm:$0xff]  ;;  %v254_v2 = vld [vmem:[%s2727_s21 + $0x8] sm:$0xff]  ;;  %s2628_s5 = smov 28   ;;  %s2629_s8 = smov 32  }
  0x14   : > { %217 = vst.msk [vmem:[#allocation2 + $0x90] sm:$0xff] %vm197_vm0, %v2621_v0  ;;  %218 = vst.msk [vmem:[#allocation2 + $0x98] sm:$0xff] %vm197_vm0, %v2621_v0  ;;  %v255_v3 = vld [vmem:[%s2727_s21 + $0x10] sm:$0xff]  ;;  %v256_v4 = vld [vmem:[%s2727_s21 + $0x18] sm:$0xff]  ;;  %p2522_p4 = scmp.ne.s32.totalorder %s2662_s16, 0 }
  0x15   : > { %220 = vst.msk [vmem:[#allocation2 + $0xa8] sm:$0xff] %vm197_vm0, %v2621_v0  ;;  %221 = vst.msk [vmem:[#allocation2 + $0xb0] sm:$0xff] %vm197_vm0, %v2621_v0  ;;  %v257_v5 = vld [vmem:[%s2727_s21 + $0x20] sm:$0xff]  ;;  %v258_v6 = vld [vmem:[%s2727_s21 + $0x28] sm:$0xff]  ;;  %vm2220_vm12 = vcmask (!%p2522_p4), 58368  }
  0x16   : > { %223 = vst.msk [vmem:[#allocation2 + $0xc0] sm:$0xff] %vm197_vm0, %v2621_v0  ;;  %224 = vst.msk [vmem:[#allocation2 + $0xc8] sm:$0xff] %vm197_vm0, %v2621_v0  ;;  %v382_v7 = vld [vmem:[#allocation2 + $0x1] sm:$0xff]  ;;  %v259_v9 = vld [vmem:[%s2727_s21 + $0x30] sm:$0xff] }
  0x17   : > { %226 = vst.msk [vmem:[#allocation2 + $0xd8] sm:$0xff] %vm197_vm0, %v2621_v0  ;;  %227 = vst.msk [vmem:[#allocation2 + $0xe0] sm:$0xff] %vm197_vm0, %v2621_v0  ;;  %446 = vrot.lane.b32.xlu0 %v382_v7, %s2622_s25  ;;  %v260_v10 = vld [vmem:[%s2727_s21 + $0x38] sm:$0xff]  ;;  %v261_v11 = vld [vmem:[%s2727_s21 + $0x40] sm:$0xff] }
  0x18   : > { %229 = vst.msk [vmem:[#allocation2 + $0xf0] sm:$0xff] %vm197_vm0, %v2621_v0  ;;  %230 = vst.msk [vmem:[#allocation2 + $0xf8] sm:$0xff] %vm197_vm0, %v2621_v0  ;;  %v262_v12 = vld [vmem:[%s2727_s21 + $0x48] sm:$0xff]  ;;  %v263_v13 = vld [vmem:[%s2727_s21 + $0x50] sm:$0xff] }
  0x19   : > { %232 = vst.msk [vmem:[#allocation2 + $0x108] sm:$0xff] %vm197_vm0, %v2621_v0  ;;  %233 = vst.msk [vmem:[#allocation2 + $0x110] sm:$0xff] %vm197_vm0, %v2621_v0  ;;  %v264_v14 = vld [vmem:[%s2727_s21 + $0x58] sm:$0xff]  ;;  %v265_v15 = vld [vmem:[%s2727_s21 + $0x60] sm:$0xff] }
  0x1a   : > { %235 = vst.msk [vmem:[#allocation2 + $0x120] sm:$0xff] %vm197_vm0, %v2621_v0  ;;  %236 = vst.msk [vmem:[#allocation2 + $0x128] sm:$0xff] %vm197_vm0, %v2621_v0  ;;  %v266_v16 = vld [vmem:[%s2727_s21 + $0x68] sm:$0xff]  ;;  %v267_v17 = vld [vmem:[%s2727_s21 + $0x70] sm:$0xff] }
  0x1b   : > { %238 = vst.msk [vmem:[#allocation2 + $0x138] sm:$0xff] %vm197_vm0, %v2621_v0  ;;  %239 = vst.msk [vmem:[#allocation2 + $0x140] sm:$0xff] %vm197_vm0, %v2621_v0  ;;  %v268_v18 = vld [vmem:[%s2727_s21 + $0x78] sm:$0xff]  ;;  %v269_v19 = vld [vmem:[%s2727_s21 + $0x80] sm:$0xff] }
  0x1c   : > { %241 = vst.msk [vmem:[#allocation2 + $0x150] sm:$0xff] %vm197_vm0, %v2621_v0  ;;  %242 = vst.msk [vmem:[#allocation2 + $0x158] sm:$0xff] %vm197_vm0, %v2621_v0  ;;  %v270_v20 = vld [vmem:[%s2727_s21 + $0x88] sm:$0xff]  ;;  %v271_v21 = vld [vmem:[%s2727_s21 + $0x90] sm:$0xff] }
  0x1d   : > { %244 = vst.msk [vmem:[#allocation2 + $0x168] sm:$0xff] %vm197_vm0, %v2621_v0  ;;  %245 = vst.msk [vmem:[#allocation2 + $0x170] sm:$0xff] %vm197_vm0, %v2621_v0  ;;  %v272_v22 = vld [vmem:[%s2727_s21 + $0x98] sm:$0xff]  ;;  %v273_v23 = vld [vmem:[%s2727_s21 + $0xa0] sm:$0xff] }
  0x1e   : > { %247 = vst.msk [vmem:[#allocation2 + $0x180] sm:$0xff] %vm197_vm0, %v2621_v0  ;;  %248 = vst.msk [vmem:[#allocation2 + $0x188] sm:$0xff] %vm197_vm0, %v2621_v0  ;;  %v274_v24 = vld [vmem:[%s2727_s21 + $0xa8] sm:$0xff]  ;;  %v275_v28 = vld [vmem:[%s2727_s21 + $0xb0] sm:$0xff] }
  0x1f   : > { %250 = vst.msk [vmem:[#allocation2 + $0x198] sm:$0xff] %vm197_vm0, %v2621_v0  ;;  %251 = vst.msk [vmem:[#allocation2 + $0x1a0] sm:$0xff] %vm197_vm0, %v2621_v0  ;;  %v276_v29 = vld [vmem:[%s2727_s21 + $0xb8] sm:$0xff]  ;;  %v277_v33 = vld [vmem:[%s2727_s21 + $0xc0] sm:$0xff] }
  0x20   : > { %201 = vst.msk [vmem:[#allocation2 + $0x10] sm:$0x3] %vm200_vm1, %v2621_v0  ;;  %204 = vst.msk [vmem:[#allocation2 + $0x28] sm:$0x3] %vm200_vm1, %v2621_v0  ;;  %v278_v34 = vld [vmem:[%s2727_s21 + $0xc8] sm:$0xff]  ;;  %v279_v35 = vld [vmem:[%s2727_s21 + $0xd0] sm:$0xff] }
  0x21   : > { %207 = vst.msk [vmem:[#allocation2 + $0x40] sm:$0x3] %vm200_vm1, %v2621_v0  ;;  %210 = vst.msk [vmem:[#allocation2 + $0x58] sm:$0x3] %vm200_vm1, %v2621_v0  ;;  %v280_v36 = vld [vmem:[%s2727_s21 + $0xd8] sm:$0xff]  ;;  %v281_v37 = vld [vmem:[%s2727_s21 + $0xe0] sm:$0xff] }
  0x22   : > { %213 = vst.msk [vmem:[#allocation2 + $0x70] sm:$0x3] %vm200_vm1, %v2621_v0  ;;  %216 = vst.msk [vmem:[#allocation2 + $0x88] sm:$0x3] %vm200_vm1, %v2621_v0  ;;  %v282_v38 = vld [vmem:[%s2727_s21 + $0xe8] sm:$0xff]  ;;  %v318_v45 = vld [vmem:[#allocation2] sm:$0xff] }
  0x23   : > { %219 = vst.msk [vmem:[#allocation2 + $0xa0] sm:$0x3] %vm200_vm1, %v2621_v0  ;;  %222 = vst.msk [vmem:[#allocation2 + $0xb8] sm:$0x3] %vm200_vm1, %v2621_v0  ;;  %v319_v48 = vld [vmem:[#allocation2 + $0x8] sm:$0xff] }
  0x24   : > { %225 = vst.msk [vmem:[#allocation2 + $0xd0] sm:$0x3] %vm200_vm1, %v2621_v0  ;;  %228 = vst.msk [vmem:[#allocation2 + $0xe8] sm:$0x3] %vm200_vm1, %v2621_v0 }
  0x25   : > { %231 = vst.msk [vmem:[#allocation2 + $0x100] sm:$0x3] %vm200_vm1, %v2621_v0  ;;  %234 = vst.msk [vmem:[#allocation2 + $0x118] sm:$0x3] %vm200_vm1, %v2621_v0 }
  0x26   : > { %237 = vst.msk [vmem:[#allocation2 + $0x130] sm:$0x3] %vm200_vm1, %v2621_v0  ;;  %240 = vst.msk [vmem:[#allocation2 + $0x148] sm:$0x3] %vm200_vm1, %v2621_v0 }
  0x27   : > { %243 = vst.msk [vmem:[#allocation2 + $0x160] sm:$0x3] %vm200_vm1, %v2621_v0  ;;  %246 = vst.msk [vmem:[#allocation2 + $0x178] sm:$0x3] %vm200_vm1, %v2621_v0  ;;  %v383_v8 = vld [vmem:[#allocation2 + $0x9] sm:$0xff] }
  0x28   : > { %249 = vst.msk [vmem:[#allocation2 + $0x190] sm:$0x3] %vm200_vm1, %v2621_v0  ;;  %252 = vst.msk [vmem:[#allocation2 + $0x1a8] sm:$0x3] %vm200_vm1, %v2621_v0  ;;  %448 = vrot.lane.b32.xlu0 %v383_v8, %s2622_s25 }
  0x29   : > { %286 = vst.msk [vmem:[#allocation2 + $0x19] sm:$0xff] %vm197_vm0, %v253_v1  ;;  %287 = vst.msk [vmem:[#allocation2 + $0x21] sm:$0xff] %vm197_vm0, %v254_v2 }
  0x2a   : > { %288 = vst.msk [vmem:[#allocation2 + $0x31] sm:$0xff] %vm197_vm0, %v255_v3  ;;  %289 = vst.msk [vmem:[#allocation2 + $0x39] sm:$0xff] %vm197_vm0, %v256_v4 }
  0x2b   : > { %290 = vst.msk [vmem:[#allocation2 + $0x49] sm:$0xff] %vm197_vm0, %v257_v5  ;;  %291 = vst.msk [vmem:[#allocation2 + $0x51] sm:$0xff] %vm197_vm0, %v258_v6 }
  0x2c   : > { %292 = vst.msk [vmem:[#allocation2 + $0x61] sm:$0xff] %vm197_vm0, %v259_v9  ;;  %293 = vst.msk [vmem:[#allocation2 + $0x69] sm:$0xff] %vm197_vm0, %v260_v10 }
  0x2d   : > { %294 = vst.msk [vmem:[#allocation2 + $0x79] sm:$0xff] %vm197_vm0, %v261_v11  ;;  %295 = vst.msk [vmem:[#allocation2 + $0x81] sm:$0xff] %vm197_vm0, %v262_v12 }
  0x2e   : > { %296 = vst.msk [vmem:[#allocation2 + $0x91] sm:$0xff] %vm197_vm0, %v263_v13  ;;  %297 = vst.msk [vmem:[#allocation2 + $0x99] sm:$0xff] %vm197_vm0, %v264_v14 }
  0x2f   : > { %298 = vst.msk [vmem:[#allocation2 + $0xa9] sm:$0xff] %vm197_vm0, %v265_v15  ;;  %299 = vst.msk [vmem:[#allocation2 + $0xb1] sm:$0xff] %vm197_vm0, %v266_v16 }
  0x30   : > { %300 = vst.msk [vmem:[#allocation2 + $0xc1] sm:$0xff] %vm197_vm0, %v267_v17  ;;  %301 = vst.msk [vmem:[#allocation2 + $0xc9] sm:$0xff] %vm197_vm0, %v268_v18  ;;  %v2777_v25 = vld [vmem:[#allocation2 + $0x19] sm:$0xff]  ;;  %v2786_v27 = vld [vmem:[#allocation2 + $0x21] sm:$0xff] }
  0x31   : > { %302 = vst.msk [vmem:[#allocation2 + $0xd9] sm:$0xff] %vm197_vm0, %v269_v19  ;;  %303 = vst.msk [vmem:[#allocation2 + $0xe1] sm:$0xff] %vm197_vm0, %v270_v20  ;;  %v2779_v26 = vld [vmem:[#allocation2 + $0x31] sm:$0xff]  ;;  %450 = vrot.lane.b32.xlu1 %v2777_v25, %s2622_s25  ;;  %v2798_v31 = vld [vmem:[#allocation2 + $0x39] sm:$0xff] }
  0x32   : > { %304 = vst.msk [vmem:[#allocation2 + $0xf1] sm:$0xff] %vm197_vm0, %v271_v21  ;;  %305 = vst.msk [vmem:[#allocation2 + $0xf9] sm:$0xff] %vm197_vm0, %v272_v22  ;;  %454 = vrot.lane.b32.xlu0 %v2779_v26, %s2622_s25  ;;  %v2794_v30 = vld [vmem:[#allocation2 + $0x49] sm:$0xff]  ;;  %v2813_v39 = vld [vmem:[#allocation2 + $0x51] sm:$0xff] }
  0x33   : > { %306 = vst.msk [vmem:[#allocation2 + $0x109] sm:$0xff] %vm197_vm0, %v273_v23  ;;  %307 = vst.msk [vmem:[#allocation2 + $0x111] sm:$0xff] %vm197_vm0, %v274_v24  ;;  %v390_v32 = vld [vmem:[#allocation2 + $0x61] sm:$0xff]  ;;  %v391_v41 = vld [vmem:[#allocation2 + $0x69] sm:$0xff] }
  0x34   : > { %308 = vst.msk [vmem:[#allocation2 + $0x121] sm:$0xff] %vm197_vm0, %v275_v28  ;;  %309 = vst.msk [vmem:[#allocation2 + $0x129] sm:$0xff] %vm197_vm0, %v276_v29  ;;  %v392_v40 = vld [vmem:[#allocation2 + $0x79] sm:$0xff]  ;;  %v393_v43 = vld [vmem:[#allocation2 + $0x81] sm:$0xff] }
  0x35   : > { %452 = vrot.lane.b32.xlu1 %v2786_v27, %s2622_s25  ;;  %310 = vst.msk [vmem:[#allocation2 + $0x139] sm:$0xff] %vm197_vm0, %v277_v33  ;;  %311 = vst.msk [vmem:[#allocation2 + $0x141] sm:$0xff] %vm197_vm0, %v278_v34  ;;  %v394_v42 = vld [vmem:[#allocation2 + $0x91] sm:$0xff]  ;;  %v395_v47 = vld [vmem:[#allocation2 + $0x99] sm:$0xff] }
  0x36   : > { %458 = vrot.lane.b32.xlu0 %v2794_v30, %s2622_s25  ;;  %312 = vst.msk [vmem:[#allocation2 + $0x151] sm:$0xff] %vm197_vm0, %v279_v35  ;;  %313 = vst.msk [vmem:[#allocation2 + $0x159] sm:$0xff] %vm197_vm0, %v280_v36  ;;  %v396_v44 = vld [vmem:[#allocation2 + $0xa9] sm:$0xff]  ;;  %v2825_v46 = vld [vmem:[#allocation2 + $0x18] sm:$0xff] }
  0x37   : > { %314 = vst.msk [vmem:[#allocation2 + $0x169] sm:$0xff] %vm197_vm0, %v281_v37  ;;  %315 = vst.msk [vmem:[#allocation2 + $0x171] sm:$0xff] %vm197_vm0, %v282_v38  ;;  %v2832_v49 = vld [vmem:[#allocation2 + $0x20] sm:$0xff]  ;;  %v2836_v51 = vld [vmem:[#allocation2 + $0x30] sm:$0xff] }
  0x38   : > { %350 = vst.msk [vmem:[#allocation3] sm:$0xff] %vm197_vm0, %v318_v45  ;;  %352 = vst.msk [vmem:[#allocation3 + $0x10] sm:$0xff] %vm197_vm0, %v2825_v46  ;;  %v398_v50 = vld [vmem:[#allocation2 + $0xc1] sm:$0xff]  ;;  %v2838_v52 = vld [vmem:[#allocation2 + $0x38] sm:$0xff] }
  0x39   : > { %456 = vrot.lane.b32.xlu1 %v2798_v31, %s2622_s25  ;;  %351 = vst.msk [vmem:[#allocation3 + $0x8] sm:$0xff] %vm197_vm0, %v319_v48  ;;  %353 = vst.msk [vmem:[#allocation3 + $0x18] sm:$0xff] %vm197_vm0, %v2832_v49  ;;  %v397_v53 = vld [vmem:[#allocation2 + $0xb1] sm:$0xff]  ;;  %v2845_v54 = vld [vmem:[#allocation2 + $0x48] sm:$0xff] }
  0x3a   : > { %462 = vrot.lane.b32.xlu0 %v390_v32, %s2622_s25  ;;  %354 = vst.msk [vmem:[#allocation3 + $0x20] sm:$0xff] %vm197_vm0, %v2836_v51  ;;  %355 = vst.msk [vmem:[#allocation3 + $0x28] sm:$0xff] %vm197_vm0, %v2838_v52  ;;  %v2847_v55 = vld [vmem:[#allocation2 + $0x50] sm:$0xff]  ;;  %v2849_v56 = vld [vmem:[#allocation2 + $0xd9] sm:$0xff] }
  0x3b   : > { %356 = vst.msk [vmem:[#allocation3 + $0x30] sm:$0xff] %vm197_vm0, %v2845_v54  ;;  %357 = vst.msk [vmem:[#allocation3 + $0x38] sm:$0xff] %vm197_vm0, %v2847_v55  ;;  %v2855_v57 = vld [vmem:[#allocation2 + $0x60] sm:$0xff]  ;;  %v2857_v58 = vld [vmem:[#allocation2 + $0x68] sm:$0xff] }
  0x3c   : > { %v2859_v59 = vld [vmem:[#allocation2 + $0x78] sm:$0xff]  ;;  %358 = vst.msk [vmem:[#allocation3 + $0x40] sm:$0xff] %vm197_vm0, %v2855_v57  ;;  %359 = vst.msk [vmem:[#allocation3 + $0x48] sm:$0xff] %vm197_vm0, %v2857_v58  ;;  %v2868_v60 = vld [vmem:[#allocation2 + $0x80] sm:$0xff] }
  0x3d   : > { %460 = vrot.lane.b32.xlu1 %v2813_v39, %s2622_s25  ;;  %360 = vst.msk [vmem:[#allocation3 + $0x50] sm:$0xff] %vm197_vm0, %v2859_v59  ;;  %v2870_v61 = vld [vmem:[#allocation2 + $0x90] sm:$0xff]  ;;  %v2872_v62 = vld [vmem:[#allocation2 + $0x98] sm:$0xff]  ;;  %361 = vst.msk [vmem:[#allocation3 + $0x58] sm:$0xff] %vm197_vm0, %v2868_v60 }
  0x3e   : > { %466 = vrot.lane.b32.xlu0 %v392_v40, %s2622_s25  ;;  %v399_v63 = vld [vmem:[#allocation2 + $0xc9] sm:$0xff]  ;;  %362 = vst.msk [vmem:[#allocation3 + $0x60] sm:$0xff] %vm197_vm0, %v2870_v61  ;;  %363 = vst.msk [vmem:[#allocation3 + $0x68] sm:$0xff] %vm197_vm0, %v2872_v62  ;;  %v2884_v2 = vld [vmem:[#allocation2 + $0xc0] sm:$0xff] }
  0x3f   : > { %v2880_v0 = vld [vmem:[#allocation2 + $0xa8] sm:$0xff]  ;;  %v2882_v1 = vld [vmem:[#allocation2 + $0xb0] sm:$0xff]  ;;  %366 = vst.msk [vmem:[#allocation3 + $0x80] sm:$0xff] %vm197_vm0, %v2884_v2  ;;  %v2895_v4 = vld [vmem:[#allocation2 + $0xd8] sm:$0xff] }
  0x40   : > { %364 = vst.msk [vmem:[#allocation3 + $0x70] sm:$0xff] %vm197_vm0, %v2880_v0  ;;  %365 = vst.msk [vmem:[#allocation3 + $0x78] sm:$0xff] %vm197_vm0, %v2882_v1  ;;  %v2893_v3 = vld [vmem:[#allocation2 + $0xc8] sm:$0xff]  ;;  %v2897_v5 = vld [vmem:[#allocation2 + $0xe0] sm:$0xff] }
  0x41   : > { %464 = vrot.lane.b32.xlu1 %v391_v41, %s2622_s25  ;;  %367 = vst.msk [vmem:[#allocation3 + $0x88] sm:$0xff] %vm197_vm0, %v2893_v3  ;;  %368 = vst.msk [vmem:[#allocation3 + $0x90] sm:$0xff] %vm197_vm0, %v2895_v4  ;;  %v2905_v6 = vld [vmem:[#allocation2 + $0xf0] sm:$0xff]  ;;  %v2907_v7 = vld [vmem:[#allocation2 + $0xf8] sm:$0xff] }
  0x42   : > { %470 = vrot.lane.b32.xlu0 %v394_v42, %s2622_s25  ;;  %369 = vst.msk [vmem:[#allocation3 + $0x98] sm:$0xff] %vm197_vm0, %v2897_v5  ;;  %v2909_v8 = vld [vmem:[#allocation2 + $0x108] sm:$0xff]  ;;  %370 = vst.msk [vmem:[#allocation3 + $0xa0] sm:$0xff] %vm197_vm0, %v2905_v6  ;;  %v2919_v9 = vld [vmem:[#allocation2 + $0x110] sm:$0xff] }
  0x43   : > { %371 = vst.msk [vmem:[#allocation3 + $0xa8] sm:$0xff] %vm197_vm0, %v2907_v7  ;;  %372 = vst.msk [vmem:[#allocation3 + $0xb0] sm:$0xff] %vm197_vm0, %v2909_v8  ;;  %v2921_v10 = vld [vmem:[#allocation2 + $0xf1] sm:$0xff]  ;;  %v2926_v11 = vld [vmem:[#allocation2 + $0x120] sm:$0xff] }
  0x44   : > { %373 = vst.msk [vmem:[#allocation3 + $0xb8] sm:$0xff] %vm197_vm0, %v2919_v9  ;;  %v2928_v12 = vld [vmem:[#allocation2 + $0x128] sm:$0xff]  ;;  %374 = vst.msk [vmem:[#allocation3 + $0xc0] sm:$0xff] %vm197_vm0, %v2926_v11  ;;  %v2942_v15 = vld [vmem:[#allocation2 + $0x138] sm:$0xff] }
  0x45   : > { %468 = vrot.lane.b32.xlu1 %v393_v43, %s2622_s25  ;;  %v2930_v13 = vld [vmem:[#allocation2 + $0xe1] sm:$0xff]  ;;  %375 = vst.msk [vmem:[#allocation3 + $0xc8] sm:$0xff] %vm197_vm0, %v2928_v12  ;;  %v2938_v14 = vld [vmem:[#allocation2 + $0x109] sm:$0xff]  ;;  %v2946_v17 = vld [vmem:[#allocation2 + $0xf9] sm:$0xff] }
  0x46   : > { %474 = vrot.lane.b32.xlu0 %v396_v44, %s2622_s25  ;;  %v2944_v16 = vld [vmem:[#allocation2 + $0x140] sm:$0xff]  ;;  %376 = vst.msk [vmem:[#allocation3 + $0xd0] sm:$0xff] %vm197_vm0, %v2942_v15  ;;  %v2958_v19 = vld [vmem:[#allocation2 + $0x150] sm:$0xff]  ;;  %v2960_v20 = vld [vmem:[#allocation2 + $0x158] sm:$0xff] }
  0x47   : > { %377 = vst.msk [vmem:[#allocation3 + $0xd8] sm:$0xff] %vm197_vm0, %v2944_v16  ;;  %v2954_v18 = vld [vmem:[#allocation2 + $0x121] sm:$0xff]  ;;  %v2962_v21 = vld [vmem:[#allocation2 + $0x111] sm:$0xff]  ;;  %378 = vst.msk [vmem:[#allocation3 + $0xe0] sm:$0xff] %vm197_vm0, %v2958_v19 }
  0x48   : > { %379 = vst.msk [vmem:[#allocation3 + $0xe8] sm:$0xff] %vm197_vm0, %v2960_v20  ;;  %v408_v22 = vld [vmem:[#allocation2 + $0x139] sm:$0xff]  ;;  %v2972_v23 = vld [vmem:[#allocation2 + $0x168] sm:$0xff]  ;;  %v2974_v24 = vld [vmem:[#allocation2 + $0x170] sm:$0xff] }
  0x49   : > { %472 = vrot.lane.b32.xlu1 %v395_v47, %s2622_s25  ;;  %v2976_v28 = vld [vmem:[#allocation2 + $0x129] sm:$0xff]  ;;  %380 = vst.msk [vmem:[#allocation3 + $0xf0] sm:$0xff] %vm197_vm0, %v2972_v23  ;;  %381 = vst.msk [vmem:[#allocation3 + $0xf8] sm:$0xff] %vm197_vm0, %v2974_v24  ;;  %v410_v29 = vld [vmem:[#allocation2 + $0x151] sm:$0xff] }
  0x4a   : > { %478 = vrot.lane.b32.xlu0 %v398_v50, %s2622_s25  ;;  %4101 = vst [vmem:[#allocation4_spill] sm:$0xff] %v2976_v28  ;;  %v409_v32 = vld [vmem:[#allocation2 + $0x141] sm:$0xff]  ;;  %v412_v33 = vld [vmem:[#allocation2 + $0x169] sm:$0xff]  ;;  %v284_v35 = vld [vmem:[%s2727_s21 + $0xf8] sm:$0xff] }
  0x4b   : > { %v283_v34 = vld [vmem:[%s2727_s21 + $0xf0] sm:$0xff]  ;;  %317 = vst.msk [vmem:[#allocation2 + $0x189] sm:$0xff] %vm197_vm0, %v284_v35  ;;  %v411_v36 = vld [vmem:[#allocation2 + $0x159] sm:$0xff]  ;;  %v575_v37 = vld [vmem:[#allocation2 + $0x2] sm:$0xff] }
  0x4c   : > { %316 = vst.msk [vmem:[#allocation2 + $0x181] sm:$0xff] %vm197_vm0, %v283_v34  ;;  %v413_v38 = vld [vmem:[#allocation2 + $0x171] sm:$0xff]  ;;  %v2994_v40 = vld [vmem:[#allocation2 + $0x1a] sm:$0xff]  ;;  %v3002_v43 = vld [vmem:[#allocation2 + $0x22] sm:$0xff] }
  0x4d   : > { %476 = vrot.lane.b32.xlu1 %v397_v53, %s2622_s25  ;;  %v576_v41 = vld [vmem:[#allocation2 + $0xa] sm:$0xff]  ;;  %v2999_v42 = vld [vmem:[#allocation2 + $0x32] sm:$0xff]  ;;  %v3010_v45 = vld [vmem:[#allocation2 + $0x3a] sm:$0xff] }
  0x4e   : > { %482 = vrot.lane.b32.xlu0 %v2849_v56, %s2622_s25  ;;  %v3006_v44 = vld [vmem:[#allocation2 + $0x4a] sm:$0xff]  ;;  %v3014_v47 = vld [vmem:[#allocation2 + $0x62] sm:$0xff]  ;;  %v3018_v48 = vld [vmem:[#allocation2 + $0x52] sm:$0xff] }
  0x4f   : > { %4102 = vst [vmem:[#allocation5_spill] sm:$0xff] %v3014_v47  ;;  %v585_v50 = vld [vmem:[#allocation2 + $0x7a] sm:$0xff]  ;;  %v3024_v53 = vld [vmem:[#allocation2 + $0x6a] sm:$0xff]  ;;  %v590_v34 = vld [vmem:[#allocation2 + $0xb2] sm:$0xff] }
  0x50   : > { %4103 = vst [vmem:[#allocation6_spill] sm:$0xff] %v3024_v53  ;;  %v3034_v35 = vld [vmem:[#allocation2 + $0xda] sm:$0xff] }
  0x51   : > { %480 = vrot.lane.b32.xlu1 %v399_v63, %s2622_s25  ;;  %v587_v63 = vld [vmem:[#allocation2 + $0x92] sm:$0xff] }
  0x52   : > { %486 = vrot.lane.b32.xlu0 %v2921_v10, %s2622_s25 }
  0x55   : > { %484 = vrot.lane.b32.xlu1 %v2930_v13, %s2622_s25 }
  0x56   : > { %490 = vrot.lane.b32.xlu0 %v2938_v14, %s2622_s25 }
  0x59   : > { %488 = vrot.lane.b32.xlu1 %v2946_v17, %s2622_s25 }
  0x5a   : > { %494 = vrot.lane.b32.xlu0 %v2954_v18, %s2622_s25 }
  0x5d   : > { %492 = vrot.lane.b32.xlu1 %v2962_v21, %s2622_s25 }
  0x5e   : > { %498 = vrot.lane.b32.xlu0 %v408_v22, %s2622_s25  ;;  %v586_v22 = vld [vmem:[#allocation2 + $0x82] sm:$0xff] }
  0x61   : > { %496 = vrot.lane.b32.xlu1 %v2976_v28, %s2622_s25 }
  0x62   : > { %502 = vrot.lane.b32.xlu0 %v410_v29, %s2622_s25  ;;  %v589_v29 = vld [vmem:[#allocation2 + $0xaa] sm:$0xff] }
  0x65   : > { %500 = vrot.lane.b32.xlu1 %v409_v32, %s2622_s25  ;;  %v588_v32 = vld [vmem:[#allocation2 + $0x9a] sm:$0xff] }
  0x66   : > { %506 = vrot.lane.b32.xlu0 %v412_v33, %s2622_s25  ;;  %v591_v33 = vld [vmem:[#allocation2 + $0xc2] sm:$0xff] }
  0x69   : > { %504 = vrot.lane.b32.xlu1 %v411_v36, %s2622_s25  ;;  %v592_v36 = vld [vmem:[#allocation2 + $0xca] sm:$0xff] }
  0x6a   : > { %639 = vrot.lane.b32.xlu0 %v575_v37, %s2623_s26  ;;  %v3039_v37 = vld [vmem:[#allocation2 + $0xf2] sm:$0xff] }
  0x6d   : > { %508 = vrot.lane.b32.xlu1 %v413_v38, %s2622_s25  ;;  %v3042_v38 = vld [vmem:[#allocation2 + $0xe2] sm:$0xff] }
  0x6e   : > { %643 = vrot.lane.b32.xlu0 %v2994_v40, %s2623_s26 }
  0x71   : > { %641 = vrot.lane.b32.xlu1 %v576_v41, %s2623_s26  ;;  %v3046_v41 = vld [vmem:[#allocation2 + $0x10a] sm:$0xff] }
  0x72   : > { %647 = vrot.lane.b32.xlu0 %v2999_v42, %s2623_s26 }
  0x75   : > { %645 = vrot.lane.b32.xlu1 %v3002_v43, %s2623_s26 }
  0x76   : > { %651 = vrot.lane.b32.xlu0 %v3006_v44, %s2623_s26 }
  0x79   : > { %649 = vrot.lane.b32.xlu1 %v3010_v45, %s2623_s26 }
  0x7a   : > { %655 = vrot.lane.b32.xlu0 %v3014_v47, %s2623_s26  ;;  %v605_v47 = vld [vmem:[#allocation2 + $0x16a] sm:$0xff] }
  0x7d   : > { %653 = vrot.lane.b32.xlu1 %v3018_v48, %s2623_s26 }
  0x7e   : > { %659 = vrot.lane.b32.xlu0 %v585_v50, %s2623_s26  ;;  %v3050_v50 = vld [vmem:[#allocation2 + $0xfa] sm:$0xff] }
  0x81   : > { %657 = vrot.lane.b32.xlu1 %v3024_v53, %s2623_s26  ;;  %v602_v53 = vld [vmem:[#allocation2 + $0x142] sm:$0xff] }
  0x82   : > { %663 = vrot.lane.b32.xlu0 %v587_v63, %s2623_s26  ;;  %v3054_v63 = vld [vmem:[#allocation2 + $0x122] sm:$0xff] }
  0x83   : > { %4104 = vst [vmem:[#allocation7_spill] sm:$0xff] %v3054_v63 }
  0x85   : > { %661 = vrot.lane.b32.xlu1 %v586_v22, %s2623_s26  ;;  %v3058_v22 = vld [vmem:[#allocation2 + $0x112] sm:$0xff] }
  0x86   : > { %667 = vrot.lane.b32.xlu0 %v589_v29, %s2623_s26  ;;  %v601_v29 = vld [vmem:[#allocation2 + $0x13a] sm:$0xff] }
  0x89   : > { %665 = vrot.lane.b32.xlu1 %v588_v32, %s2623_s26  ;;  %v447_v32 = vpop.permute.xlu0 %446 }
  0x8a   : > { %671 = vrot.lane.b32.xlu0 %v591_v33, %s2623_s26  ;;  %v3064_v33 = vld [vmem:[#allocation2 + $0x12a] sm:$0xff]  ;;  %543 = vst.msk [vmem:[#allocation3] sm:$0xff] %vm542_vm2, %v447_v32  ;;  %v604_v32 = vld [vmem:[#allocation2 + $0x15a] sm:$0xff] }
  0x8b   : > { %4105 = vst [vmem:[#allocation8_spill] sm:$0xff] %v3064_v33 }
  0x8d   : > { %669 = vrot.lane.b32.xlu1 %v590_v34, %s2623_s26  ;;  %v603_v34 = vld [vmem:[#allocation2 + $0x152] sm:$0xff] }
  0x8e   : > { %675 = vrot.lane.b32.xlu0 %v3034_v35, %s2623_s26 }
  0x91   : > { %673 = vrot.lane.b32.xlu1 %v592_v36, %s2623_s26 }
  0x92   : > { %679 = vrot.lane.b32.xlu0 %v3039_v37, %s2623_s26 }
  0x95   : > { %677 = vrot.lane.b32.xlu1 %v3042_v38, %s2623_s26 }
  0x96   : > { %683 = vrot.lane.b32.xlu0 %v3046_v41, %s2623_s26 }
  0x99   : > { %681 = vrot.lane.b32.xlu1 %v3050_v50, %s2623_s26 }
  0x9a   : > { %687 = vrot.lane.b32.xlu0 %v3054_v63, %s2623_s26  ;;  %v449_v36 = vpop.permute.xlu0 %448 }
  0x9b   : > { %544 = vst.msk [vmem:[#allocation3 + $0x8] sm:$0xff] %vm542_vm2, %v449_v36 }
  0x9d   : > { %685 = vrot.lane.b32.xlu1 %v3058_v22, %s2623_s26 }
  0x9e   : > { %691 = vrot.lane.b32.xlu0 %v601_v29, %s2623_s26 }
  0xa1   : > { %689 = vrot.lane.b32.xlu1 %v3064_v33, %s2623_s26  ;;  %v606_v33 = vld [vmem:[#allocation2 + $0x172] sm:$0xff] }
  0xa2   : > { %695 = vrot.lane.b32.xlu0 %v603_v34, %s2623_s26 }
  0xa3   : > { %v451_v63 = vpop.permute.xlu1 %450 }
  0xa4   : > { %545 = vst.msk [vmem:[#allocation3 + $0x10] sm:$0xff] %vm542_vm2, %v451_v63  ;;  %v455_v28 = vpop.permute.xlu0 %454 }
  0xa5   : > { %693 = vrot.lane.b32.xlu1 %v602_v53, %s2623_s26  ;;  %547 = vst.msk [vmem:[#allocation3 + $0x20] sm:$0xff] %vm542_vm2, %v455_v28 }
  0xa6   : > { %699 = vrot.lane.b32.xlu0 %v605_v47, %s2623_s26 }
  0xa7   : > { %v453_v29 = vpop.permute.xlu1 %452 }
  0xa8   : > { %546 = vst.msk [vmem:[#allocation3 + $0x18] sm:$0xff] %vm542_vm2, %v453_v29  ;;  %v459_v36 = vpop.permute.xlu0 %458 }
  0xa9   : > { %697 = vrot.lane.b32.xlu1 %v604_v32, %s2623_s26  ;;  %549 = vst.msk [vmem:[#allocation3 + $0x30] sm:$0xff] %vm542_vm2, %v459_v36 }
  0xaa   : > { %832 = vrot.lane.b32.xlu0 %v2825_v46, %s2624_s27 }
  0xab   : > { %v457_v34 = vpop.permute.xlu1 %456 }
  0xac   : > { %548 = vst.msk [vmem:[#allocation3 + $0x28] sm:$0xff] %vm542_vm2, %v457_v34  ;;  %v463_v28 = vpop.permute.xlu0 %462 }
  0xad   : > { %701 = vrot.lane.b32.xlu1 %v606_v33, %s2623_s26  ;;  %551 = vst.msk [vmem:[#allocation3 + $0x40] sm:$0xff] %vm542_vm2, %v463_v28 }
  0xae   : > { %836 = vrot.lane.b32.xlu0 %v2836_v51, %s2624_s27 }
  0xaf   : > { %v461_v47 = vpop.permute.xlu1 %460 }
  0xb0   : > { %550 = vst.msk [vmem:[#allocation3 + $0x38] sm:$0xff] %vm542_vm2, %v461_v47  ;;  %v467_v53 = vpop.permute.xlu0 %466 }
  0xb1   : > { %834 = vrot.lane.b32.xlu1 %v2832_v49, %s2624_s27  ;;  %553 = vst.msk [vmem:[#allocation3 + $0x50] sm:$0xff] %vm542_vm2, %v467_v53 }
  0xb2   : > { %840 = vrot.lane.b32.xlu0 %v2845_v54, %s2624_s27 }
  0xb3   : > { %v465_v46 = vpop.permute.xlu1 %464 }
  0xb4   : > { %552 = vst.msk [vmem:[#allocation3 + $0x48] sm:$0xff] %vm542_vm2, %v465_v46  ;;  %v471_v63 = vpop.permute.xlu0 %470 }
  0xb5   : > { %838 = vrot.lane.b32.xlu1 %v2838_v52, %s2624_s27  ;;  %555 = vst.msk [vmem:[#allocation3 + $0x60] sm:$0xff] %vm542_vm2, %v471_v63 }
  0xb6   : > { %844 = vrot.lane.b32.xlu0 %v2855_v57, %s2624_s27 }
  0xb7   : > { %v469_v33 = vpop.permute.xlu1 %468 }
  0xb8   : > { %554 = vst.msk [vmem:[#allocation3 + $0x58] sm:$0xff] %vm542_vm2, %v469_v33  ;;  %v475_v49 = vpop.permute.xlu0 %474 }
  0xb9   : > { %842 = vrot.lane.b32.xlu1 %v2847_v55, %s2624_s27  ;;  %557 = vst.msk [vmem:[#allocation3 + $0x70] sm:$0xff] %vm542_vm2, %v475_v49 }
  0xba   : > { %848 = vrot.lane.b32.xlu0 %v2859_v59, %s2624_s27 }
  0xbb   : > { %v473_v32 = vpop.permute.xlu1 %472 }
  0xbc   : > { %556 = vst.msk [vmem:[#allocation3 + $0x68] sm:$0xff] %vm542_vm2, %v473_v32  ;;  %v479_v29 = vpop.permute.xlu0 %478 }
  0xbd   : > { %846 = vrot.lane.b32.xlu1 %v2857_v58, %s2624_s27  ;;  %559 = vst.msk [vmem:[#allocation3 + $0x80] sm:$0xff] %vm542_vm2, %v479_v29 }
  0xbe   : > { %852 = vrot.lane.b32.xlu0 %v2870_v61, %s2624_s27 }
  0xbf   : > { %v477_v36 = vpop.permute.xlu1 %476 }
  0xc0   : > { %558 = vst.msk [vmem:[#allocation3 + $0x78] sm:$0xff] %vm542_vm2, %v477_v36  ;;  %v483_v34 = vpop.permute.xlu0 %482  ;;  %v798_v36 = vld [vmem:[#allocation2 + $0x180] sm:$0xff] }
  0xc1   : > { %850 = vrot.lane.b32.xlu1 %v2868_v60, %s2624_s27  ;;  %561 = vst.msk [vmem:[#allocation3 + $0x90] sm:$0xff] %vm542_vm2, %v483_v34 }
  0xc2   : > { %856 = vrot.lane.b32.xlu0 %v2880_v0, %s2624_s27 }
  0xc3   : > { %v481_v28 = vpop.permute.xlu1 %480 }
  0xc4   : > { %560 = vst.msk [vmem:[#allocation3 + $0x88] sm:$0xff] %vm542_vm2, %v481_v28  ;;  %v487_v47 = vpop.permute.xlu0 %486 }
  0xc5   : > { %854 = vrot.lane.b32.xlu1 %v2872_v62, %s2624_s27  ;;  %563 = vst.msk [vmem:[#allocation3 + $0xa0] sm:$0xff] %vm542_vm2, %v487_v47 }
  0xc6   : > { %860 = vrot.lane.b32.xlu0 %v2884_v2, %s2624_s27 }
  0xc7   : > { %v485_v61 = vpop.permute.xlu1 %484 }
  0xc8   : > { %562 = vst.msk [vmem:[#allocation3 + $0x98] sm:$0xff] %vm542_vm2, %v485_v61  ;;  %v491_v53 = vpop.permute.xlu0 %490  ;;  %v799_v61 = vld [vmem:[#allocation2 + $0x188] sm:$0xff] }
  0xc9   : > { %858 = vrot.lane.b32.xlu1 %v2882_v1, %s2624_s27  ;;  %565 = vst.msk [vmem:[#allocation3 + $0xb0] sm:$0xff] %vm542_vm2, %v491_v53 }
  0xca   : > { %864 = vrot.lane.b32.xlu0 %v2895_v4, %s2624_s27 }
  0xcb   : > { %v489_v0 = vpop.permute.xlu1 %488 }
  0xcc   : > { %564 = vst.msk [vmem:[#allocation3 + $0xa8] sm:$0xff] %vm542_vm2, %v489_v0  ;;  %v495_v62 = vpop.permute.xlu0 %494 }
  0xcd   : > { %862 = vrot.lane.b32.xlu1 %v2893_v3, %s2624_s27  ;;  %567 = vst.msk [vmem:[#allocation3 + $0xc0] sm:$0xff] %vm542_vm2, %v495_v62 }
  0xce   : > { %868 = vrot.lane.b32.xlu0 %v2905_v6, %s2624_s27 }
  0xcf   : > { %v493_v2 = vpop.permute.xlu1 %492 }
  0xd0   : > { %566 = vst.msk [vmem:[#allocation3 + $0xb8] sm:$0xff] %vm542_vm2, %v493_v2  ;;  %v499_v1 = vpop.permute.xlu0 %498 }
  0xd1   : > { %866 = vrot.lane.b32.xlu1 %v2897_v5, %s2624_s27  ;;  %569 = vst.msk [vmem:[#allocation3 + $0xd0] sm:$0xff] %vm542_vm2, %v499_v1 }
  0xd2   : > { %872 = vrot.lane.b32.xlu0 %v2909_v8, %s2624_s27 }
  0xd3   : > { %v497_v4 = vpop.permute.xlu1 %496 }
  0xd4   : > { %568 = vst.msk [vmem:[#allocation3 + $0xc8] sm:$0xff] %vm542_vm2, %v497_v4  ;;  %v503_v3 = vpop.permute.xlu0 %502 }
  0xd5   : > { %870 = vrot.lane.b32.xlu1 %v2907_v7, %s2624_s27  ;;  %571 = vst.msk [vmem:[#allocation3 + $0xe0] sm:$0xff] %vm542_vm2, %v503_v3 }
  0xd6   : > { %876 = vrot.lane.b32.xlu0 %v2926_v11, %s2624_s27 }
  0xd7   : > { %v501_v46 = vpop.permute.xlu1 %500 }
  0xd8   : > { %570 = vst.msk [vmem:[#allocation3 + $0xd8] sm:$0xff] %vm542_vm2, %v501_v46  ;;  %v507_v5 = vpop.permute.xlu0 %506 }
  0xd9   : > { %874 = vrot.lane.b32.xlu1 %v2919_v9, %s2624_s27  ;;  %573 = vst.msk [vmem:[#allocation3 + $0xf0] sm:$0xff] %vm542_vm2, %v507_v5 }
  0xda   : > { %880 = vrot.lane.b32.xlu0 %v2942_v15, %s2624_s27 }
  0xdb   : > { %v505_v63 = vpop.permute.xlu1 %504 }
  0xdc   : > { %572 = vst.msk [vmem:[#allocation3 + $0xe8] sm:$0xff] %vm542_vm2, %v505_v63  ;;  %v640_v33 = vpop.permute.xlu0 %639 }
  0xdd   : > { %878 = vrot.lane.b32.xlu1 %v2928_v12, %s2624_s27  ;;  %736 = vst.msk [vmem:[#allocation3] sm:$0xff] %vm735_vm3, %v640_v33 }
  0xde   : > { %884 = vrot.lane.b32.xlu0 %v2958_v19, %s2624_s27 }
  0xdf   : > { %v509_v49 = vpop.permute.xlu1 %508 }
  0xe0   : > { %574 = vst.msk [vmem:[#allocation3 + $0xf8] sm:$0xff] %vm542_vm2, %v509_v49  ;;  %v644_v32 = vpop.permute.xlu0 %643 }
  0xe1   : > { %882 = vrot.lane.b32.xlu1 %v2944_v16, %s2624_s27  ;;  %738 = vst.msk [vmem:[#allocation3 + $0x10] sm:$0xff] %vm735_vm3, %v644_v32 }
  0xe2   : > { %888 = vrot.lane.b32.xlu0 %v2972_v23, %s2624_s27 }
  0xe3   : > { %v642_v29 = vpop.permute.xlu1 %641 }
  0xe4   : > { %737 = vst.msk [vmem:[#allocation3 + $0x8] sm:$0xff] %vm735_vm3, %v642_v29  ;;  %v648_v34 = vpop.permute.xlu0 %647  ;;  %v2611_v29 = vld [vmem:[%s4092_s1 + $0x8] sm:$0xff]  }
  0xe5   : > { %886 = vrot.lane.b32.xlu1 %v2960_v20, %s2624_s27  ;;  %740 = vst.msk [vmem:[#allocation3 + $0x20] sm:$0xff] %vm735_vm3, %v648_v34 }
  0xe6   : > { %892 = vrot.lane.b32.xlu0 %v798_v36, %s2624_s27 }
  0xe7   : > { %v646_v28 = vpop.permute.xlu1 %645 }
  0xe8   : > { %739 = vst.msk [vmem:[#allocation3 + $0x18] sm:$0xff] %vm735_vm3, %v646_v28  ;;  %v652_v47 = vpop.permute.xlu0 %651 }
  0xe9   : > { %890 = vrot.lane.b32.xlu1 %v2974_v24, %s2624_s27  ;;  %742 = vst.msk [vmem:[#allocation3 + $0x30] sm:$0xff] %vm735_vm3, %v652_v47 }
  0xea   : > { %1025 = vrot.lane.b32.xlu0 %v2777_v25, %s2625_s28 }
  0xeb   : > { %v650_v53 = vpop.permute.xlu1 %649 }
  0xec   : > { %741 = vst.msk [vmem:[#allocation3 + $0x28] sm:$0xff] %vm735_vm3, %v650_v53  ;;  %v656_v0 = vpop.permute.xlu0 %655 }
  0xed   : > { %894 = vrot.lane.b32.xlu1 %v799_v61, %s2624_s27  ;;  %744 = vst.msk [vmem:[#allocation3 + $0x40] sm:$0xff] %vm735_vm3, %v656_v0  ;;  %v965_v61 = vld [vmem:[#allocation2 + $0x49] sm:$0xff] }
  0xee   : > { %1029 = vrot.lane.b32.xlu0 %v2779_v26, %s2625_s28 }
  0xef   : > { %v654_v62 = vpop.permute.xlu1 %653 }
  0xf0   : > { %743 = vst.msk [vmem:[#allocation3 + $0x38] sm:$0xff] %vm735_vm3, %v654_v62  ;;  %v660_v2 = vpop.permute.xlu0 %659  ;;  %v966_v62 = vld [vmem:[#allocation2 + $0x51] sm:$0xff] }
  0xf1   : > { %1027 = vrot.lane.b32.xlu1 %v2786_v27, %s2625_s28  ;;  %746 = vst.msk [vmem:[#allocation3 + $0x50] sm:$0xff] %vm735_vm3, %v660_v2 }
  0xf2   : > { %1057 = vrot.lane.b32.xlu0 %v2849_v56, %s2625_s28 }
  0xf3   : > { %v658_v25 = vpop.permute.xlu1 %657 }
  0xf4   : > { %745 = vst.msk [vmem:[#allocation3 + $0x48] sm:$0xff] %vm735_vm3, %v658_v25  ;;  %v664_v1 = vpop.permute.xlu0 %663  ;;  %v3309_v25 = vld [vmem:[#allocation2 + $0x61] sm:$0xff] }
  0xf5   : > { %1031 = vrot.lane.b32.xlu1 %v2798_v31, %s2625_s28  ;;  %748 = vst.msk [vmem:[#allocation3 + $0x60] sm:$0xff] %vm735_vm3, %v664_v1 }
  0xf6   : > { %1061 = vrot.lane.b32.xlu0 %v2921_v10, %s2625_s28 }
  0xf7   : > { %v662_v4 = vpop.permute.xlu1 %661 }
  0xf8   : > { %747 = vst.msk [vmem:[#allocation3 + $0x58] sm:$0xff] %vm735_vm3, %v662_v4  ;;  %v668_v27 = vpop.permute.xlu0 %667 }
  0xf9   : > { %1059 = vrot.lane.b32.xlu1 %v2930_v13, %s2625_s28  ;;  %750 = vst.msk [vmem:[#allocation3 + $0x70] sm:$0xff] %vm735_vm3, %v668_v27 }
  0xfa   : > { %1218 = vrot.lane.b32.xlu0 %v2994_v40, %s2626_s29 }
  0xfb   : > { %v666_v56 = vpop.permute.xlu1 %665 }
  0xfc   : > { %749 = vst.msk [vmem:[#allocation3 + $0x68] sm:$0xff] %vm735_vm3, %v666_v56  ;;  %v672_v3 = vpop.permute.xlu0 %671 }
  0xfd   : > { %1063 = vrot.lane.b32.xlu1 %v2946_v17, %s2625_s28  ;;  %752 = vst.msk [vmem:[#allocation3 + $0x80] sm:$0xff] %vm735_vm3, %v672_v3 }
  0xfe   : > { %1250 = vrot.lane.b32.xlu0 %v3034_v35, %s2626_s29 }
  0xff   : > { %v670_v46 = vpop.permute.xlu1 %669 }
 0x100   : > { %751 = vst.msk [vmem:[#allocation3 + $0x78] sm:$0xff] %vm735_vm3, %v670_v46  ;;  %v676_v13 = vpop.permute.xlu0 %675 }
 0x101   : > { %1220 = vrot.lane.b32.xlu1 %v3002_v43, %s2626_s29  ;;  %754 = vst.msk [vmem:[#allocation3 + $0x90] sm:$0xff] %vm735_vm3, %v676_v13 }
 0x102   : > { %1222 = vrot.lane.b32.xlu0 %v2999_v42, %s2626_s29 }
 0x103   : > { %v674_v40 = vpop.permute.xlu1 %673 }
 0x104   : > { %753 = vst.msk [vmem:[#allocation3 + $0x88] sm:$0xff] %vm735_vm3, %v674_v40  ;;  %v680_v5 = vpop.permute.xlu0 %679 }
 0x105   : > { %1252 = vrot.lane.b32.xlu1 %v3042_v38, %s2626_s29  ;;  %756 = vst.msk [vmem:[#allocation3 + $0xa0] sm:$0xff] %vm735_vm3, %v680_v5  ;;  %v4107_v5 = vld [vmem:[#allocation5_spill] sm:$0xff] }
 0x106   : > { %1254 = vrot.lane.b32.xlu0 %v3039_v37, %s2626_s29 }
 0x107   : > { %v678_v35 = vpop.permute.xlu1 %677 }
 0x108   : > { %755 = vst.msk [vmem:[#allocation3 + $0x98] sm:$0xff] %vm735_vm3, %v678_v35  ;;  %v684_v43 = vpop.permute.xlu0 %683 }
 0x109   : > { %1224 = vrot.lane.b32.xlu1 %v3010_v45, %s2626_s29  ;;  %758 = vst.msk [vmem:[#allocation3 + $0xb0] sm:$0xff] %vm735_vm3, %v684_v43  ;;  %v4108_v43 = vld [vmem:[#allocation7_spill] sm:$0xff] }
 0x10a   : > { %1412 = vrot.lane.b32.xlu0 %v2836_v51, %s2627_s30 }
 0x10b   : > { %v682_v63 = vpop.permute.xlu1 %681 }
 0x10c   : > { %757 = vst.msk [vmem:[#allocation3 + $0xa8] sm:$0xff] %vm735_vm3, %v682_v63  ;;  %v688_v38 = vpop.permute.xlu0 %687 }
 0x10d   : > { %1256 = vrot.lane.b32.xlu1 %v3050_v50, %s2626_s29  ;;  %760 = vst.msk [vmem:[#allocation3 + $0xc0] sm:$0xff] %vm735_vm3, %v688_v38 }
 0x10e   : > { %1444 = vrot.lane.b32.xlu0 %v2905_v6, %s2627_s30 }
 0x10f   : > { %v686_v33 = vpop.permute.xlu1 %685 }
 0x110   : > { %759 = vst.msk [vmem:[#allocation3 + $0xb8] sm:$0xff] %vm735_vm3, %v686_v33  ;;  %v692_v49 = vpop.permute.xlu0 %691 }
 0x111   : > { %1414 = vrot.lane.b32.xlu1 %v2838_v52, %s2627_s30  ;;  %762 = vst.msk [vmem:[#allocation3 + $0xd0] sm:$0xff] %vm735_vm3, %v692_v49 }
 0x112   : > { %1416 = vrot.lane.b32.xlu0 %v2845_v54, %s2627_s30 }
 0x113   : > { %v690_v51 = vpop.permute.xlu1 %689 }
 0x114   : > { %761 = vst.msk [vmem:[#allocation3 + $0xc8] sm:$0xff] %vm735_vm3, %v690_v51  ;;  %v696_v32 = vpop.permute.xlu0 %695 }
 0x115   : > { %1446 = vrot.lane.b32.xlu1 %v2907_v7, %s2627_s30  ;;  %764 = vst.msk [vmem:[#allocation3 + $0xe0] sm:$0xff] %vm735_vm3, %v696_v32 }
 0x116   : > { %1448 = vrot.lane.b32.xlu0 %v2909_v8, %s2627_s30 }
 0x117   : > { %v694_v6 = vpop.permute.xlu1 %693 }
 0x118   : > { %763 = vst.msk [vmem:[#allocation3 + $0xd8] sm:$0xff] %vm735_vm3, %v694_v6  ;;  %v700_v52 = vpop.permute.xlu0 %699 }
 0x119   : > { %1418 = vrot.lane.b32.xlu1 %v2847_v55, %s2627_s30  ;;  %766 = vst.msk [vmem:[#allocation3 + $0xf0] sm:$0xff] %vm735_vm3, %v700_v52 }
 0x11a   : > { %1605 = vrot.lane.b32.xlu0 %v2779_v26, %s2628_s5 }
 0x11b   : > { %v698_v54 = vpop.permute.xlu1 %697 }
 0x11c   : > { %765 = vst.msk [vmem:[#allocation3 + $0xe8] sm:$0xff] %vm735_vm3, %v698_v54  ;;  %v833_v7 = vpop.permute.xlu0 %832  ;;  %v1562_v54 = vld [vmem:[#allocation2 + $0x129] sm:$0xff] }
 0x11d   : > { %1450 = vrot.lane.b32.xlu1 %v2919_v9, %s2627_s30  ;;  %929 = vst.msk [vmem:[#allocation3] sm:$0xff] %vm928_vm4, %v833_v7 }
 0x11e   : > { %1637 = vrot.lane.b32.xlu0 %v2921_v10, %s2628_s5 }
 0x11f   : > { %v702_v8 = vpop.permute.xlu1 %701 }
 0x120   : > { %767 = vst.msk [vmem:[#allocation3 + $0xf8] sm:$0xff] %vm735_vm3, %v702_v8  ;;  %v837_v55 = vpop.permute.xlu0 %836 }
 0x121   : > { %1607 = vrot.lane.b32.xlu1 %v2798_v31, %s2628_s5  ;;  %931 = vst.msk [vmem:[#allocation3 + $0x10] sm:$0xff] %vm928_vm4, %v837_v55  ;;  %v2610_v31 = vld [vmem:[%s4092_s1] sm:$0xff]  }
 0x122   : > { %1609 = vrot.lane.b32.xlu0 %v2794_v30, %s2628_s5  ;;  %2546 = vmatprep.subr.bf16.mxu0 %v2610_v31  ;;  %v1548_v55 = vld [vmem:[#allocation2 + $0x81] sm:$0xff] }
 0x123   : > { %v835_v26 = vpop.permute.xlu1 %834  ;;  %2584 = vmatprep.subr.bf16.mxu1 %v2610_v31  ;;  %2547 = vmatpush3.bf16.msra.mxu0 %v2610_v31 }
 0x124   : > { %930 = vst.msk [vmem:[#allocation3 + $0x8] sm:$0xff] %vm928_vm4, %v835_v26  ;;  %v841_v9 = vpop.permute.xlu0 %840  ;;  %2587 = vmatpush3.bf16.msra.mxu1 %v2610_v31  ;;  %2548 = vmatprep.subr.bf16.mxu0 %v2611_v29  ;;  %v1564_v31 = vld [vmem:[#allocation2 + $0x141] sm:$0xff] }
 0x125   : > { %1639 = vrot.lane.b32.xlu1 %v2946_v17, %s2628_s5  ;;  %933 = vst.msk [vmem:[#allocation3 + $0x20] sm:$0xff] %vm928_vm4, %v841_v9  ;;  %2585 = vmatprep.subr.bf16.mxu1 %v2611_v29  ;;  %v1738_v9 = vld [vmem:[#allocation2 + $0x62] sm:$0xff] }
 0x126   : > { %1641 = vrot.lane.b32.xlu0 %v2938_v14, %s2628_s5 }
 0x127   : > { %v839_v10 = vpop.permute.xlu1 %838  ;;  %2549 = vmatpush3.bf16.msra.mxu0 %v2611_v29 }
 0x128   : > { %932 = vst.msk [vmem:[#allocation3 + $0x18] sm:$0xff] %vm928_vm4, %v839_v10  ;;  %v845_v30 = vpop.permute.xlu0 %844  ;;  %2588 = vmatpush3.bf16.msra.mxu1 %v2611_v29 }
 0x129   : > { %1611 = vrot.lane.b32.xlu1 %v2813_v39, %s2628_s5  ;;  %935 = vst.msk [vmem:[#allocation3 + $0x30] sm:$0xff] %vm928_vm4, %v845_v30 }
 0x12a   : > { %1798 = vrot.lane.b32.xlu0 %v2999_v42, %s2629_s8  ;;  %v2612_v42 = vld [vmem:[%s4092_s1 + $0x10] ss:$0 sps:$4 sm:$0x33]  }
 0x12b   : > { %v843_v17 = vpop.permute.xlu1 %842  ;;  %2590 = vmatprep.subr.msk.bf16.mxu0 %vm2051_vm5, %v2612_v42  ;;  %v2053_v28 = vsel %vm2051_vm5, %v2612_v42, 0  ;;  %2591 = vmatprep.subr.msk.bf16.mxu1 %vm2051_vm5, %v2612_v42  ;;  %v1740_v42 = vld [vmem:[#allocation2 + $0x7a] sm:$0xff] }
 0x12c   : > { %934 = vst.msk [vmem:[#allocation3 + $0x28] sm:$0xff] %vm928_vm4, %v843_v17  ;;  %v849_v39 = vpop.permute.xlu0 %848  ;;  %2551 = vmatpush3.bf16.msra.mxu0 %v2053_v28  ;;  %2589 = vmatpush3.bf16.msra.mxu1 %v2053_v28  ;;  %v1754_v17 = vld [vmem:[#allocation2 + $0x122] sm:$0xff]  ;;  %v1755_v28 = vld [vmem:[#allocation2 + $0x12a] sm:$0xff] }
 0x12d   : > { %1643 = vrot.lane.b32.xlu1 %v2962_v21, %s2628_s5  ;;  %937 = vst.msk [vmem:[#allocation3 + $0x40] sm:$0xff] %vm928_vm4, %v849_v39  ;;  %v1739_v39 = vld [vmem:[#allocation2 + $0x6a] sm:$0xff] }
 0x12e   : > { %1830 = vrot.lane.b32.xlu0 %v3039_v37, %s2629_s8 }
 0x12f   : > { %v847_v36 = vpop.permute.xlu1 %846 }
 0x130   : > { %936 = vst.msk [vmem:[#allocation3 + $0x38] sm:$0xff] %vm928_vm4, %v847_v36  ;;  %v853_v34 = vpop.permute.xlu0 %852 }
 0x131   : > { %1800 = vrot.lane.b32.xlu1 %v3010_v45, %s2629_s8  ;;  %939 = vst.msk [vmem:[#allocation3 + $0x50] sm:$0xff] %vm928_vm4, %v853_v34 }
 0x132   : > { %1802 = vrot.lane.b32.xlu0 %v3006_v44, %s2629_s8 }
 0x133   : > { %v851_v47 = vpop.permute.xlu1 %850 }
 0x134   : > { %938 = vst.msk [vmem:[#allocation3 + $0x48] sm:$0xff] %vm928_vm4, %v851_v47  ;;  %v857_v37 = vpop.permute.xlu0 %856 }
 0x135   : > { %1832 = vrot.lane.b32.xlu1 %v3050_v50, %s2629_s8  ;;  %941 = vst.msk [vmem:[#allocation3 + $0x60] sm:$0xff] %vm928_vm4, %v857_v37  ;;  %v1756_v37 = vld [vmem:[#allocation2 + $0x13a] sm:$0xff] }
 0x136   : > { %1834 = vrot.lane.b32.xlu0 %v3046_v41, %s2629_s8 }
 0x137   : > { %v855_v45 = vpop.permute.xlu1 %854 }
 0x138   : > { %940 = vst.msk [vmem:[#allocation3 + $0x58] sm:$0xff] %vm928_vm4, %v855_v45  ;;  %v861_v53 = vpop.permute.xlu0 %860 }
 0x139   : > { %1804 = vrot.lane.b32.xlu1 %v3018_v48, %s2629_s8  ;;  %943 = vst.msk [vmem:[#allocation3 + $0x70] sm:$0xff] %vm928_vm4, %v861_v53 }
 0x13a   : > { %1033 = vrot.lane.b32.xlu0 %v965_v61, %s2625_s28  ;;  %v1741_v61 = vld [vmem:[#allocation2 + $0x82] sm:$0xff] }
 0x13b   : > { %v859_v0 = vpop.permute.xlu1 %858 }
 0x13c   : > { %942 = vst.msk [vmem:[#allocation3 + $0x68] sm:$0xff] %vm928_vm4, %v859_v0  ;;  %v865_v50 = vpop.permute.xlu0 %864 }
 0x13d   : > { %1836 = vrot.lane.b32.xlu1 %v3058_v22, %s2629_s8  ;;  %945 = vst.msk [vmem:[#allocation3 + $0x80] sm:$0xff] %vm928_vm4, %v865_v50  ;;  %v1757_v50 = vld [vmem:[#allocation2 + $0x142] sm:$0xff] }
 0x13e   : > { %1065 = vrot.lane.b32.xlu0 %v2938_v14, %s2625_s28  ;;  %v3318_v14 = vld [vmem:[#allocation2 + $0x69] sm:$0xff] }
 0x13f   : > { %v863_v2 = vpop.permute.xlu1 %862 }
 0x140   : > { %944 = vst.msk [vmem:[#allocation3 + $0x78] sm:$0xff] %vm928_vm4, %v863_v2  ;;  %v869_v1 = vpop.permute.xlu0 %868 }
 0x141   : > { %1035 = vrot.lane.b32.xlu1 %v966_v62, %s2625_s28  ;;  %947 = vst.msk [vmem:[#allocation3 + $0x90] sm:$0xff] %vm928_vm4, %v869_v1  ;;  %v3416_v1 = vld [vmem:[#allocation2 + $0x91] sm:$0xff] }
 0x142   : > { %1037 = vrot.lane.b32.xlu0 %v3309_v25, %s2625_s28 }
 0x143   : > { %v867_v4 = vpop.permute.xlu1 %866 }
 0x144   : > { %946 = vst.msk [vmem:[#allocation3 + $0x88] sm:$0xff] %vm928_vm4, %v867_v4  ;;  %v873_v27 = vpop.permute.xlu0 %872 }
 0x145   : > { %1067 = vrot.lane.b32.xlu1 %v2962_v21, %s2625_s28  ;;  %949 = vst.msk [vmem:[#allocation3 + $0xa0] sm:$0xff] %vm928_vm4, %v873_v27  ;;  %v4106_v21 = vld [vmem:[#allocation4_spill] sm:$0xff] }
 0x146   : > { %1069 = vrot.lane.b32.xlu0 %v2954_v18, %s2625_s28 }
 0x147   : > { %v871_v56 = vpop.permute.xlu1 %870 }
 0x148   : > { %948 = vst.msk [vmem:[#allocation3 + $0x98] sm:$0xff] %vm928_vm4, %v871_v56  ;;  %v877_v3 = vpop.permute.xlu0 %876 }
 0x149   : > { %1039 = vrot.lane.b32.xlu1 %v3318_v14, %s2625_s28  ;;  %951 = vst.msk [vmem:[#allocation3 + $0xb0] sm:$0xff] %vm928_vm4, %v877_v3  ;;  %v3426_v3 = vld [vmem:[#allocation2 + $0x99] sm:$0xff] }
 0x14a   : > { %1226 = vrot.lane.b32.xlu0 %v3006_v44, %s2626_s29 }
 0x14b   : > { %v875_v46 = vpop.permute.xlu1 %874 }
 0x14c   : > { %950 = vst.msk [vmem:[#allocation3 + $0xa8] sm:$0xff] %vm928_vm4, %v875_v46  ;;  %v881_v13 = vpop.permute.xlu0 %880 }
 0x14d   : > { %1071 = vrot.lane.b32.xlu1 %v4106_v21, %s2625_s28  ;;  %953 = vst.msk [vmem:[#allocation3 + $0xc0] sm:$0xff] %vm928_vm4, %v881_v13  ;;  %v3434_v13 = vld [vmem:[#allocation2 + $0x159] sm:$0xff] }
 0x14e   : > { %1258 = vrot.lane.b32.xlu0 %v3046_v41, %s2626_s29 }
 0x14f   : > { %v879_v18 = vpop.permute.xlu1 %878 }
 0x150   : > { %952 = vst.msk [vmem:[#allocation3 + $0xb8] sm:$0xff] %vm928_vm4, %v879_v18  ;;  %v885_v40 = vpop.permute.xlu0 %884 }
 0x151   : > { %1228 = vrot.lane.b32.xlu1 %v3018_v48, %s2626_s29  ;;  %955 = vst.msk [vmem:[#allocation3 + $0xd0] sm:$0xff] %vm928_vm4, %v885_v40  ;;  %v4109_v48 = vld [vmem:[#allocation6_spill] sm:$0xff] }
 0x152   : > { %1230 = vrot.lane.b32.xlu0 %v4107_v5, %s2626_s29  ;;  %v3444_v5 = vld [vmem:[#allocation2 + $0x92] sm:$0xff] }
 0x153   : > { %v883_v44 = vpop.permute.xlu1 %882 }
 0x154   : > { %954 = vst.msk [vmem:[#allocation3 + $0xc8] sm:$0xff] %vm928_vm4, %v883_v44  ;;  %v889_v35 = vpop.permute.xlu0 %888 }
 0x155   : > { %1260 = vrot.lane.b32.xlu1 %v3058_v22, %s2626_s29  ;;  %957 = vst.msk [vmem:[#allocation3 + $0xe0] sm:$0xff] %vm928_vm4, %v889_v35  ;;  %v4110_v22 = vld [vmem:[#allocation8_spill] sm:$0xff] }
 0x156   : > { %1262 = vrot.lane.b32.xlu0 %v4108_v43, %s2626_s29  ;;  %v3451_v43 = vld [vmem:[#allocation2 + $0x152] sm:$0xff] }
 0x157   : > { %v887_v41 = vpop.permute.xlu1 %886 }
 0x158   : > { %956 = vst.msk [vmem:[#allocation3 + $0xd8] sm:$0xff] %vm928_vm4, %v887_v41  ;;  %v893_v63 = vpop.permute.xlu0 %892 }
 0x159   : > { %1232 = vrot.lane.b32.xlu1 %v4109_v48, %s2626_s29  ;;  %959 = vst.msk [vmem:[#allocation3 + $0xf0] sm:$0xff] %vm928_vm4, %v893_v63  ;;  %v3454_v63 = vld [vmem:[#allocation2 + $0x9a] sm:$0xff] }
 0x15a   : > { %1420 = vrot.lane.b32.xlu0 %v2855_v57, %s2627_s30 }
 0x15b   : > { %v891_v38 = vpop.permute.xlu1 %890 }
 0x15c   : > { %958 = vst.msk [vmem:[#allocation3 + $0xe8] sm:$0xff] %vm928_vm4, %v891_v38  ;;  %v1026_v33 = vpop.permute.xlu0 %1025 }
 0x15d   : > { %1264 = vrot.lane.b32.xlu1 %v4110_v22, %s2626_s29  ;;  %1122 = vst.msk [vmem:[#allocation3] sm:$0xff] %vm1121_vm6, %v1026_v33  ;;  %v1356_v22 = vld [vmem:[#allocation2 + $0x90] sm:$0xff] }
 0x15e   : > { %1452 = vrot.lane.b32.xlu0 %v2926_v11, %s2627_s30 }
 0x15f   : > { %v895_v49 = vpop.permute.xlu1 %894 }
 0x160   : > { %960 = vst.msk [vmem:[#allocation3 + $0xf8] sm:$0xff] %vm928_vm4, %v895_v49  ;;  %v1030_v51 = vpop.permute.xlu0 %1029 }
 0x161   : > { %1422 = vrot.lane.b32.xlu1 %v2857_v58, %s2627_s30  ;;  %1124 = vst.msk [vmem:[#allocation3 + $0x10] sm:$0xff] %vm1121_vm6, %v1030_v51  ;;  %v3462_v51 = vld [vmem:[#allocation2 + $0x15a] sm:$0xff] }
 0x162   : > { %1424 = vrot.lane.b32.xlu0 %v2859_v59, %s2627_s30 }
 0x163   : > { %v1028_v57 = vpop.permute.xlu1 %1027 }
 0x164   : > { %1123 = vst.msk [vmem:[#allocation3 + $0x8] sm:$0xff] %vm1121_vm6, %v1028_v57  ;;  %v1058_v32 = vpop.permute.xlu0 %1057 }
 0x165   : > { %1454 = vrot.lane.b32.xlu1 %v2928_v12, %s2627_s30  ;;  %1138 = vst.msk [vmem:[#allocation3 + $0x80] sm:$0xff] %vm1121_vm6, %v1058_v32  ;;  %v1561_v12 = vld [vmem:[#allocation2 + $0x121] sm:$0xff] }
 0x166   : > { %1456 = vrot.lane.b32.xlu0 %v2942_v15, %s2627_s30 }
 0x167   : > { %v1032_v11 = vpop.permute.xlu1 %1031 }
 0x168   : > { %1125 = vst.msk [vmem:[#allocation3 + $0x18] sm:$0xff] %vm1121_vm6, %v1032_v11  ;;  %v1062_v58 = vpop.permute.xlu0 %1061 }
 0x169   : > { %1426 = vrot.lane.b32.xlu1 %v2868_v60, %s2627_s30  ;;  %1140 = vst.msk [vmem:[#allocation3 + $0x90] sm:$0xff] %vm1121_vm6, %v1062_v58  ;;  %v1547_v60 = vld [vmem:[#allocation2 + $0x79] sm:$0xff] }
 0x16a   : > { %1613 = vrot.lane.b32.xlu0 %v3309_v25, %s2628_s5 }
 0x16b   : > { %v1060_v59 = vpop.permute.xlu1 %1059 }
 0x16c   : > { %1139 = vst.msk [vmem:[#allocation3 + $0x88] sm:$0xff] %vm1121_vm6, %v1060_v59  ;;  %v1219_v15 = vpop.permute.xlu0 %1218 }
 0x16d   : > { %1458 = vrot.lane.b32.xlu1 %v2944_v16, %s2627_s30  ;;  %1315 = vst.msk [vmem:[#allocation3] sm:$0xff] %vm1314_vm7, %v1219_v15  ;;  %v1563_v16 = vld [vmem:[#allocation2 + $0x139] sm:$0xff] }
 0x16e   : > { %1645 = vrot.lane.b32.xlu0 %v1561_v12, %s2628_s5  ;;  %v1357_v12 = vld [vmem:[#allocation2 + $0x98] sm:$0xff] }
 0x16f   : > { %v1064_v6 = vpop.permute.xlu1 %1063 }
 0x170   : > { %1141 = vst.msk [vmem:[#allocation3 + $0x98] sm:$0xff] %vm1121_vm6, %v1064_v6  ;;  %v1251_v52 = vpop.permute.xlu0 %1250 }
 0x171   : > { %1615 = vrot.lane.b32.xlu1 %v3318_v14, %s2628_s5  ;;  %1331 = vst.msk [vmem:[#allocation3 + $0x80] sm:$0xff] %vm1314_vm7, %v1251_v52  ;;  %v3423_v14 = vld [vmem:[#allocation2 + $0x151] sm:$0xff]  ;;  %v1358_v52 = vld [vmem:[#allocation2 + $0xa8] sm:$0xff] }
 0x172   : > { %1617 = vrot.lane.b32.xlu0 %v1547_v60, %s2628_s5 }
 0x173   : > { %v1221_v7 = vpop.permute.xlu1 %1220 }
 0x174   : > { %1316 = vst.msk [vmem:[#allocation3 + $0x8] sm:$0xff] %vm1314_vm7, %v1221_v7  ;;  %v1223_v8 = vpop.permute.xlu0 %1222 }
 0x175   : > { %1647 = vrot.lane.b32.xlu1 %v1562_v54, %s2628_s5  ;;  %1317 = vst.msk [vmem:[#allocation3 + $0x10] sm:$0xff] %vm1314_vm7, %v1223_v8 }
 0x176   : > { %1649 = vrot.lane.b32.xlu0 %v1563_v16, %s2628_s5 }
 0x177   : > { %v1253_v26 = vpop.permute.xlu1 %1252 }
 0x178   : > { %1332 = vst.msk [vmem:[#allocation3 + $0x88] sm:$0xff] %vm1314_vm7, %v1253_v26  ;;  %v1255_v10 = vpop.permute.xlu0 %1254 }
 0x179   : > { %1619 = vrot.lane.b32.xlu1 %v1548_v55, %s2628_s5  ;;  %1333 = vst.msk [vmem:[#allocation3 + $0x90] sm:$0xff] %vm1314_vm7, %v1255_v10 }
 0x17a   : > { %1806 = vrot.lane.b32.xlu0 %v1738_v9, %s2629_s8  ;;  %v1359_v9 = vld [vmem:[#allocation2 + $0xb0] sm:$0xff] }
 0x17b   : > { %v1225_v30 = vpop.permute.xlu1 %1224 }
 0x17c   : > { %1318 = vst.msk [vmem:[#allocation3 + $0x18] sm:$0xff] %vm1314_vm7, %v1225_v30  ;;  %v1413_v29 = vpop.permute.xlu0 %1412 }
 0x17d   : > { %1651 = vrot.lane.b32.xlu1 %v1564_v31, %s2628_s5  ;;  %1509 = vst.msk [vmem:[#allocation3] sm:$0xff] %vm1508_vm8, %v1413_v29 }
 0x17e   : > { %1838 = vrot.lane.b32.xlu0 %v1754_v17, %s2629_s8 }
 0x17f   : > { %v1257_v36 = vpop.permute.xlu1 %1256 }
 0x180   : > { %1334 = vst.msk [vmem:[#allocation3 + $0x98] sm:$0xff] %vm1314_vm7, %v1257_v36  ;;  %v1445_v34 = vpop.permute.xlu0 %1444 }
 0x181   : > { %1808 = vrot.lane.b32.xlu1 %v1739_v39, %s2629_s8  ;;  %1525 = vst.msk [vmem:[#allocation3 + $0x80] sm:$0xff] %vm1508_vm8, %v1445_v34  ;;  %v1551_v39 = vld [vmem:[#allocation2 + $0xa9] sm:$0xff] }
 0x182   : > { %1810 = vrot.lane.b32.xlu0 %v1740_v42, %s2629_s8 }
 0x183   : > { %v1415_v47 = vpop.permute.xlu1 %1414 }
 0x184   : > { %1510 = vst.msk [vmem:[#allocation3 + $0x8] sm:$0xff] %vm1508_vm8, %v1415_v47  ;;  %v1417_v45 = vpop.permute.xlu0 %1416 }
 0x185   : > { %1840 = vrot.lane.b32.xlu1 %v1755_v28, %s2629_s8  ;;  %1511 = vst.msk [vmem:[#allocation3 + $0x10] sm:$0xff] %vm1508_vm8, %v1417_v45  ;;  %v1552_v28 = vld [vmem:[#allocation2 + $0xb1] sm:$0xff] }
 0x186   : > { %1842 = vrot.lane.b32.xlu0 %v1756_v37, %s2629_s8  ;;  %v1568_v45 = vld [vmem:[#allocation2 + $0x171] sm:$0xff] }
 0x187   : > { %v1447_v53 = vpop.permute.xlu1 %1446 }
 0x188   : > { %1526 = vst.msk [vmem:[#allocation3 + $0x88] sm:$0xff] %vm1508_vm8, %v1447_v53  ;;  %v1449_v0 = vpop.permute.xlu0 %1448 }
 0x189   : > { %1812 = vrot.lane.b32.xlu1 %v1741_v61, %s2629_s8  ;;  %1527 = vst.msk [vmem:[#allocation3 + $0x90] sm:$0xff] %vm1508_vm8, %v1449_v0 }
 0x18a   : > { %1041 = vrot.lane.b32.xlu0 %v1547_v60, %s2625_s28 }
 0x18b   : > { %v1419_v62 = vpop.permute.xlu1 %1418 }
 0x18c   : > { %1512 = vst.msk [vmem:[#allocation3 + $0x18] sm:$0xff] %vm1508_vm8, %v1419_v62  ;;  %v1606_v2 = vpop.permute.xlu0 %1605 }
 0x18d   : > { %1844 = vrot.lane.b32.xlu1 %v1757_v50, %s2629_s8  ;;  %1702 = vst.msk [vmem:[#allocation3] sm:$0xff] %vm1701_vm9, %v1606_v2 }
 0x18e   : > { %1073 = vrot.lane.b32.xlu0 %v1563_v16, %s2625_s28 }
 0x18f   : > { %v1451_v25 = vpop.permute.xlu1 %1450 }
 0x190   : > { %1528 = vst.msk [vmem:[#allocation3 + $0x98] sm:$0xff] %vm1508_vm8, %v1451_v25  ;;  %v1638_v4 = vpop.permute.xlu0 %1637  ;;  %v1760_v25 = vld [vmem:[#allocation2 + $0x16a] sm:$0xff] }
 0x191   : > { %1043 = vrot.lane.b32.xlu1 %v1548_v55, %s2625_s28  ;;  %1718 = vst.msk [vmem:[#allocation3 + $0x80] sm:$0xff] %vm1701_vm9, %v1638_v4  ;;  %v1745_v4 = vld [vmem:[#allocation2 + $0xb2] sm:$0xff] }
 0x192   : > { %1045 = vrot.lane.b32.xlu0 %v3416_v1, %s2625_s28 }
 0x193   : > { %v1608_v27 = vpop.permute.xlu1 %1607 }
 0x194   : > { %1703 = vst.msk [vmem:[#allocation3 + $0x8] sm:$0xff] %vm1701_vm9, %v1608_v27  ;;  %v1610_v56 = vpop.permute.xlu0 %1609 }
 0x195   : > { %1075 = vrot.lane.b32.xlu1 %v1564_v31, %s2625_s28  ;;  %1704 = vst.msk [vmem:[#allocation3 + $0x10] sm:$0xff] %vm1701_vm9, %v1610_v56  ;;  %v1761_v56 = vld [vmem:[#allocation2 + $0x172] sm:$0xff] }
 0x196   : > { %1077 = vrot.lane.b32.xlu0 %v3423_v14, %s2625_s28 }
 0x197   : > { %v1640_v46 = vpop.permute.xlu1 %1639 }
 0x198   : > { %1719 = vst.msk [vmem:[#allocation3 + $0x88] sm:$0xff] %vm1701_vm9, %v1640_v46  ;;  %v1642_v21 = vpop.permute.xlu0 %1641 }
 0x199   : > { %1047 = vrot.lane.b32.xlu1 %v3426_v3, %s2625_s28  ;;  %1720 = vst.msk [vmem:[#allocation3 + $0x90] sm:$0xff] %vm1701_vm9, %v1642_v21 }
 0x19a   : > { %1234 = vrot.lane.b32.xlu0 %v1740_v42, %s2626_s29 }
 0x19b   : > { %v1612_v18 = vpop.permute.xlu1 %1611 }
 0x19c   : > { %1705 = vst.msk [vmem:[#allocation3 + $0x18] sm:$0xff] %vm1701_vm9, %v1612_v18  ;;  %v1799_v40 = vpop.permute.xlu0 %1798 }
 0x19d   : > { %1079 = vrot.lane.b32.xlu1 %v3434_v13, %s2625_s28  ;;  %1895 = vst.msk [vmem:[#allocation3] sm:$0xff] %vm1894_vm10, %v1799_v40 }
 0x19e   : > { %1266 = vrot.lane.b32.xlu0 %v1756_v37, %s2626_s29 }
 0x19f   : > { %v1644_v44 = vpop.permute.xlu1 %1643 }
 0x1a0   : > { %1721 = vst.msk [vmem:[#allocation3 + $0x98] sm:$0xff] %vm1701_vm9, %v1644_v44  ;;  %v1831_v35 = vpop.permute.xlu0 %1830  ;;  %v3543_v44 = vld [vmem:[#allocation2 + $0x181] sm:$0xff] }
 0x1a1   : > { %1236 = vrot.lane.b32.xlu1 %v1741_v61, %s2626_s29  ;;  %1911 = vst.msk [vmem:[#allocation3 + $0x80] sm:$0xff] %vm1894_vm10, %v1831_v35  ;;  %v3546_v35 = vld [vmem:[#allocation2 + $0xc9] sm:$0xff] }
 0x1a2   : > { %1238 = vrot.lane.b32.xlu0 %v3444_v5, %s2626_s29 }
 0x1a3   : > { %v1801_v41 = vpop.permute.xlu1 %1800 }
 0x1a4   : > { %1896 = vst.msk [vmem:[#allocation3 + $0x8] sm:$0xff] %vm1894_vm10, %v1801_v41  ;;  %v1803_v48 = vpop.permute.xlu0 %1802  ;;  %v1927_v33 = vld [vmem:[#allocation3] sm:$0xff] }
 0x1a5   : > { %1268 = vrot.lane.b32.xlu1 %v1757_v50, %s2626_s29  ;;  %1897 = vst.msk [vmem:[#allocation3 + $0x10] sm:$0xff] %vm1894_vm10, %v1803_v48  ;;  %v1744_v50 = vld [vmem:[#allocation2 + $0xaa] sm:$0xff] }
 0x1a6   : > { %1270 = vrot.lane.b32.xlu0 %v3451_v43, %s2626_s29  ;;  %v3554_v48 = vld [vmem:[#allocation2 + $0x189] sm:$0xff] }
 0x1a7   : > { %v1833_v38 = vpop.permute.xlu1 %1832 }
 0x1a8   : > { %1912 = vst.msk [vmem:[#allocation3 + $0x88] sm:$0xff] %vm1894_vm10, %v1833_v38  ;;  %v1835_v49 = vpop.permute.xlu0 %1834  ;;  %v1943_v58 = vld [vmem:[#allocation3 + $0x80] sm:$0xff] }
 0x1a9   : > { %1240 = vrot.lane.b32.xlu1 %v3454_v63, %s2626_s29  ;;  %1913 = vst.msk [vmem:[#allocation3 + $0x90] sm:$0xff] %vm1894_vm10, %v1835_v49 }
 0x1aa   : > { %1428 = vrot.lane.b32.xlu0 %v1356_v22, %s2627_s30 }
 0x1ab   : > { %v1805_v57 = vpop.permute.xlu1 %1804  ;;  %v1928_v32 = vld [vmem:[#allocation3 + $0x8] sm:$0xff] }
 0x1ac   : > { %1898 = vst.msk [vmem:[#allocation3 + $0x18] sm:$0xff] %vm1894_vm10, %v1805_v57  ;;  %v1959_v11 = vpack.c.bf16 %v1928_v32, %v1927_v33  ;;  %v1034_v59 = vpop.permute.xlu0 %1033  ;;  %v1929_v54 = vld [vmem:[#allocation3 + $0x10] sm:$0xff] }
 0x1ad   : > { %1272 = vrot.lane.b32.xlu1 %v3462_v51, %s2626_s29  ;;  %1126 = vst.msk [vmem:[#allocation3 + $0x20] sm:$0xff] %vm1121_vm6, %v1034_v59  ;;  %v3564_v33 = vld [vmem:[#allocation2 + $0xc2] sm:$0xff] }
 0x1ae   : > { %2552 = vmatprep.mubr.msk.bf16.mxu0 %vm2002_vm11, %v1959_v11  ;;  %1460 = vrot.lane.b32.xlu0 %v2958_v19, %s2627_s30  ;;  %v3571_v57 = vld [vmem:[#allocation2 + $0x182] sm:$0xff]  ;;  %v3574_v11 = vld [vmem:[#allocation2 + $0xca] sm:$0xff] }
 0x1af   : > { %v1837_v15 = vpop.permute.xlu1 %1836  ;;  %v1944_v6 = vld [vmem:[#allocation3 + $0x88] sm:$0xff]  ;;  %v1360_v59 = vld [vmem:[#allocation2 + $0xc0] sm:$0xff] }
 0x1b0   : > { %1914 = vst.msk [vmem:[#allocation3 + $0x98] sm:$0xff] %vm1894_vm10, %v1837_v15  ;;  %v1967_v60 = vpack.c.bf16 %v1944_v6, %v1943_v58  ;;  %v1066_v7 = vpop.permute.xlu0 %1065  ;;  %v1945_v19 = vld [vmem:[#allocation3 + $0x90] sm:$0xff]  ;;  %v3582_v6 = vld [vmem:[#allocation2 + $0x18a] sm:$0xff] }
 0x1b1   : > { %1430 = vrot.lane.b32.xlu1 %v1357_v12, %s2627_s30  ;;  %1142 = vst.msk [vmem:[#allocation3 + $0xa0] sm:$0xff] %vm1121_vm6, %v1066_v7  ;;  %v1376_v7 = vld [vmem:[#allocation2 + $0x180] sm:$0xff] }
 0x1b2   : > { %2568 = vmatprep.mubr.msk.bf16.mxu1 %vm2002_vm11, %v1967_v60  ;;  %1432 = vrot.lane.b32.xlu0 %v1358_v52, %s2627_s30 }
 0x1b3   : > { %v1036_v16 = vpop.permute.xlu1 %1035  ;;  %v1930_v8 = vld [vmem:[#allocation3 + $0x18] sm:$0xff] }
 0x1b4   : > { %1127 = vst.msk [vmem:[#allocation3 + $0x28] sm:$0xff] %vm1121_vm6, %v1036_v16  ;;  %v1960_v55 = vpack.c.bf16 %v1930_v8, %v1929_v54  ;;  %v1038_v26 = vpop.permute.xlu0 %1037 }
 0x1b5   : > { %1462 = vrot.lane.b32.xlu1 %v2960_v20, %s2627_s30  ;;  %1128 = vst.msk [vmem:[#allocation3 + $0x30] sm:$0xff] %vm1121_vm6, %v1038_v26 }
 0x1b6   : > { %2553 = vmatmul.mubr.msk.bf16.vlgmr.msra.gmra.mrb[0].mxu0 %vm2002_vm11, %v1960_v55  ;;  %1464 = vrot.lane.b32.xlu0 %v2972_v23, %s2627_s30  ;;  %v1361_v55 = vld [vmem:[#allocation2 + $0xc8] sm:$0xff] }
 0x1b7   : > { %v1068_v10 = vpop.permute.xlu1 %1067  ;;  %v1946_v31 = vld [vmem:[#allocation3 + $0x98] sm:$0xff] }
 0x1b8   : > { %1143 = vst.msk [vmem:[#allocation3 + $0xa8] sm:$0xff] %vm1121_vm6, %v1068_v10  ;;  %v1968_v30 = vpack.c.bf16 %v1946_v31, %v1945_v19  ;;  %v1070_v17 = vpop.permute.xlu0 %1069  ;;  %v1362_v10 = vld [vmem:[#allocation2 + $0xd8] sm:$0xff] }
 0x1b9   : > { %1434 = vrot.lane.b32.xlu1 %v1359_v9, %s2627_s30  ;;  %1144 = vst.msk [vmem:[#allocation3 + $0xb0] sm:$0xff] %vm1121_vm6, %v1070_v17  ;;  %v1377_v17 = vld [vmem:[#allocation2 + $0x188] sm:$0xff] }
 0x1ba   : > { %2569 = vmatmul.mubr.msk.bf16.vlgmr.msra.gmra.mrb[0].mxu1 %vm2002_vm11, %v1968_v30  ;;  %1621 = vrot.lane.b32.xlu0 %v3416_v1, %s2628_s5 }
 0x1bb   : > { %v1040_v20 = vpop.permute.xlu1 %1039 }
 0x1bc   : > { %1129 = vst.msk [vmem:[#allocation3 + $0x38] sm:$0xff] %vm1121_vm6, %v1040_v20  ;;  %v1227_v23 = vpop.permute.xlu0 %1226 }
 0x1bd   : > { %1466 = vrot.lane.b32.xlu1 %v2974_v24, %s2627_s30  ;;  %1319 = vst.msk [vmem:[#allocation3 + $0x20] sm:$0xff] %vm1314_vm7, %v1227_v23  ;;  %v1567_v24 = vld [vmem:[#allocation2 + $0x169] sm:$0xff] }
 0x1be   : > { %1653 = vrot.lane.b32.xlu0 %v3423_v14, %s2628_s5 }
 0x1bf   : > { %v1072_v29 = vpop.permute.xlu1 %1071 }
 0x1c0   : > { %1145 = vst.msk [vmem:[#allocation3 + $0xb8] sm:$0xff] %vm1121_vm6, %v1072_v29  ;;  %v1259_v36 = vpop.permute.xlu0 %1258 }
 0x1c1   : > { %1623 = vrot.lane.b32.xlu1 %v3426_v3, %s2628_s5  ;;  %1335 = vst.msk [vmem:[#allocation3 + $0xa0] sm:$0xff] %vm1314_vm7, %v1259_v36 }
 0x1c2   : > { %1625 = vrot.lane.b32.xlu0 %v1551_v39, %s2628_s5 }
 0x1c3   : > { %v1229_v42 = vpop.permute.xlu1 %1228 }
 0x1c4   : > { %1320 = vst.msk [vmem:[#allocation3 + $0x28] sm:$0xff] %vm1314_vm7, %v1229_v42  ;;  %v1231_v34 = vpop.permute.xlu0 %1230 }
 0x1c5   : > { %1655 = vrot.lane.b32.xlu1 %v3434_v13, %s2628_s5  ;;  %1321 = vst.msk [vmem:[#allocation3 + $0x30] sm:$0xff] %vm1314_vm7, %v1231_v34  ;;  %v3536_v13 = vld [vmem:[#allocation2 + $0xc1] sm:$0xff] }
 0x1c6   : > { %1657 = vrot.lane.b32.xlu0 %v1567_v24, %s2628_s5 }
 0x1c7   : > { %v1261_v47 = vpop.permute.xlu1 %1260 }
 0x1c8   : > { %1336 = vst.msk [vmem:[#allocation3 + $0xa8] sm:$0xff] %vm1314_vm7, %v1261_v47  ;;  %v1263_v37 = vpop.permute.xlu0 %1262 }
 0x1c9   : > { %1627 = vrot.lane.b32.xlu1 %v1552_v28, %s2628_s5  ;;  %1337 = vst.msk [vmem:[#allocation3 + $0xb0] sm:$0xff] %vm1314_vm7, %v1263_v37 }
 0x1ca   : > { %1814 = vrot.lane.b32.xlu0 %v3444_v5, %s2629_s8 }
 0x1cb   : > { %v1233_v61 = vpop.permute.xlu1 %1232 }
 0x1cc   : > { %1322 = vst.msk [vmem:[#allocation3 + $0x38] sm:$0xff] %vm1314_vm7, %v1233_v61  ;;  %v1421_v53 = vpop.permute.xlu0 %1420 }
 0x1cd   : > { %1659 = vrot.lane.b32.xlu1 %v1568_v45, %s2628_s5  ;;  %1513 = vst.msk [vmem:[#allocation3 + $0x20] sm:$0xff] %vm1508_vm8, %v1421_v53 }
 0x1ce   : > { %1846 = vrot.lane.b32.xlu0 %v3451_v43, %s2629_s8 }
 0x1cf   : > { %v1265_v0 = vpop.permute.xlu1 %1264 }
 0x1d0   : > { %1338 = vst.msk [vmem:[#allocation3 + $0xb8] sm:$0xff] %vm1314_vm7, %v1265_v0  ;;  %v1453_v62 = vpop.permute.xlu0 %1452 }
 0x1d1   : > { %1816 = vrot.lane.b32.xlu1 %v3454_v63, %s2629_s8  ;;  %1529 = vst.msk [vmem:[#allocation3 + $0xa0] sm:$0xff] %vm1508_vm8, %v1453_v62 }
 0x1d2   : > { %1818 = vrot.lane.b32.xlu0 %v1744_v50, %s2629_s8 }
 0x1d3   : > { %v1423_v2 = vpop.permute.xlu1 %1422 }
 0x1d4   : > { %1514 = vst.msk [vmem:[#allocation3 + $0x28] sm:$0xff] %vm1508_vm8, %v1423_v2  ;;  %v1425_v1 = vpop.permute.xlu0 %1424 }
 0x1d5   : > { %1848 = vrot.lane.b32.xlu1 %v3462_v51, %s2629_s8  ;;  %1515 = vst.msk [vmem:[#allocation3 + $0x30] sm:$0xff] %vm1508_vm8, %v1425_v1 }
 0x1d6   : > { %1850 = vrot.lane.b32.xlu0 %v1760_v25, %s2629_s8 }
 0x1d7   : > { %v1455_v27 = vpop.permute.xlu1 %1454 }
 0x1d8   : > { %1530 = vst.msk [vmem:[#allocation3 + $0xa8] sm:$0xff] %vm1508_vm8, %v1455_v27  ;;  %v1457_v14 = vpop.permute.xlu0 %1456 }
 0x1d9   : > { %1820 = vrot.lane.b32.xlu1 %v1745_v4, %s2629_s8  ;;  %1531 = vst.msk [vmem:[#allocation3 + $0xb0] sm:$0xff] %vm1508_vm8, %v1457_v14 }
 0x1da   : > { %1049 = vrot.lane.b32.xlu0 %v1551_v39, %s2625_s28  ;;  %v1378_v39 = vld [vmem:[#allocation2 + $0x198] sm:$0xff] }
 0x1db   : > { %v1427_v3 = vpop.permute.xlu1 %1426 }
 0x1dc   : > { %1516 = vst.msk [vmem:[#allocation3 + $0x38] sm:$0xff] %vm1508_vm8, %v1427_v3  ;;  %v1614_v46 = vpop.permute.xlu0 %1613 }
 0x1dd   : > { %1852 = vrot.lane.b32.xlu1 %v1761_v56, %s2629_s8  ;;  %1706 = vst.msk [vmem:[#allocation3 + $0x20] sm:$0xff] %vm1701_vm9, %v1614_v46 }
 0x1de   : > { %1081 = vrot.lane.b32.xlu0 %v1567_v24, %s2625_s28  ;;  %v1363_v24 = vld [vmem:[#allocation2 + $0xe0] sm:$0xff] }
 0x1df   : > { %v1459_v21 = vpop.permute.xlu1 %1458 }
 0x1e0   : > { %1532 = vst.msk [vmem:[#allocation3 + $0xb8] sm:$0xff] %vm1508_vm8, %v1459_v21  ;;  %v1646_v18 = vpop.permute.xlu0 %1645 }
 0x1e1   : > { %1051 = vrot.lane.b32.xlu1 %v1552_v28, %s2625_s28  ;;  %1722 = vst.msk [vmem:[#allocation3 + $0xa0] sm:$0xff] %vm1701_vm9, %v1646_v18 }
 0x1e2   : > { %1053 = vrot.lane.b32.xlu0 %v3536_v13, %s2625_s28 }
 0x1e3   : > { %v1616_v40 = vpop.permute.xlu1 %1615 }
 0x1e4   : > { %1707 = vst.msk [vmem:[#allocation3 + $0x28] sm:$0xff] %vm1701_vm9, %v1616_v40  ;;  %v1618_v5 = vpop.permute.xlu0 %1617 }
 0x1e5   : > { %1083 = vrot.lane.b32.xlu1 %v1568_v45, %s2625_s28  ;;  %1708 = vst.msk [vmem:[#allocation3 + $0x30] sm:$0xff] %vm1701_vm9, %v1618_v5  ;;  %v1379_v45 = vld [vmem:[#allocation2 + $0x1a0] sm:$0xff] }
 0x1e6   : > { %1085 = vrot.lane.b32.xlu0 %v3543_v44, %s2625_s28 }
 0x1e7   : > { %v1648_v41 = vpop.permute.xlu1 %1647 }
 0x1e8   : > { %1723 = vst.msk [vmem:[#allocation3 + $0xa8] sm:$0xff] %vm1701_vm9, %v1648_v41  ;;  %v1650_v43 = vpop.permute.xlu0 %1649 }
 0x1e9   : > { %1055 = vrot.lane.b32.xlu1 %v3546_v35, %s2625_s28  ;;  %1724 = vst.msk [vmem:[#allocation3 + $0xb0] sm:$0xff] %vm1701_vm9, %v1650_v43 }
 0x1ea   : > { %1242 = vrot.lane.b32.xlu0 %v1744_v50, %s2626_s29  ;;  %v1555_v50 = vld [vmem:[#allocation2 + $0xd9] sm:$0xff] }
 0x1eb   : > { %v1620_v63 = vpop.permute.xlu1 %1619 }
 0x1ec   : > { %1709 = vst.msk [vmem:[#allocation3 + $0x38] sm:$0xff] %vm1701_vm9, %v1620_v63  ;;  %v1807_v38 = vpop.permute.xlu0 %1806 }
 0x1ed   : > { %1087 = vrot.lane.b32.xlu1 %v3554_v48, %s2625_s28  ;;  %1899 = vst.msk [vmem:[#allocation3 + $0x20] sm:$0xff] %vm1894_vm10, %v1807_v38 }
 0x1ee   : > { %1274 = vrot.lane.b32.xlu0 %v1760_v25, %s2626_s29  ;;  %v1571_v25 = vld [vmem:[#allocation2 + $0x199] sm:$0xff] }
 0x1ef   : > { %v1652_v22 = vpop.permute.xlu1 %1651 }
 0x1f0   : > { %1725 = vst.msk [vmem:[#allocation3 + $0xb8] sm:$0xff] %vm1701_vm9, %v1652_v22  ;;  %v1839_v49 = vpop.permute.xlu0 %1838 }
 0x1f1   : > { %1244 = vrot.lane.b32.xlu1 %v1745_v4, %s2626_s29  ;;  %1915 = vst.msk [vmem:[#allocation3 + $0xa0] sm:$0xff] %vm1894_vm10, %v1839_v49  ;;  %v1556_v4 = vld [vmem:[#allocation2 + $0xe1] sm:$0xff] }
 0x1f2   : > { %1246 = vrot.lane.b32.xlu0 %v3564_v33, %s2626_s29 }
 0x1f3   : > { %v1809_v51 = vpop.permute.xlu1 %1808 }
 0x1f4   : > { %1900 = vst.msk [vmem:[#allocation3 + $0x28] sm:$0xff] %vm1894_vm10, %v1809_v51  ;;  %v1811_v32 = vpop.permute.xlu0 %1810  ;;  %v1931_v12 = vld [vmem:[#allocation3 + $0x20] sm:$0xff] }
 0x1f5   : > { %1276 = vrot.lane.b32.xlu1 %v1761_v56, %s2626_s29  ;;  %1901 = vst.msk [vmem:[#allocation3 + $0x30] sm:$0xff] %vm1894_vm10, %v1811_v32  ;;  %v1572_v56 = vld [vmem:[#allocation2 + $0x1a1] sm:$0xff] }
 0x1f6   : > { %1278 = vrot.lane.b32.xlu0 %v3571_v57, %s2626_s29 }
 0x1f7   : > { %v1841_v58 = vpop.permute.xlu1 %1840 }
 0x1f8   : > { %1916 = vst.msk [vmem:[#allocation3 + $0xa8] sm:$0xff] %vm1894_vm10, %v1841_v58  ;;  %v1843_v15 = vpop.permute.xlu0 %1842  ;;  %v1947_v16 = vld [vmem:[#allocation3 + $0xa0] sm:$0xff] }
 0x1f9   : > { %1248 = vrot.lane.b32.xlu1 %v3574_v11, %s2626_s29  ;;  %1917 = vst.msk [vmem:[#allocation3 + $0xb0] sm:$0xff] %vm1894_vm10, %v1843_v15 }
 0x1fa   : > { %1436 = vrot.lane.b32.xlu0 %v1360_v59, %s2627_s30 }
 0x1fb   : > { %v1813_v60 = vpop.permute.xlu1 %1812  ;;  %v1932_v52 = vld [vmem:[#allocation3 + $0x28] sm:$0xff] }
 0x1fc   : > { %1902 = vst.msk [vmem:[#allocation3 + $0x38] sm:$0xff] %vm1894_vm10, %v1813_v60  ;;  %v1961_v54 = vpack.c.bf16 %v1932_v52, %v1931_v12  ;;  %v1042_v8 = vpop.permute.xlu0 %1041  ;;  %v1933_v31 = vld [vmem:[#allocation3 + $0x30] sm:$0xff] }
 0x1fd   : > { %1280 = vrot.lane.b32.xlu1 %v3582_v6, %s2626_s29  ;;  %1130 = vst.msk [vmem:[#allocation3 + $0x40] sm:$0xff] %vm1121_vm6, %v1042_v8 }
 0x1fe   : > { %2556 = vmatprep.mubr.msk.bf16.mxu0 %vm2002_vm11, %v1961_v54  ;;  %1468 = vrot.lane.b32.xlu0 %v1376_v7, %s2627_s30 }
 0x1ff   : > { %v1845_v19 = vpop.permute.xlu1 %1844  ;;  %v1948_v26 = vld [vmem:[#allocation3 + $0xa8] sm:$0xff] }
 0x200   : > { %1918 = vst.msk [vmem:[#allocation3 + $0xb8] sm:$0xff] %vm1894_vm10, %v1845_v19  ;;  %v1969_v9 = vpack.c.bf16 %v1948_v26, %v1947_v16  ;;  %v1074_v30 = vpop.permute.xlu0 %1073  ;;  %v1949_v36 = vld [vmem:[#allocation3 + $0xb0] sm:$0xff] }
 0x201   : > { %1438 = vrot.lane.b32.xlu1 %v1361_v55, %s2627_s30  ;;  %1146 = vst.msk [vmem:[#allocation3 + $0xc0] sm:$0xff] %vm1121_vm6, %v1074_v30 }
 0x202   : > { %2572 = vmatprep.mubr.msk.bf16.mxu1 %vm2002_vm11, %v1969_v9  ;;  %1440 = vrot.lane.b32.xlu0 %v1362_v10, %s2627_s30 }
 0x203   : > { %v1044_v20 = vpop.permute.xlu1 %1043  ;;  %v1934_v23 = vld [vmem:[#allocation3 + $0x38] sm:$0xff] }
 0x204   : > { %1131 = vst.msk [vmem:[#allocation3 + $0x48] sm:$0xff] %vm1121_vm6, %v1044_v20  ;;  %v1962_v29 = vpack.c.bf16 %v1934_v23, %v1933_v31  ;;  %v1046_v42 = vpop.permute.xlu0 %1045 }
 0x205   : > { %1470 = vrot.lane.b32.xlu1 %v1377_v17, %s2627_s30  ;;  %1132 = vst.msk [vmem:[#allocation3 + $0x50] sm:$0xff] %vm1121_vm6, %v1046_v42 }
 0x206   : > { %2557 = vmatmul.mubr.msk.bf16.gmra.mrb[4].mxu0 %vm2002_vm11, %v1962_v29  ;;  %1472 = vrot.lane.b32.xlu0 %v1378_v39, %s2627_s30 }
 0x207   : > { %v1076_v34 = vpop.permute.xlu1 %1075  ;;  %v1950_v28 = vld [vmem:[#allocation3 + $0xb8] sm:$0xff] }
 0x208   : > { %1147 = vst.msk [vmem:[#allocation3 + $0xc8] sm:$0xff] %vm1121_vm6, %v1076_v34  ;;  %v1970_v47 = vpack.c.bf16 %v1950_v28, %v1949_v36  ;;  %v1078_v37 = vpop.permute.xlu0 %1077 }
 0x209   : > { %1442 = vrot.lane.b32.xlu1 %v1363_v24, %s2627_s30  ;;  %1148 = vst.msk [vmem:[#allocation3 + $0xd0] sm:$0xff] %vm1121_vm6, %v1078_v37 }
 0x20a   : > { %2573 = vmatmul.mubr.msk.bf16.gmra.mrb[4].mxu1 %vm2002_vm11, %v1970_v47  ;;  %1629 = vrot.lane.b32.xlu0 %v3536_v13, %s2628_s5  ;;  %v1748_v13 = vld [vmem:[#allocation2 + $0xda] sm:$0xff] }
 0x20b   : > { %v1048_v61 = vpop.permute.xlu1 %1047 }
 0x20c   : > { %1133 = vst.msk [vmem:[#allocation3 + $0x58] sm:$0xff] %vm1121_vm6, %v1048_v61  ;;  %v1235_v53 = vpop.permute.xlu0 %1234 }
 0x20d   : > { %1474 = vrot.lane.b32.xlu1 %v1379_v45, %s2627_s30  ;;  %1323 = vst.msk [vmem:[#allocation3 + $0x40] sm:$0xff] %vm1314_vm7, %v1235_v53 }
 0x20e   : > { %1661 = vrot.lane.b32.xlu0 %v3543_v44, %s2628_s5  ;;  %v1764_v44 = vld [vmem:[#allocation2 + $0x19a] sm:$0xff] }
 0x20f   : > { %v1080_v0 = vpop.permute.xlu1 %1079 }
 0x210   : > { %1149 = vst.msk [vmem:[#allocation3 + $0xd8] sm:$0xff] %vm1121_vm6, %v1080_v0  ;;  %v1267_v62 = vpop.permute.xlu0 %1266 }
 0x211   : > { %1631 = vrot.lane.b32.xlu1 %v3546_v35, %s2628_s5  ;;  %1339 = vst.msk [vmem:[#allocation3 + $0xc0] sm:$0xff] %vm1314_vm7, %v1267_v62  ;;  %v1749_v35 = vld [vmem:[#allocation2 + $0xe2] sm:$0xff] }
 0x212   : > { %1633 = vrot.lane.b32.xlu0 %v1555_v50, %s2628_s5 }
 0x213   : > { %v1237_v2 = vpop.permute.xlu1 %1236 }
 0x214   : > { %1324 = vst.msk [vmem:[#allocation3 + $0x48] sm:$0xff] %vm1314_vm7, %v1237_v2  ;;  %v1239_v1 = vpop.permute.xlu0 %1238 }
 0x215   : > { %1663 = vrot.lane.b32.xlu1 %v3554_v48, %s2628_s5  ;;  %1325 = vst.msk [vmem:[#allocation3 + $0x50] sm:$0xff] %vm1314_vm7, %v1239_v1  ;;  %v1765_v48 = vld [vmem:[#allocation2 + $0x1a2] sm:$0xff] }
 0x216   : > { %1665 = vrot.lane.b32.xlu0 %v1571_v25, %s2628_s5 }
 0x217   : > { %v1269_v27 = vpop.permute.xlu1 %1268 }
 0x218   : > { %1340 = vst.msk [vmem:[#allocation3 + $0xc8] sm:$0xff] %vm1314_vm7, %v1269_v27  ;;  %v1271_v14 = vpop.permute.xlu0 %1270 }
 0x219   : > { %1635 = vrot.lane.b32.xlu1 %v1556_v4, %s2628_s5  ;;  %1341 = vst.msk [vmem:[#allocation3 + $0xd0] sm:$0xff] %vm1314_vm7, %v1271_v14 }
 0x21a   : > { %1822 = vrot.lane.b32.xlu0 %v3564_v33, %s2629_s8 }
 0x21b   : > { %v1241_v3 = vpop.permute.xlu1 %1240 }
 0x21c   : > { %1326 = vst.msk [vmem:[#allocation3 + $0x58] sm:$0xff] %vm1314_vm7, %v1241_v3  ;;  %v1429_v46 = vpop.permute.xlu0 %1428 }
 0x21d   : > { %1667 = vrot.lane.b32.xlu1 %v1572_v56, %s2628_s5  ;;  %1517 = vst.msk [vmem:[#allocation3 + $0x40] sm:$0xff] %vm1508_vm8, %v1429_v46 }
 0x21e   : > { %1854 = vrot.lane.b32.xlu0 %v3571_v57, %s2629_s8 }
 0x21f   : > { %v1273_v21 = vpop.permute.xlu1 %1272 }
 0x220   : > { %1342 = vst.msk [vmem:[#allocation3 + $0xd8] sm:$0xff] %vm1314_vm7, %v1273_v21  ;;  %v1461_v18 = vpop.permute.xlu0 %1460 }
 0x221   : > { %1824 = vrot.lane.b32.xlu1 %v3574_v11, %s2629_s8  ;;  %1533 = vst.msk [vmem:[#allocation3 + $0xc0] sm:$0xff] %vm1508_vm8, %v1461_v18 }
 0x222   : > { %1826 = vrot.lane.b32.xlu0 %v1748_v13, %s2629_s8 }
 0x223   : > { %v1431_v40 = vpop.permute.xlu1 %1430 }
 0x224   : > { %1518 = vst.msk [vmem:[#allocation3 + $0x48] sm:$0xff] %vm1508_vm8, %v1431_v40  ;;  %v1433_v5 = vpop.permute.xlu0 %1432 }
 0x225   : > { %1856 = vrot.lane.b32.xlu1 %v3582_v6, %s2629_s8  ;;  %1519 = vst.msk [vmem:[#allocation3 + $0x50] sm:$0xff] %vm1508_vm8, %v1433_v5  ;;  %v3700_v5 = vld [vmem:[%s4093_s2] ss:$0 sm:$0xff] }
 0x226   : > { %1858 = vrot.lane.b32.xlu0 %v1764_v44, %s2629_s8 }
 0x227   : > { %v1463_v41 = vpop.permute.xlu1 %1462 }
 0x228   : > { %1534 = vst.msk [vmem:[#allocation3 + $0xc8] sm:$0xff] %vm1508_vm8, %v1463_v41  ;;  %v1465_v43 = vpop.permute.xlu0 %1464 }
 0x229   : > { %1828 = vrot.lane.b32.xlu1 %v1749_v35, %s2629_s8  ;;  %1535 = vst.msk [vmem:[#allocation3 + $0xd0] sm:$0xff] %vm1508_vm8, %v1465_v43 }
 0x22b   : > { %v1435_v63 = vpop.permute.xlu1 %1434 }
 0x22c   : > { %1520 = vst.msk [vmem:[#allocation3 + $0x58] sm:$0xff] %vm1508_vm8, %v1435_v63  ;;  %v1622_v38 = vpop.permute.xlu0 %1621 }
 0x22d   : > { %1860 = vrot.lane.b32.xlu1 %v1765_v48, %s2629_s8  ;;  %1710 = vst.msk [vmem:[#allocation3 + $0x40] sm:$0xff] %vm1701_vm9, %v1622_v38 }
 0x22f   : > { %v1467_v22 = vpop.permute.xlu1 %1466 }
 0x230   : > { %1536 = vst.msk [vmem:[#allocation3 + $0xd8] sm:$0xff] %vm1508_vm8, %v1467_v22  ;;  %v1654_v33 = vpop.permute.xlu0 %1653 }
 0x231   : > { %1726 = vst.msk [vmem:[#allocation3 + $0xc0] sm:$0xff] %vm1701_vm9, %v1654_v33 }
 0x233   : > { %v1624_v49 = vpop.permute.xlu1 %1623 }
 0x234   : > { %1711 = vst.msk [vmem:[#allocation3 + $0x48] sm:$0xff] %vm1701_vm9, %v1624_v49  ;;  %v1626_v51 = vpop.permute.xlu0 %1625 }
 0x235   : > { %1712 = vst.msk [vmem:[#allocation3 + $0x50] sm:$0xff] %vm1701_vm9, %v1626_v51 }
 0x237   : > { %v1656_v57 = vpop.permute.xlu1 %1655 }
 0x238   : > { %1727 = vst.msk [vmem:[#allocation3 + $0xc8] sm:$0xff] %vm1701_vm9, %v1656_v57  ;;  %v1658_v32 = vpop.permute.xlu0 %1657 }
 0x239   : > { %1728 = vst.msk [vmem:[#allocation3 + $0xd0] sm:$0xff] %vm1701_vm9, %v1658_v32 }
 0x23b   : > { %v1628_v11 = vpop.permute.xlu1 %1627 }
 0x23c   : > { %1713 = vst.msk [vmem:[#allocation3 + $0x58] sm:$0xff] %vm1701_vm9, %v1628_v11  ;;  %v1815_v58 = vpop.permute.xlu0 %1814 }
 0x23d   : > { %1903 = vst.msk [vmem:[#allocation3 + $0x40] sm:$0xff] %vm1894_vm10, %v1815_v58 }
 0x23f   : > { %v1660_v59 = vpop.permute.xlu1 %1659 }
 0x240   : > { %1729 = vst.msk [vmem:[#allocation3 + $0xd8] sm:$0xff] %vm1701_vm9, %v1660_v59  ;;  %v1847_v12 = vpop.permute.xlu0 %1846 }
 0x241   : > { %1919 = vst.msk [vmem:[#allocation3 + $0xc0] sm:$0xff] %vm1894_vm10, %v1847_v12 }
 0x243   : > { %v1817_v15 = vpop.permute.xlu1 %1816 }
 0x244   : > { %1904 = vst.msk [vmem:[#allocation3 + $0x48] sm:$0xff] %vm1894_vm10, %v1817_v15  ;;  %v1819_v6 = vpop.permute.xlu0 %1818  ;;  %v1935_v52 = vld [vmem:[#allocation3 + $0x40] sm:$0xff] }
 0x245   : > { %1905 = vst.msk [vmem:[#allocation3 + $0x50] sm:$0xff] %vm1894_vm10, %v1819_v6 }
 0x247   : > { %v1849_v60 = vpop.permute.xlu1 %1848 }
 0x248   : > { %1920 = vst.msk [vmem:[#allocation3 + $0xc8] sm:$0xff] %vm1894_vm10, %v1849_v60  ;;  %v1851_v54 = vpop.permute.xlu0 %1850  ;;  %v1951_v55 = vld [vmem:[#allocation3 + $0xc0] sm:$0xff] }
 0x249   : > { %1921 = vst.msk [vmem:[#allocation3 + $0xd0] sm:$0xff] %vm1894_vm10, %v1851_v54 }
 0x24b   : > { %v1821_v7 = vpop.permute.xlu1 %1820  ;;  %v1936_v16 = vld [vmem:[#allocation3 + $0x48] sm:$0xff] }
 0x24c   : > { %1906 = vst.msk [vmem:[#allocation3 + $0x58] sm:$0xff] %vm1894_vm10, %v1821_v7  ;;  %v1963_v8 = vpack.c.bf16 %v1936_v16, %v1935_v52  ;;  %v1050_v19 = vpop.permute.xlu0 %1049  ;;  %v1937_v31 = vld [vmem:[#allocation3 + $0x50] sm:$0xff] }
 0x24d   : > { %1134 = vst.msk [vmem:[#allocation3 + $0x60] sm:$0xff] %vm1121_vm6, %v1050_v19 }
 0x24e   : > { %2560 = vmatprep.mubr.msk.bf16.mxu0 %vm2002_vm11, %v1963_v8 }
 0x24f   : > { %v1853_v26 = vpop.permute.xlu1 %1852  ;;  %v1952_v9 = vld [vmem:[#allocation3 + $0xc8] sm:$0xff] }
 0x250   : > { %1922 = vst.msk [vmem:[#allocation3 + $0xd8] sm:$0xff] %vm1894_vm10, %v1853_v26  ;;  %v1971_v10 = vpack.c.bf16 %v1952_v9, %v1951_v55  ;;  %v1082_v30 = vpop.permute.xlu0 %1081  ;;  %v1953_v29 = vld [vmem:[#allocation3 + $0xd0] sm:$0xff] }
 0x251   : > { %1150 = vst.msk [vmem:[#allocation3 + $0xe0] sm:$0xff] %vm1121_vm6, %v1082_v30 }
 0x252   : > { %2576 = vmatprep.mubr.msk.bf16.mxu1 %vm2002_vm11, %v1971_v10 }
 0x253   : > { %v1052_v17 = vpop.permute.xlu1 %1051  ;;  %v1938_v20 = vld [vmem:[#allocation3 + $0x58] sm:$0xff] }
 0x254   : > { %1135 = vst.msk [vmem:[#allocation3 + $0x68] sm:$0xff] %vm1121_vm6, %v1052_v17  ;;  %v1964_v23 = vpack.c.bf16 %v1938_v20, %v1937_v31  ;;  %v1054_v39 = vpop.permute.xlu0 %1053 }
 0x255   : > { %1136 = vst.msk [vmem:[#allocation3 + $0x70] sm:$0xff] %vm1121_vm6, %v1054_v39 }
 0x256   : > { %2561 = vmatmul.mubr.msk.bf16.gmra.mrb[8].mxu0 %vm2002_vm11, %v1964_v23 }
 0x257   : > { %v1084_v36 = vpop.permute.xlu1 %1083  ;;  %v1954_v42 = vld [vmem:[#allocation3 + $0xd8] sm:$0xff] }
 0x258   : > { %1151 = vst.msk [vmem:[#allocation3 + $0xe8] sm:$0xff] %vm1121_vm6, %v1084_v36  ;;  %v1972_v24 = vpack.c.bf16 %v1954_v42, %v1953_v29  ;;  %v1086_v34 = vpop.permute.xlu0 %1085 }
 0x259   : > { %1152 = vst.msk [vmem:[#allocation3 + $0xf0] sm:$0xff] %vm1121_vm6, %v1086_v34 }
 0x25a   : > { %2577 = vmatmul.mubr.msk.bf16.gmra.mrb[8].mxu1 %vm2002_vm11, %v1972_v24 }
 0x25b   : > { %v1056_v28 = vpop.permute.xlu1 %1055 }
 0x25c   : > { %1137 = vst.msk [vmem:[#allocation3 + $0x78] sm:$0xff] %vm1121_vm6, %v1056_v28  ;;  %v1243_v47 = vpop.permute.xlu0 %1242 }
 0x25d   : > { %1327 = vst.msk [vmem:[#allocation3 + $0x60] sm:$0xff] %vm1314_vm7, %v1243_v47 }
 0x25f   : > { %v1088_v37 = vpop.permute.xlu1 %1087 }
 0x260   : > { %1153 = vst.msk [vmem:[#allocation3 + $0xf8] sm:$0xff] %vm1121_vm6, %v1088_v37  ;;  %v1275_v45 = vpop.permute.xlu0 %1274 }
 0x261   : > { %1343 = vst.msk [vmem:[#allocation3 + $0xe0] sm:$0xff] %vm1314_vm7, %v1275_v45 }
 0x263   : > { %v1245_v61 = vpop.permute.xlu1 %1244 }
 0x264   : > { %1328 = vst.msk [vmem:[#allocation3 + $0x68] sm:$0xff] %vm1314_vm7, %v1245_v61  ;;  %v1247_v53 = vpop.permute.xlu0 %1246 }
 0x265   : > { %1329 = vst.msk [vmem:[#allocation3 + $0x70] sm:$0xff] %vm1314_vm7, %v1247_v53 }
 0x267   : > { %v1277_v0 = vpop.permute.xlu1 %1276 }
 0x268   : > { %1344 = vst.msk [vmem:[#allocation3 + $0xe8] sm:$0xff] %vm1314_vm7, %v1277_v0  ;;  %v1279_v50 = vpop.permute.xlu0 %1278 }
 0x269   : > { %1345 = vst.msk [vmem:[#allocation3 + $0xf0] sm:$0xff] %vm1314_vm7, %v1279_v50 }
 0x26b   : > { %v1249_v62 = vpop.permute.xlu1 %1248 }
 0x26c   : > { %1330 = vst.msk [vmem:[#allocation3 + $0x78] sm:$0xff] %vm1314_vm7, %v1249_v62  ;;  %v1437_v2 = vpop.permute.xlu0 %1436 }
 0x26d   : > { %1521 = vst.msk [vmem:[#allocation3 + $0x60] sm:$0xff] %vm1508_vm8, %v1437_v2 }
 0x26f   : > { %v1281_v25 = vpop.permute.xlu1 %1280 }
 0x270   : > { %1346 = vst.msk [vmem:[#allocation3 + $0xf8] sm:$0xff] %vm1314_vm7, %v1281_v25  ;;  %v1469_v1 = vpop.permute.xlu0 %1468 }
 0x271   : > { %1537 = vst.msk [vmem:[#allocation3 + $0xe0] sm:$0xff] %vm1508_vm8, %v1469_v1 }
 0x273   : > { %v1439_v4 = vpop.permute.xlu1 %1438 }
 0x274   : > { %1522 = vst.msk [vmem:[#allocation3 + $0x68] sm:$0xff] %vm1508_vm8, %v1439_v4  ;;  %v1441_v27 = vpop.permute.xlu0 %1440 }
 0x275   : > { %1523 = vst.msk [vmem:[#allocation3 + $0x70] sm:$0xff] %vm1508_vm8, %v1441_v27 }
 0x277   : > { %v1471_v14 = vpop.permute.xlu1 %1470 }
 0x278   : > { %1538 = vst.msk [vmem:[#allocation3 + $0xe8] sm:$0xff] %vm1508_vm8, %v1471_v14  ;;  %v1473_v56 = vpop.permute.xlu0 %1472 }
 0x279   : > { %1539 = vst.msk [vmem:[#allocation3 + $0xf0] sm:$0xff] %vm1508_vm8, %v1473_v56 }
 0x27b   : > { %v1443_v3 = vpop.permute.xlu1 %1442 }
 0x27c   : > { %1524 = vst.msk [vmem:[#allocation3 + $0x78] sm:$0xff] %vm1508_vm8, %v1443_v3  ;;  %v1630_v46 = vpop.permute.xlu0 %1629 }
 0x27d   : > { %1714 = vst.msk [vmem:[#allocation3 + $0x60] sm:$0xff] %vm1701_vm9, %v1630_v46 }
 0x27f   : > { %v1475_v21 = vpop.permute.xlu1 %1474 }
 0x280   : > { %1540 = vst.msk [vmem:[#allocation3 + $0xf8] sm:$0xff] %vm1508_vm8, %v1475_v21  ;;  %v1662_v13 = vpop.permute.xlu0 %1661 }
 0x281   : > { %1730 = vst.msk [vmem:[#allocation3 + $0xe0] sm:$0xff] %vm1701_vm9, %v1662_v13 }
 0x283   : > { %v1632_v18 = vpop.permute.xlu1 %1631 }
 0x284   : > { %1715 = vst.msk [vmem:[#allocation3 + $0x68] sm:$0xff] %vm1701_vm9, %v1632_v18  ;;  %v1634_v40 = vpop.permute.xlu0 %1633 }
 0x285   : > { %1716 = vst.msk [vmem:[#allocation3 + $0x70] sm:$0xff] %vm1701_vm9, %v1634_v40 }
 0x287   : > { %v1664_v44 = vpop.permute.xlu1 %1663 }
 0x288   : > { %1731 = vst.msk [vmem:[#allocation3 + $0xe8] sm:$0xff] %vm1701_vm9, %v1664_v44  ;;  %v1666_v41 = vpop.permute.xlu0 %1665 }
 0x289   : > { %v2554_v35 = vpop.f32.mrb[0].mxu0  ;;  %1732 = vst.msk [vmem:[#allocation3 + $0xf0] sm:$0xff] %vm1701_vm9, %v1666_v41 }
 0x28a   : > { %v3704_v43 = vadd.f32 %v2554_v35, %v3700_v5  ;;  %v2089_v48 = vpop.f32.mrb[1].mxu0 }
 0x28b   : > { %v3708_v63 = vadd.f32 %v3700_v5, %v2089_v48  ;;  %v1636_v38 = vpop.permute.xlu1 %1635  ;;  %v2555_v22 = vpop.f32.mrb[2].mxu0 }
 0x28c   : > { %1717 = vst.msk [vmem:[#allocation3 + $0x78] sm:$0xff] %vm1701_vm9, %v1636_v38  ;;  %v3712_v33 = vadd.f32 %v2555_v22, %v3700_v5  ;;  %v2092_v49 = vpop.f32.mrb[3].mxu0  ;;  %v1823_v32 = vpop.permute.xlu0 %1822 }
 0x28d   : > { %v3715_v51 = vadd.f32 %v3700_v5, %v2092_v49  ;;  %v2570_v57 = vpop.f32.mrb[0].mxu1  ;;  %1907 = vst.msk [vmem:[#allocation3 + $0x60] sm:$0xff] %vm1894_vm10, %v1823_v32 }
 0x28e   : > { %v3718_v11 = vadd.f32 %v2570_v57, %v3700_v5  ;;  %v2153_v58 = vpop.f32.mrb[1].mxu1 }
 0x28f   : > { %v3722_v59 = vadd.f32 %v3700_v5, %v2153_v58  ;;  %v2571_v12 = vpop.f32.mrb[2].mxu1  ;;  %v1668_v15 = vpop.permute.xlu1 %1667 }
 0x290   : > { %v3725_v6 = vadd.f32 %v2571_v12, %v3700_v5  ;;  %1733 = vst.msk [vmem:[#allocation3 + $0xf8] sm:$0xff] %vm1701_vm9, %v1668_v15  ;;  %v2156_v60 = vpop.f32.mrb[3].mxu1  ;;  %v1855_v54 = vpop.permute.xlu0 %1854 }
 0x291   : > { %v3729_v52 = vadd.f32 %v3700_v5, %v2156_v60  ;;  %1923 = vst.msk [vmem:[#allocation3 + $0xe0] sm:$0xff] %vm1894_vm10, %v1855_v54 }
 0x293   : > { %v1825_v7 = vpop.permute.xlu1 %1824 }
 0x294   : > { %1908 = vst.msk [vmem:[#allocation3 + $0x68] sm:$0xff] %vm1894_vm10, %v1825_v7  ;;  %v1827_v16 = vpop.permute.xlu0 %1826  ;;  %v1939_v55 = vld [vmem:[#allocation3 + $0x60] sm:$0xff] }
 0x295   : > { %1909 = vst.msk [vmem:[#allocation3 + $0x70] sm:$0xff] %vm1894_vm10, %v1827_v16 }
 0x297   : > { %v1857_v8 = vpop.permute.xlu1 %1856 }
 0x298   : > { %1924 = vst.msk [vmem:[#allocation3 + $0xe8] sm:$0xff] %vm1894_vm10, %v1857_v8  ;;  %v1859_v19 = vpop.permute.xlu0 %1858  ;;  %v1955_v31 = vld [vmem:[#allocation3 + $0xe0] sm:$0xff] }
 0x299   : > { %1925 = vst.msk [vmem:[#allocation3 + $0xf0] sm:$0xff] %vm1894_vm10, %v1859_v19 }
 0x29b   : > { %v1829_v26 = vpop.permute.xlu1 %1828  ;;  %v1940_v9 = vld [vmem:[#allocation3 + $0x68] sm:$0xff] }
 0x29c   : > { %1910 = vst.msk [vmem:[#allocation3 + $0x78] sm:$0xff] %vm1894_vm10, %v1829_v26  ;;  %v1965_v10 = vpack.c.bf16 %v1940_v9, %v1939_v55  ;;  %v1941_v23 = vld [vmem:[#allocation3 + $0x70] sm:$0xff] }
 0x29e   : > { %2564 = vmatprep.mubr.msk.bf16.mxu0 %vm2002_vm11, %v1965_v10 }
 0x29f   : > { %v1861_v30 = vpop.permute.xlu1 %1860  ;;  %v1956_v17 = vld [vmem:[#allocation3 + $0xe8] sm:$0xff] }
 0x2a0   : > { %1926 = vst.msk [vmem:[#allocation3 + $0xf8] sm:$0xff] %vm1894_vm10, %v1861_v30  ;;  %v1973_v20 = vpack.c.bf16 %v1956_v17, %v1955_v31  ;;  %v1957_v36 = vld [vmem:[#allocation3 + $0xf0] sm:$0xff] }
 0x2a2   : > { %2580 = vmatprep.mubr.msk.bf16.mxu1 %vm2002_vm11, %v1973_v20  ;;  %v2630_v20 = vmov (!%p2522_p4), 0.0  }
 0x2a3   : > { %v1942_v29 = vld [vmem:[#allocation3 + $0x78] sm:$0xff]  ;;  %2221 = vst.msk [vmem:[%s4095_s4] sm:$0x3] (!%p2522_p4), %vm2220_vm12, %v2630_v20 }
 0x2a4   : > { %v1966_v39 = vpack.c.bf16 %v1942_v29, %v1941_v23 }
 0x2a6   : > { %2565 = vmatmul.mubr.msk.bf16.gmra.mrb[12].mxu0 %vm2002_vm11, %v1966_v39 }
 0x2a7   : > { %v1958_v42 = vld [vmem:[#allocation3 + $0xf8] sm:$0xff] }
 0x2a8   : > { %v1974_v24 = vpack.c.bf16 %v1958_v42, %v1957_v36 }
 0x2aa   : > { %2581 = vmatmul.mubr.msk.bf16.gmra.mrb[12].mxu1 %vm2002_vm11, %v1974_v24 }
 0x2d9   : > { %v2558_v34 = vpop.f32.mrb[4].mxu0 }
 0x2da   : > { %v3743_v28 = vadd.f32 %v2558_v34, %v3700_v5  ;;  %v2105_v47 = vpop.f32.mrb[5].mxu0 }
 0x2db   : > { %v3746_v37 = vadd.f32 %v3700_v5, %v2105_v47  ;;  %v2559_v45 = vpop.f32.mrb[6].mxu0 }
 0x2dc   : > { %v3749_v61 = vadd.f32 %v2559_v45, %v3700_v5  ;;  %v2108_v53 = vpop.f32.mrb[7].mxu0 }
 0x2dd   : > { %v3752_v0 = vadd.f32 %v3700_v5, %v2108_v53  ;;  %v2574_v50 = vpop.f32.mrb[4].mxu1 }
 0x2de   : > { %v3755_v62 = vadd.f32 %v2574_v50, %v3700_v5  ;;  %v2169_v2 = vpop.f32.mrb[5].mxu1 }
 0x2df   : > { %v3758_v25 = vadd.f32 %v3700_v5, %v2169_v2  ;;  %v2575_v1 = vpop.f32.mrb[6].mxu1 }
 0x2e0   : > { %v3761_v4 = vadd.f32 %v2575_v1, %v3700_v5  ;;  %v2172_v27 = vpop.f32.mrb[7].mxu1 }
 0x2e1   : > { %v3764_v14 = vadd.f32 %v3700_v5, %v2172_v27 }
 0x329   : > { %v2562_v56 = vpop.f32.mrb[8].mxu0 }
 0x32a   : > { %v3767_v3 = vadd.f32 %v2562_v56, %v3700_v5  ;;  %v2121_v46 = vpop.f32.mrb[9].mxu0 }
 0x32b   : > { %v3770_v21 = vadd.f32 %v3700_v5, %v2121_v46  ;;  %v2563_v13 = vpop.f32.mrb[10].mxu0 }
 0x32c   : > { %v3773_v18 = vadd.f32 %v2563_v13, %v3700_v5  ;;  %v2124_v40 = vpop.f32.mrb[11].mxu0 }
 0x32d   : > { %v3776_v44 = vadd.f32 %v3700_v5, %v2124_v40  ;;  %v2578_v35 = vpop.f32.mrb[8].mxu1 }
 0x32e   : > { %v3779_v41 = vadd.f32 %v2578_v35, %v3700_v5  ;;  %v2185_v48 = vpop.f32.mrb[9].mxu1 }
 0x32f   : > { %v3782_v38 = vadd.f32 %v3700_v5, %v2185_v48  ;;  %v2579_v22 = vpop.f32.mrb[10].mxu1 }
 0x330   : > { %v3785_v49 = vadd.f32 %v2579_v22, %v3700_v5  ;;  %v2188_v57 = vpop.f32.mrb[11].mxu1 }
 0x331   : > { %v3788_v32 = vadd.f32 %v3700_v5, %v2188_v57 }
 0x379   : > { %v2566_v58 = vpop.f32.mrb[12].mxu0 }
 0x37a   : > { %v3791_v12 = vadd.f32 %v2566_v58, %v3700_v5  ;;  %v2137_v15 = vpop.f32.mrb[13].mxu0 }
 0x37b   : > { %v3794_v60 = vadd.f32 %v3700_v5, %v2137_v15  ;;  %v2567_v54 = vpop.f32.mrb[14].mxu0  ;;  %2219 = sbr.rel (%p2522_p4) target bundleno = 898 (0x382), region = 36 }
 0x37c   : > { %v3797_v7 = vadd.f32 %v2567_v54, %v3700_v5  ;;  %v2140_v16 = vpop.f32.mrb[15].mxu0 }
 0x37d   : > { %v3800_v8 = vadd.f32 %v3700_v5, %v2140_v16  ;;  %v2582_v55 = vpop.f32.mrb[12].mxu1 }
 0x37e   : > { %v3803_v19 = vadd.f32 %v2582_v55, %v3700_v5  ;;  %v2201_v26 = vpop.f32.mrb[13].mxu1 }
 0x37f   : > { %v3806_v9 = vadd.f32 %v3700_v5, %v2201_v26  ;;  %v2583_v10 = vpop.f32.mrb[14].mxu1 }
 0x380   : > { %v3809_v31 = vadd.f32 %v2583_v10, %v3700_v5  ;;  %v2204_v30 = vpop.f32.mrb[15].mxu1 }
 0x381   : > { %v3812_v17 = vadd.f32 %v3700_v5, %v2204_v30 }
 0x382 PF: > { %vm2223_vm13 = vcmask 64512   ;;  %v2297_v46 = vmul.f32 %v3708_v63, %v3708_v63  ;;  %v2298_v40 = vmul.f32 %v3715_v51, %v3715_v51  ;;  %v2299_v35 = vmul.f32 %v3704_v43, %v3704_v43 }
 0x383   : > { %v2224_v5 = vsel %vm2223_vm13, %v3708_v63, 0.0  ;;  %v2225_v23 = vsel %vm2223_vm13, %v3715_v51, 0.0  ;;  %v2227_v29 = vsel %vm2223_vm13, %v3704_v43, 0.0  ;;  %2400 = vst.msk [vmem:[%s2732_s24] sm:$0xff] %vm2223_vm13, %v3708_v63  ;;  %2401 = vst.msk [vmem:[%s2732_s24 + $0x8] sm:$0xff] %vm2223_vm13, %v3715_v51  ;;  %v2229_v36 = vsel %vm2223_vm13, %v3712_v33, 0.0 }
 0x384   : > { %2402 = vst.msk [vmem:[%s2732_s24 + $0x10] sm:$0xff] %vm2223_vm13, %v3704_v43  ;;  %2403 = vst.msk [vmem:[%s2732_s24 + $0x18] sm:$0xff] %vm2223_vm13, %v3712_v33  ;;  %v2226_v39 = vadd.f32 %v2225_v23, %v2224_v5  ;;  %v2231_v24 = vsel %vm2223_vm13, %v3746_v37, 0.0  ;;  %v2233_v47 = vsel %vm2223_vm13, %v3752_v0, 0.0  ;;  %v2235_v53 = vsel %vm2223_vm13, %v3743_v28, 0.0 }
 0x385   : > { %2404 = vst.msk [vmem:[%s2732_s24 + $0x20] sm:$0xff] %vm2223_vm13, %v3746_v37  ;;  %2405 = vst.msk [vmem:[%s2732_s24 + $0x28] sm:$0xff] %vm2223_vm13, %v3752_v0  ;;  %v2237_v2 = vsel %vm2223_vm13, %v3749_v61, 0.0  ;;  %v2239_v27 = vsel %vm2223_vm13, %v3770_v21, 0.0  ;;  %v2241_v13 = vsel %vm2223_vm13, %v3776_v44, 0.0  ;;  %v2243_v22 = vsel %vm2223_vm13, %v3767_v3, 0.0 }
 0x386   : > { %2406 = vst.msk [vmem:[%s2732_s24 + $0x30] sm:$0xff] %vm2223_vm13, %v3743_v28  ;;  %2407 = vst.msk [vmem:[%s2732_s24 + $0x38] sm:$0xff] %vm2223_vm13, %v3749_v61  ;;  %v2228_v42 = vadd.f32 %v2227_v29, %v2226_v39  ;;  %v2300_v57 = vmul.f32 %v3712_v33, %v3712_v33  ;;  %v2329_v15 = vsel %vm2223_vm13, %v2297_v46, 0.0  ;;  %v2245_v63 = vsel %vm2223_vm13, %v3773_v18, 0.0 }
 0x387   : > { %2408 = vst.msk [vmem:[%s2732_s24 + $0x40] sm:$0xff] %vm2223_vm13, %v3770_v21  ;;  %2409 = vst.msk [vmem:[%s2732_s24 + $0x48] sm:$0xff] %vm2223_vm13, %v3776_v44  ;;  %v2301_v54 = vmul.f32 %v3746_v37, %v3746_v37  ;;  %v2330_v51 = vsel %vm2223_vm13, %v2298_v40, 0.0  ;;  %v2332_v43 = vsel %vm2223_vm13, %v2299_v35, 0.0  ;;  %v2247_v26 = vsel %vm2223_vm13, %v3794_v60, 0.0 }
 0x388   : > { %2410 = vst.msk [vmem:[%s2732_s24 + $0x50] sm:$0xff] %vm2223_vm13, %v3767_v3  ;;  %2411 = vst.msk [vmem:[%s2732_s24 + $0x58] sm:$0xff] %vm2223_vm13, %v3773_v18  ;;  %v2230_v34 = vadd.f32 %v2229_v36, %v2228_v42  ;;  %v2331_v55 = vadd.f32 %v2330_v51, %v2329_v15  ;;  %v2302_v33 = vmul.f32 %v3752_v0, %v3752_v0  ;;  %v2334_v10 = vsel %vm2223_vm13, %v2300_v57, 0.0 }
 0x389   : > { %2412 = vst.msk [vmem:[%s2732_s24 + $0x60] sm:$0xff] %vm2223_vm13, %v3794_v60  ;;  %2413 = vst.msk [vmem:[%s2732_s24 + $0x68] sm:$0xff] %vm2223_vm13, %v3800_v8  ;;  %v2249_v5 = vsel %vm2223_vm13, %v3800_v8, 0.0  ;;  %v2303_v37 = vmul.f32 %v3743_v28, %v3743_v28  ;;  %v2336_v23 = vsel %vm2223_vm13, %v2301_v54, 0.0  ;;  %v2251_v36 = vsel %vm2223_vm13, %v3791_v12, 0.0 }
 0x38a   : > { %2414 = vst.msk [vmem:[%s2732_s24 + $0x70] sm:$0xff] %vm2223_vm13, %v3791_v12  ;;  %2415 = vst.msk [vmem:[%s2732_s24 + $0x78] sm:$0xff] %vm2223_vm13, %v3797_v7  ;;  %v2232_v45 = vadd.f32 %v2231_v24, %v2230_v34  ;;  %v2333_v20 = vadd.f32 %v2332_v43, %v2331_v55  ;;  %v2304_v0 = vmul.f32 %v3749_v61, %v3749_v61  ;;  %v2338_v42 = vsel %vm2223_vm13, %v2302_v33, 0.0 }
 0x38b   : > { %2416 = vst.msk [vmem:[%s2732_s24 + $0x80] sm:$0xff] %vm2223_vm13, %v3722_v59  ;;  %2417 = vst.msk [vmem:[%s2732_s24 + $0x88] sm:$0xff] %vm2223_vm13, %v3729_v52  ;;  %v2305_v28 = vmul.f32 %v3770_v21, %v3770_v21  ;;  %v2306_v61 = vmul.f32 %v3776_v44, %v3776_v44  ;;  %v2257_v46 = vsel %vm2223_vm13, %v3729_v52, 0.0  ;;  %v2307_v21 = vmul.f32 %v3767_v3, %v3767_v3 }
 0x38c   : > { %2418 = vst.msk [vmem:[%s2732_s24 + $0x90] sm:$0xff] %vm2223_vm13, %v3718_v11  ;;  %2419 = vst.msk [vmem:[%s2732_s24 + $0x98] sm:$0xff] %vm2223_vm13, %v3725_v6  ;;  %v2234_v50 = vadd.f32 %v2233_v47, %v2232_v45  ;;  %v2335_v39 = vadd.f32 %v2334_v10, %v2333_v20  ;;  %v2253_v47 = vsel %vm2223_vm13, %v3797_v7, 0.0  ;;  %v2340_v45 = vsel %vm2223_vm13, %v2303_v37, 0.0 }
 0x38d   : > { %2420 = vst.msk [vmem:[%s2732_s24 + $0xa0] sm:$0xff] %vm2223_vm13, %v3758_v25  ;;  %2421 = vst.msk [vmem:[%s2732_s24 + $0xa8] sm:$0xff] %vm2223_vm13, %v3764_v14  ;;  %v2308_v44 = vmul.f32 %v3773_v18, %v3773_v18  ;;  %v2261_v15 = vsel %vm2223_vm13, %v3725_v6, 0.0  ;;  %v2309_v3 = vmul.f32 %v3794_v60, %v3794_v60  ;;  %v2263_v43 = vsel %vm2223_vm13, %v3758_v25, 0.0 }
 0x38e   : > { %2422 = vst.msk [vmem:[%s2732_s24 + $0xb0] sm:$0xff] %vm2223_vm13, %v3755_v62  ;;  %2423 = vst.msk [vmem:[%s2732_s24 + $0xb8] sm:$0xff] %vm2223_vm13, %v3761_v4  ;;  %v2236_v1 = vadd.f32 %v2235_v53, %v2234_v50  ;;  %v2337_v34 = vadd.f32 %v2336_v23, %v2335_v39  ;;  %v2310_v18 = vmul.f32 %v3800_v8, %v3800_v8  ;;  %v2265_v33 = vsel %vm2223_vm13, %v3764_v14, 0.0 }
 0x38f   : > { %2424 = vst.msk [vmem:[%s2732_s24 + $0xc0] sm:$0xff] %vm2223_vm13, %v3782_v38  ;;  %2425 = vst.msk [vmem:[%s2732_s24 + $0xc8] sm:$0xff] %vm2223_vm13, %v3788_v32  ;;  %v2311_v60 = vmul.f32 %v3791_v12, %v3791_v12  ;;  %v2352_v10 = vsel %vm2223_vm13, %v2309_v3, 0.0  ;;  %v2312_v8 = vmul.f32 %v3797_v7, %v3797_v7  ;;  %v2269_v39 = vsel %vm2223_vm13, %v3761_v4, 0.0 }
 0x390   : > { %2426 = vst.msk [vmem:[%s2732_s24 + $0xd0] sm:$0xff] %vm2223_vm13, %v3779_v41  ;;  %2427 = vst.msk [vmem:[%s2732_s24 + $0xd8] sm:$0xff] %vm2223_vm13, %v3785_v49  ;;  %v2238_v56 = vadd.f32 %v2237_v2, %v2236_v1  ;;  %v2339_v50 = vadd.f32 %v2338_v42, %v2337_v34  ;;  %v2255_v2 = vsel %vm2223_vm13, %v3722_v59, 0.0  ;;  %v2342_v1 = vsel %vm2223_vm13, %v2304_v0, 0.0 }
 0x391   : > { %2428 = vst.msk [vmem:[%s2732_s24 + $0xe0] sm:$0xff] %vm2223_vm13, %v3806_v9  ;;  %2429 = vst.msk [vmem:[%s2732_s24 + $0xe8] sm:$0xff] %vm2223_vm13, %v3812_v17  ;;  %v2354_v37 = vsel %vm2223_vm13, %v2310_v18, 0.0  ;;  %v2313_v12 = vmul.f32 %v3722_v59, %v3722_v59  ;;  %v2314_v7 = vmul.f32 %v3729_v52, %v3729_v52  ;;  %v2358_v34 = vsel %vm2223_vm13, %v2312_v8, 0.0 }
 0x392   : > { %2430 = vst.msk [vmem:[%s2732_s24 + $0xf0] sm:$0xff] %vm2223_vm13, %v3803_v19  ;;  %2431 = vst.msk [vmem:[%s2732_s24 + $0xf8] sm:$0xff] %vm2223_vm13, %v3809_v31  ;;  %v2240_v48 = vadd.f32 %v2239_v27, %v2238_v56  ;;  %v2341_v56 = vadd.f32 %v2340_v45, %v2339_v50  ;;  %v2273_v45 = vsel %vm2223_vm13, %v3788_v32, 0.0  ;;  %v2315_v59 = vmul.f32 %v3718_v11, %v3718_v11 }
 0x393   : > { %v2316_v52 = vmul.f32 %v3725_v6, %v3725_v6  ;;  %v2318_v6 = vmul.f32 %v3764_v14, %v3764_v14  ;;  %v2320_v14 = vmul.f32 %v3761_v4, %v3761_v4  ;;  %v2285_v18 = vsel %vm2223_vm13, %v3809_v31, 0.0 }
 0x394   : > { %v2242_v58 = vadd.f32 %v2241_v13, %v2240_v48  ;;  %v2344_v13 = vsel %vm2223_vm13, %v2305_v28, 0.0  ;;  %v2343_v35 = vadd.f32 %v2342_v1, %v2341_v56  ;;  %v2259_v48 = vsel %vm2223_vm13, %v3718_v11, 0.0 }
 0x395   : > { %v2362_v1 = vsel %vm2223_vm13, %v2314_v7, 0.0  ;;  %v2317_v11 = vmul.f32 %v3758_v25, %v3758_v25  ;;  %v2319_v25 = vmul.f32 %v3755_v62, %v3755_v62  ;;  %vm2294_vm14 = vcmask 57344  }
 0x396   : > { %v2244_v16 = vadd.f32 %v2243_v22, %v2242_v58  ;;  %v2346_v22 = vsel %vm2223_vm13, %v2306_v61, 0.0  ;;  %v2345_v58 = vadd.f32 %v2344_v13, %v2343_v35  ;;  %v2275_v61 = vsel %vm2223_vm13, %v3779_v41, 0.0 }
 0x397   : > { %v2279_v35 = vsel %vm2223_vm13, %v3806_v9, 0.0 }
 0x398   : > { %v2246_v30 = vadd.f32 %v2245_v63, %v2244_v16  ;;  %v2348_v63 = vsel %vm2223_vm13, %v2307_v21, 0.0  ;;  %v2347_v51 = vadd.f32 %v2346_v22, %v2345_v58  ;;  %v2350_v16 = vsel %vm2223_vm13, %v2308_v44, 0.0 }
 0x399   : > { %v2364_v21 = vsel %vm2223_vm13, %v2315_v59, 0.0  ;;  %v2368_v58 = vsel %vm2223_vm13, %v2317_v11, 0.0  ;;  %v2296_v11 = vld [vmem:[%s4095_s4 + $0x1] sm:$0x1] }
 0x39a   : > { %v2248_v29 = vadd.f32 %v2247_v26, %v2246_v30  ;;  %v2349_v26 = vadd.f32 %v2348_v63, %v2347_v51  ;;  %v2283_v63 = vsel %vm2223_vm13, %v3803_v19, 0.0 }
 0x39c   : > { %v2250_v24 = vadd.f32 %v2249_v5, %v2248_v29  ;;  %v2351_v20 = vadd.f32 %v2350_v16, %v2349_v26  ;;  %v2267_v5 = vsel %vm2223_vm13, %v3755_v62, 0.0  ;;  %v2321_v62 = vmul.f32 %v3782_v38, %v3782_v38 }
 0x39d   : > { %v2372_v16 = vsel %vm2223_vm13, %v2319_v25, 0.0 }
 0x39e   : > { %v2252_v53 = vadd.f32 %v2251_v36, %v2250_v24  ;;  %v2353_v29 = vadd.f32 %v2352_v10, %v2351_v20  ;;  %v2356_v36 = vsel %vm2223_vm13, %v2311_v60, 0.0  ;;  %v2271_v24 = vsel %vm2223_vm13, %v3782_v38, 0.0 }
 0x39f   : > { %v2374_v60 = vsel %vm2223_vm13, %v2320_v14, 0.0  ;;  %v2376_v20 = vsel %vm2223_vm13, %v2321_v62, 0.0  ;;  %v2324_v38 = vmul.f32 %v3785_v49, %v3785_v49 }
 0x3a0   : > { %v2254_v27 = vadd.f32 %v2253_v47, %v2252_v53  ;;  %v2355_v42 = vadd.f32 %v2354_v37, %v2353_v29  ;;  %v2360_v53 = vsel %vm2223_vm13, %v2313_v12, 0.0 }
 0x3a2   : > { %v2256_v40 = vadd.f32 %v2255_v2, %v2254_v27  ;;  %v2357_v28 = vadd.f32 %v2356_v36, %v2355_v42 }
 0x3a4   : > { %v2258_v57 = vadd.f32 %v2257_v46, %v2256_v40  ;;  %v2359_v2 = vadd.f32 %v2358_v34, %v2357_v28  ;;  %v2277_v46 = vsel %vm2223_vm13, %v3785_v49, 0.0  ;;  %v2327_v49 = vmul.f32 %v3803_v19, %v3803_v19 }
 0x3a5   : > { %v2328_v28 = vmul.f32 %v3809_v31, %v3809_v31 }
 0x3a6   : > { %v2260_v54 = vadd.f32 %v2259_v48, %v2258_v57  ;;  %v2361_v56 = vadd.f32 %v2360_v53, %v2359_v2  ;;  %v2366_v48 = vsel %vm2223_vm13, %v2316_v52, 0.0  ;;  %v2281_v57 = vsel %vm2223_vm13, %v3812_v17, 0.0 }
 0x3a7   : > { %v2388_v53 = vsel %vm2223_vm13, %v2327_v49, 0.0  ;;  %v2390_v2 = vsel %vm2223_vm13, %v2328_v28, 0.0 }
 0x3a8   : > { %v2262_v55 = vadd.f32 %v2261_v15, %v2260_v54  ;;  %v2363_v40 = vadd.f32 %v2362_v1, %v2361_v56  ;;  %v2370_v54 = vsel %vm2223_vm13, %v2318_v6, 0.0 }
 0x3aa   : > { %v2264_v30 = vadd.f32 %v2263_v43, %v2262_v55  ;;  %v2365_v22 = vadd.f32 %v2364_v21, %v2363_v40 }
 0x3ac   : > { %v2266_v23 = vadd.f32 %v2265_v33, %v2264_v30  ;;  %v2367_v3 = vadd.f32 %v2366_v48, %v2365_v22  ;;  %v2322_v33 = vmul.f32 %v3788_v32, %v3788_v32  ;;  %v2323_v30 = vmul.f32 %v3779_v41, %v3779_v41 }
 0x3ad   : > { %v2325_v32 = vmul.f32 %v3806_v9, %v3806_v9  ;;  %v2326_v41 = vmul.f32 %v3812_v17, %v3812_v17  ;;  %v2222_v9 = vld [vmem:[%s4095_s4] sm:$0x1] }
 0x3ae   : > { %v2268_v0 = vadd.f32 %v2267_v5, %v2266_v23  ;;  %v2369_v43 = vadd.f32 %v2368_v58, %v2367_v3  ;;  %v2378_v37 = vsel %vm2223_vm13, %v2322_v33, 0.0 }
 0x3af   : > { %v2384_v7 = vsel %vm2223_vm13, %v2325_v32, 0.0  ;;  %v2386_v17 = vsel %vm2223_vm13, %v2326_v41, 0.0 }
 0x3b0   : > { %v2270_v47 = vadd.f32 %v2269_v39, %v2268_v0  ;;  %v2371_v26 = vadd.f32 %v2370_v54, %v2369_v43  ;;  %v2380_v39 = vsel %vm2223_vm13, %v2323_v30, 0.0  ;;  %v2382_v0 = vsel %vm2223_vm13, %v2324_v38, 0.0 }
 0x3b2   : > { %v2272_v50 = vadd.f32 %v2271_v24, %v2270_v47  ;;  %v2373_v10 = vadd.f32 %v2372_v16, %v2371_v26 }
 0x3b4   : > { %v2274_v27 = vadd.f32 %v2273_v45, %v2272_v50  ;;  %v2375_v8 = vadd.f32 %v2374_v60, %v2373_v10 }
 0x3b6   : > { %v2276_v13 = vadd.f32 %v2275_v61, %v2274_v27  ;;  %v2377_v29 = vadd.f32 %v2376_v20, %v2375_v8 }
 0x3b8   : > { %v2278_v44 = vadd.f32 %v2277_v46, %v2276_v13  ;;  %v2379_v36 = vadd.f32 %v2378_v37, %v2377_v29 }
 0x3ba   : > { %v2280_v15 = vadd.f32 %v2279_v35, %v2278_v44  ;;  %v2381_v24 = vadd.f32 %v2380_v39, %v2379_v36 }
 0x3bc   : > { %v2282_v51 = vadd.f32 %v2281_v57, %v2280_v15  ;;  %v2383_v47 = vadd.f32 %v2382_v0, %v2381_v24 }
 0x3be   : > { %v2284_v55 = vadd.f32 %v2283_v63, %v2282_v51  ;;  %v2385_v59 = vadd.f32 %v2384_v7, %v2383_v47 }
 0x3c0   : > { %v2286_v4 = vadd.f32 %v2285_v18, %v2284_v55  ;;  %v2387_v19 = vadd.f32 %v2386_v17, %v2385_v59 }
 0x3c2   : > { %v2287_v5 = vrot.slane %v2286_v4, 4  ;;  %v2389_v61 = vadd.f32 %v2388_v53, %v2387_v19 }
 0x3c4   : > { %v2288_v23 = vadd.f32 %v2287_v5, %v2286_v4  ;;  %v2391_v52 = vadd.f32 %v2390_v2, %v2389_v61 }
 0x3c6   : > { %v2289_v12 = vrot.slane %v2288_v23, 2  ;;  %v2392_v1 = vrot.slane %v2391_v52, 4 }
 0x3c8   : > { %v2290_v42 = vadd.f32 %v2289_v12, %v2288_v23  ;;  %v2393_v31 = vadd.f32 %v2392_v1, %v2391_v52 }
 0x3ca   : > { %v2291_v34 = vrot.slane %v2290_v42, 1  ;;  %v2394_v27 = vrot.slane %v2393_v31, 2 }
 0x3cc   : > { %v2292_v45 = vadd.f32 %v2291_v34, %v2290_v42  ;;  %v2395_v56 = vadd.f32 %v2394_v27, %v2393_v31 }
 0x3ce   : > { %v2293_v50 = vadd.f32 %v2292_v45, %v2222_v9  ;;  %v2396_v46 = vrot.slane %v2395_v56, 1 }
 0x3d0   : > { %2295 = vst.msk [vmem:[%s4095_s4] sm:$0x1] %vm2294_vm14, %v2293_v50  ;;  %v2397_v21 = vadd.f32 %v2396_v46, %v2395_v56 }
 0x3d2   : > { %v2398_v13 = vadd.f32 %v2397_v21, %v2296_v11 }
 0x3d4   : > { %2399 = vst.msk [vmem:[%s4095_s4 + $0x1] sm:$0x1] %vm2294_vm14, %v2398_v13 }
 0x3d5 PF: > { %s15_s15 = sadd.s32 1, %s2619_s15  }
 0x3d6   : > { %p12_p5 = scmp.ge.s32.totalorder %s15_s15, 4  }
 0x3d8   :  { %14 = sbr.rel (!%p12_p5) target bundleno = 1 (0x1), region = 76 }

// kernel: _lambda_.6
= control target key start
LH: loop header
LB: loop body
LE: loop exit
PB: predicated region body
PF: predicated region fallthrough
CT: control target
= control target key end

     0   :  { %s2684_s15 = smov 0   ;;  %s4124_s0 = inlined_call_operand.vmem [shape: f32[2,16,16,8], index: 0, kind: input, shape index: {}]   ;;  %s4125_s1 = inlined_call_operand.vmem [shape: bf16[72,8], index: 1, kind: input, shape index: {}]   ;;  %s4126_s2 = inlined_call_operand.vmem [shape: f32[1,8], index: 2, kind: input, shape index: {}]   ;;  %s4127_s3 = inlined_call_operand.vmem [shape: f32[2,256,8], index: 3, kind: output, shape index: {0}]   ;;  %s4128_s4 = inlined_call_operand.vmem [shape: f32[2,8], index: 4, kind: output, shape index: {1}]  }
   0x1 LB: > { %s2690_s16 = sadd.s32 4294967295, %s2647_s15   ;;  %p2511_p0 = scmp.ge.s32.totalorder %s2647_s15, 1  ;;  %s2647_s15 = sphi %s2684_s15, %s15_s15  }
   0x2   : > { %p160_p1 = scmp.lt.s32.totalorder %s2647_s15, 3 }
   0x4   : > { %p161_p2 = pnand %p2511_p0, %p160_p1 }
   0x6   : > { %164 = sbr.rel (%p161_p2) target bundleno = 981 (0x3d5), region = 32 }
   0xd   : > { %vm197_vm0 = vcmask 64512   ;;  %p186_p3 = scmp.lt.s32.totalorder %s2690_s16, 1  ;;  %vm200_vm1 = vcmask 58368   ;;  %v2649_v0 = vmov 0.0   ;;  %s2650_s25 = smov 8   ;;  %vm542_vm2 = vcmask 130112  }
   0xe   : > { %198 = vst.msk [vmem:[#allocation2] sm:$0xff] %vm197_vm0, %v2649_v0  ;;  %199 = vst.msk [vmem:[#allocation2 + $0x8] sm:$0xff] %vm197_vm0, %v2649_v0  ;;  %s2651_s26 = smov 16   ;;  %s2652_s27 = smov 24   ;;  %vm735_vm3 = vcmask 195712   ;;  %vm928_vm4 = vcmask 261312  }
   0xf   : > { %202 = vst.msk [vmem:[#allocation2 + $0x18] sm:$0xff] %vm197_vm0, %v2649_v0  ;;  %203 = vst.msk [vmem:[#allocation2 + $0x20] sm:$0xff] %vm197_vm0, %v2649_v0  ;;  %s187_s17 = scalar_select %p186_p3, %s2690_s16, 1  ;;  %vm2067_vm5 = vcmask 1043456   ;;  %vm1121_vm6 = vcmask 326912   ;;  %vm1314_vm7 = vcmask 392512  }
  0x10   : > { %205 = vst.msk [vmem:[#allocation2 + $0x30] sm:$0xff] %vm197_vm0, %v2649_v0  ;;  %206 = vst.msk [vmem:[#allocation2 + $0x38] sm:$0xff] %vm197_vm0, %v2649_v0  ;;  %s2653_s28 = smov 32   ;;  %s2654_s29 = smov 40   ;;  %vm1508_vm8 = vcmask 458112   ;;  %vm1701_vm9 = vcmask 523712  }
  0x11   : > { %208 = vst.msk [vmem:[#allocation2 + $0x48] sm:$0xff] %vm197_vm0, %v2649_v0  ;;  %209 = vst.msk [vmem:[#allocation2 + $0x50] sm:$0xff] %vm197_vm0, %v2649_v0  ;;  %s2541_s18 = sshll.u32 %s187_s17, 8  ;;  %s2655_s30 = smov 48   ;;  %vm1894_vm10 = vcmask 589312   ;;  %vm2018_vm11 = vcmask 588800  }
  0x12   : > { %211 = vst.msk [vmem:[#allocation2 + $0x60] sm:$0xff] %vm197_vm0, %v2649_v0  ;;  %212 = vst.msk [vmem:[#allocation2 + $0x68] sm:$0xff] %vm197_vm0, %v2649_v0  ;;  %s2755_s21 = scalar_lea.vmem %s4124_s0, %s2541_s18  ;;  %s2760_s24 = scalar_lea.vmem %s4127_s3, %s2541_s18 }
  0x13   : > { %214 = vst.msk [vmem:[#allocation2 + $0x78] sm:$0xff] %vm197_vm0, %v2649_v0  ;;  %215 = vst.msk [vmem:[#allocation2 + $0x80] sm:$0xff] %vm197_vm0, %v2649_v0  ;;  %v253_v1 = vld [vmem:[%s2755_s21] sm:$0xff]  ;;  %v254_v2 = vld [vmem:[%s2755_s21 + $0x8] sm:$0xff]  ;;  %s2656_s5 = smov 56   ;;  %s2657_s12 = smov 64  }
  0x14   : > { %217 = vst.msk [vmem:[#allocation2 + $0x90] sm:$0xff] %vm197_vm0, %v2649_v0  ;;  %218 = vst.msk [vmem:[#allocation2 + $0x98] sm:$0xff] %vm197_vm0, %v2649_v0  ;;  %v255_v3 = vld [vmem:[%s2755_s21 + $0x10] sm:$0xff]  ;;  %v256_v4 = vld [vmem:[%s2755_s21 + $0x18] sm:$0xff]  ;;  %p2538_p4 = scmp.ne.s32.totalorder %s2690_s16, 0 }
  0x15   : > { %220 = vst.msk [vmem:[#allocation2 + $0xa8] sm:$0xff] %vm197_vm0, %v2649_v0  ;;  %221 = vst.msk [vmem:[#allocation2 + $0xb0] sm:$0xff] %vm197_vm0, %v2649_v0  ;;  %v257_v5 = vld [vmem:[%s2755_s21 + $0x20] sm:$0xff]  ;;  %v258_v6 = vld [vmem:[%s2755_s21 + $0x28] sm:$0xff] }
  0x16   : > { %223 = vst.msk [vmem:[#allocation2 + $0xc0] sm:$0xff] %vm197_vm0, %v2649_v0  ;;  %224 = vst.msk [vmem:[#allocation2 + $0xc8] sm:$0xff] %vm197_vm0, %v2649_v0  ;;  %v382_v7 = vld [vmem:[#allocation2 + $0x1] sm:$0xff]  ;;  %v259_v9 = vld [vmem:[%s2755_s21 + $0x30] sm:$0xff] }
  0x17   : > { %226 = vst.msk [vmem:[#allocation2 + $0xd8] sm:$0xff] %vm197_vm0, %v2649_v0  ;;  %227 = vst.msk [vmem:[#allocation2 + $0xe0] sm:$0xff] %vm197_vm0, %v2649_v0  ;;  %446 = vrot.lane.b32.xlu0 %v382_v7, %s2650_s25  ;;  %v260_v10 = vld [vmem:[%s2755_s21 + $0x38] sm:$0xff]  ;;  %v261_v11 = vld [vmem:[%s2755_s21 + $0x40] sm:$0xff] }
  0x18   : > { %229 = vst.msk [vmem:[#allocation2 + $0xf0] sm:$0xff] %vm197_vm0, %v2649_v0  ;;  %230 = vst.msk [vmem:[#allocation2 + $0xf8] sm:$0xff] %vm197_vm0, %v2649_v0  ;;  %v262_v12 = vld [vmem:[%s2755_s21 + $0x48] sm:$0xff]  ;;  %v263_v13 = vld [vmem:[%s2755_s21 + $0x50] sm:$0xff] }
  0x19   : > { %232 = vst.msk [vmem:[#allocation2 + $0x108] sm:$0xff] %vm197_vm0, %v2649_v0  ;;  %233 = vst.msk [vmem:[#allocation2 + $0x110] sm:$0xff] %vm197_vm0, %v2649_v0  ;;  %v264_v14 = vld [vmem:[%s2755_s21 + $0x58] sm:$0xff]  ;;  %v265_v15 = vld [vmem:[%s2755_s21 + $0x60] sm:$0xff] }
  0x1a   : > { %235 = vst.msk [vmem:[#allocation2 + $0x120] sm:$0xff] %vm197_vm0, %v2649_v0  ;;  %236 = vst.msk [vmem:[#allocation2 + $0x128] sm:$0xff] %vm197_vm0, %v2649_v0  ;;  %v266_v16 = vld [vmem:[%s2755_s21 + $0x68] sm:$0xff]  ;;  %v267_v17 = vld [vmem:[%s2755_s21 + $0x70] sm:$0xff] }
  0x1b   : > { %238 = vst.msk [vmem:[#allocation2 + $0x138] sm:$0xff] %vm197_vm0, %v2649_v0  ;;  %239 = vst.msk [vmem:[#allocation2 + $0x140] sm:$0xff] %vm197_vm0, %v2649_v0  ;;  %v268_v18 = vld [vmem:[%s2755_s21 + $0x78] sm:$0xff]  ;;  %v269_v19 = vld [vmem:[%s2755_s21 + $0x80] sm:$0xff] }
  0x1c   : > { %241 = vst.msk [vmem:[#allocation2 + $0x150] sm:$0xff] %vm197_vm0, %v2649_v0  ;;  %242 = vst.msk [vmem:[#allocation2 + $0x158] sm:$0xff] %vm197_vm0, %v2649_v0  ;;  %v270_v20 = vld [vmem:[%s2755_s21 + $0x88] sm:$0xff]  ;;  %v271_v21 = vld [vmem:[%s2755_s21 + $0x90] sm:$0xff] }
  0x1d   : > { %244 = vst.msk [vmem:[#allocation2 + $0x168] sm:$0xff] %vm197_vm0, %v2649_v0  ;;  %245 = vst.msk [vmem:[#allocation2 + $0x170] sm:$0xff] %vm197_vm0, %v2649_v0  ;;  %v272_v22 = vld [vmem:[%s2755_s21 + $0x98] sm:$0xff]  ;;  %v273_v23 = vld [vmem:[%s2755_s21 + $0xa0] sm:$0xff] }
  0x1e   : > { %247 = vst.msk [vmem:[#allocation2 + $0x180] sm:$0xff] %vm197_vm0, %v2649_v0  ;;  %248 = vst.msk [vmem:[#allocation2 + $0x188] sm:$0xff] %vm197_vm0, %v2649_v0  ;;  %v274_v24 = vld [vmem:[%s2755_s21 + $0xa8] sm:$0xff]  ;;  %v275_v28 = vld [vmem:[%s2755_s21 + $0xb0] sm:$0xff] }
  0x1f   : > { %250 = vst.msk [vmem:[#allocation2 + $0x198] sm:$0xff] %vm197_vm0, %v2649_v0  ;;  %251 = vst.msk [vmem:[#allocation2 + $0x1a0] sm:$0xff] %vm197_vm0, %v2649_v0  ;;  %v276_v29 = vld [vmem:[%s2755_s21 + $0xb8] sm:$0xff]  ;;  %v277_v33 = vld [vmem:[%s2755_s21 + $0xc0] sm:$0xff] }
  0x20   : > { %201 = vst.msk [vmem:[#allocation2 + $0x10] sm:$0x3] %vm200_vm1, %v2649_v0  ;;  %204 = vst.msk [vmem:[#allocation2 + $0x28] sm:$0x3] %vm200_vm1, %v2649_v0  ;;  %v278_v34 = vld [vmem:[%s2755_s21 + $0xc8] sm:$0xff]  ;;  %v279_v35 = vld [vmem:[%s2755_s21 + $0xd0] sm:$0xff] }
  0x21   : > { %207 = vst.msk [vmem:[#allocation2 + $0x40] sm:$0x3] %vm200_vm1, %v2649_v0  ;;  %210 = vst.msk [vmem:[#allocation2 + $0x58] sm:$0x3] %vm200_vm1, %v2649_v0  ;;  %v280_v36 = vld [vmem:[%s2755_s21 + $0xd8] sm:$0xff]  ;;  %v281_v37 = vld [vmem:[%s2755_s21 + $0xe0] sm:$0xff] }
  0x22   : > { %213 = vst.msk [vmem:[#allocation2 + $0x70] sm:$0x3] %vm200_vm1, %v2649_v0  ;;  %216 = vst.msk [vmem:[#allocation2 + $0x88] sm:$0x3] %vm200_vm1, %v2649_v0  ;;  %v282_v38 = vld [vmem:[%s2755_s21 + $0xe8] sm:$0xff]  ;;  %v318_v45 = vld [vmem:[#allocation2] sm:$0xff] }
  0x23   : > { %219 = vst.msk [vmem:[#allocation2 + $0xa0] sm:$0x3] %vm200_vm1, %v2649_v0  ;;  %222 = vst.msk [vmem:[#allocation2 + $0xb8] sm:$0x3] %vm200_vm1, %v2649_v0  ;;  %v319_v48 = vld [vmem:[#allocation2 + $0x8] sm:$0xff] }
  0x24   : > { %225 = vst.msk [vmem:[#allocation2 + $0xd0] sm:$0x3] %vm200_vm1, %v2649_v0  ;;  %228 = vst.msk [vmem:[#allocation2 + $0xe8] sm:$0x3] %vm200_vm1, %v2649_v0 }
  0x25   : > { %231 = vst.msk [vmem:[#allocation2 + $0x100] sm:$0x3] %vm200_vm1, %v2649_v0  ;;  %234 = vst.msk [vmem:[#allocation2 + $0x118] sm:$0x3] %vm200_vm1, %v2649_v0 }
  0x26   : > { %237 = vst.msk [vmem:[#allocation2 + $0x130] sm:$0x3] %vm200_vm1, %v2649_v0  ;;  %240 = vst.msk [vmem:[#allocation2 + $0x148] sm:$0x3] %vm200_vm1, %v2649_v0 }
  0x27   : > { %243 = vst.msk [vmem:[#allocation2 + $0x160] sm:$0x3] %vm200_vm1, %v2649_v0  ;;  %246 = vst.msk [vmem:[#allocation2 + $0x178] sm:$0x3] %vm200_vm1, %v2649_v0  ;;  %v383_v8 = vld [vmem:[#allocation2 + $0x9] sm:$0xff] }
  0x28   : > { %249 = vst.msk [vmem:[#allocation2 + $0x190] sm:$0x3] %vm200_vm1, %v2649_v0  ;;  %252 = vst.msk [vmem:[#allocation2 + $0x1a8] sm:$0x3] %vm200_vm1, %v2649_v0  ;;  %448 = vrot.lane.b32.xlu0 %v383_v8, %s2650_s25 }
  0x29   : > { %286 = vst.msk [vmem:[#allocation2 + $0x19] sm:$0xff] %vm197_vm0, %v253_v1  ;;  %287 = vst.msk [vmem:[#allocation2 + $0x21] sm:$0xff] %vm197_vm0, %v254_v2 }
  0x2a   : > { %288 = vst.msk [vmem:[#allocation2 + $0x31] sm:$0xff] %vm197_vm0, %v255_v3  ;;  %289 = vst.msk [vmem:[#allocation2 + $0x39] sm:$0xff] %vm197_vm0, %v256_v4 }
  0x2b   : > { %290 = vst.msk [vmem:[#allocation2 + $0x49] sm:$0xff] %vm197_vm0, %v257_v5  ;;  %291 = vst.msk [vmem:[#allocation2 + $0x51] sm:$0xff] %vm197_vm0, %v258_v6 }
  0x2c   : > { %292 = vst.msk [vmem:[#allocation2 + $0x61] sm:$0xff] %vm197_vm0, %v259_v9  ;;  %293 = vst.msk [vmem:[#allocation2 + $0x69] sm:$0xff] %vm197_vm0, %v260_v10 }
  0x2d   : > { %294 = vst.msk [vmem:[#allocation2 + $0x79] sm:$0xff] %vm197_vm0, %v261_v11  ;;  %295 = vst.msk [vmem:[#allocation2 + $0x81] sm:$0xff] %vm197_vm0, %v262_v12 }
  0x2e   : > { %296 = vst.msk [vmem:[#allocation2 + $0x91] sm:$0xff] %vm197_vm0, %v263_v13  ;;  %297 = vst.msk [vmem:[#allocation2 + $0x99] sm:$0xff] %vm197_vm0, %v264_v14 }
  0x2f   : > { %298 = vst.msk [vmem:[#allocation2 + $0xa9] sm:$0xff] %vm197_vm0, %v265_v15  ;;  %299 = vst.msk [vmem:[#allocation2 + $0xb1] sm:$0xff] %vm197_vm0, %v266_v16 }
  0x30   : > { %300 = vst.msk [vmem:[#allocation2 + $0xc1] sm:$0xff] %vm197_vm0, %v267_v17  ;;  %301 = vst.msk [vmem:[#allocation2 + $0xc9] sm:$0xff] %vm197_vm0, %v268_v18  ;;  %v2805_v25 = vld [vmem:[#allocation2 + $0x19] sm:$0xff]  ;;  %v2814_v27 = vld [vmem:[#allocation2 + $0x21] sm:$0xff] }
  0x31   : > { %302 = vst.msk [vmem:[#allocation2 + $0xd9] sm:$0xff] %vm197_vm0, %v269_v19  ;;  %303 = vst.msk [vmem:[#allocation2 + $0xe1] sm:$0xff] %vm197_vm0, %v270_v20  ;;  %v2807_v26 = vld [vmem:[#allocation2 + $0x31] sm:$0xff]  ;;  %450 = vrot.lane.b32.xlu1 %v2805_v25, %s2650_s25  ;;  %v2826_v31 = vld [vmem:[#allocation2 + $0x39] sm:$0xff] }
  0x32   : > { %304 = vst.msk [vmem:[#allocation2 + $0xf1] sm:$0xff] %vm197_vm0, %v271_v21  ;;  %305 = vst.msk [vmem:[#allocation2 + $0xf9] sm:$0xff] %vm197_vm0, %v272_v22  ;;  %454 = vrot.lane.b32.xlu0 %v2807_v26, %s2650_s25  ;;  %v2822_v30 = vld [vmem:[#allocation2 + $0x49] sm:$0xff]  ;;  %v2841_v39 = vld [vmem:[#allocation2 + $0x51] sm:$0xff] }
  0x33   : > { %306 = vst.msk [vmem:[#allocation2 + $0x109] sm:$0xff] %vm197_vm0, %v273_v23  ;;  %307 = vst.msk [vmem:[#allocation2 + $0x111] sm:$0xff] %vm197_vm0, %v274_v24  ;;  %v390_v32 = vld [vmem:[#allocation2 + $0x61] sm:$0xff]  ;;  %v391_v41 = vld [vmem:[#allocation2 + $0x69] sm:$0xff] }
  0x34   : > { %308 = vst.msk [vmem:[#allocation2 + $0x121] sm:$0xff] %vm197_vm0, %v275_v28  ;;  %309 = vst.msk [vmem:[#allocation2 + $0x129] sm:$0xff] %vm197_vm0, %v276_v29  ;;  %v392_v40 = vld [vmem:[#allocation2 + $0x79] sm:$0xff]  ;;  %v393_v43 = vld [vmem:[#allocation2 + $0x81] sm:$0xff] }
  0x35   : > { %452 = vrot.lane.b32.xlu1 %v2814_v27, %s2650_s25  ;;  %310 = vst.msk [vmem:[#allocation2 + $0x139] sm:$0xff] %vm197_vm0, %v277_v33  ;;  %311 = vst.msk [vmem:[#allocation2 + $0x141] sm:$0xff] %vm197_vm0, %v278_v34  ;;  %v394_v42 = vld [vmem:[#allocation2 + $0x91] sm:$0xff]  ;;  %v395_v47 = vld [vmem:[#allocation2 + $0x99] sm:$0xff] }
  0x36   : > { %458 = vrot.lane.b32.xlu0 %v2822_v30, %s2650_s25  ;;  %312 = vst.msk [vmem:[#allocation2 + $0x151] sm:$0xff] %vm197_vm0, %v279_v35  ;;  %313 = vst.msk [vmem:[#allocation2 + $0x159] sm:$0xff] %vm197_vm0, %v280_v36  ;;  %v396_v44 = vld [vmem:[#allocation2 + $0xa9] sm:$0xff]  ;;  %v2853_v46 = vld [vmem:[#allocation2 + $0x18] sm:$0xff] }
  0x37   : > { %314 = vst.msk [vmem:[#allocation2 + $0x169] sm:$0xff] %vm197_vm0, %v281_v37  ;;  %315 = vst.msk [vmem:[#allocation2 + $0x171] sm:$0xff] %vm197_vm0, %v282_v38  ;;  %v2860_v49 = vld [vmem:[#allocation2 + $0x20] sm:$0xff]  ;;  %v2864_v51 = vld [vmem:[#allocation2 + $0x30] sm:$0xff] }
  0x38   : > { %350 = vst.msk [vmem:[#allocation3] sm:$0xff] %vm197_vm0, %v318_v45  ;;  %352 = vst.msk [vmem:[#allocation3 + $0x10] sm:$0xff] %vm197_vm0, %v2853_v46  ;;  %v398_v50 = vld [vmem:[#allocation2 + $0xc1] sm:$0xff]  ;;  %v2866_v52 = vld [vmem:[#allocation2 + $0x38] sm:$0xff] }
  0x39   : > { %456 = vrot.lane.b32.xlu1 %v2826_v31, %s2650_s25  ;;  %351 = vst.msk [vmem:[#allocation3 + $0x8] sm:$0xff] %vm197_vm0, %v319_v48  ;;  %353 = vst.msk [vmem:[#allocation3 + $0x18] sm:$0xff] %vm197_vm0, %v2860_v49  ;;  %v397_v53 = vld [vmem:[#allocation2 + $0xb1] sm:$0xff]  ;;  %v2873_v54 = vld [vmem:[#allocation2 + $0x48] sm:$0xff] }
  0x3a   : > { %462 = vrot.lane.b32.xlu0 %v390_v32, %s2650_s25  ;;  %354 = vst.msk [vmem:[#allocation3 + $0x20] sm:$0xff] %vm197_vm0, %v2864_v51  ;;  %355 = vst.msk [vmem:[#allocation3 + $0x28] sm:$0xff] %vm197_vm0, %v2866_v52  ;;  %v2875_v55 = vld [vmem:[#allocation2 + $0x50] sm:$0xff]  ;;  %v2877_v56 = vld [vmem:[#allocation2 + $0xd9] sm:$0xff] }
  0x3b   : > { %356 = vst.msk [vmem:[#allocation3 + $0x30] sm:$0xff] %vm197_vm0, %v2873_v54  ;;  %357 = vst.msk [vmem:[#allocation3 + $0x38] sm:$0xff] %vm197_vm0, %v2875_v55  ;;  %v2883_v57 = vld [vmem:[#allocation2 + $0x60] sm:$0xff]  ;;  %v2885_v58 = vld [vmem:[#allocation2 + $0x68] sm:$0xff] }
  0x3c   : > { %v2887_v59 = vld [vmem:[#allocation2 + $0x78] sm:$0xff]  ;;  %358 = vst.msk [vmem:[#allocation3 + $0x40] sm:$0xff] %vm197_vm0, %v2883_v57  ;;  %359 = vst.msk [vmem:[#allocation3 + $0x48] sm:$0xff] %vm197_vm0, %v2885_v58  ;;  %v2896_v60 = vld [vmem:[#allocation2 + $0x80] sm:$0xff] }
  0x3d   : > { %460 = vrot.lane.b32.xlu1 %v2841_v39, %s2650_s25  ;;  %360 = vst.msk [vmem:[#allocation3 + $0x50] sm:$0xff] %vm197_vm0, %v2887_v59  ;;  %v2898_v61 = vld [vmem:[#allocation2 + $0x90] sm:$0xff]  ;;  %v2900_v62 = vld [vmem:[#allocation2 + $0x98] sm:$0xff]  ;;  %361 = vst.msk [vmem:[#allocation3 + $0x58] sm:$0xff] %vm197_vm0, %v2896_v60 }
  0x3e   : > { %466 = vrot.lane.b32.xlu0 %v392_v40, %s2650_s25  ;;  %v399_v63 = vld [vmem:[#allocation2 + $0xc9] sm:$0xff]  ;;  %362 = vst.msk [vmem:[#allocation3 + $0x60] sm:$0xff] %vm197_vm0, %v2898_v61  ;;  %363 = vst.msk [vmem:[#allocation3 + $0x68] sm:$0xff] %vm197_vm0, %v2900_v62  ;;  %v2912_v2 = vld [vmem:[#allocation2 + $0xc0] sm:$0xff] }
  0x3f   : > { %v2908_v0 = vld [vmem:[#allocation2 + $0xa8] sm:$0xff]  ;;  %v2910_v1 = vld [vmem:[#allocation2 + $0xb0] sm:$0xff]  ;;  %366 = vst.msk [vmem:[#allocation3 + $0x80] sm:$0xff] %vm197_vm0, %v2912_v2  ;;  %v2923_v4 = vld [vmem:[#allocation2 + $0xd8] sm:$0xff] }
  0x40   : > { %364 = vst.msk [vmem:[#allocation3 + $0x70] sm:$0xff] %vm197_vm0, %v2908_v0  ;;  %365 = vst.msk [vmem:[#allocation3 + $0x78] sm:$0xff] %vm197_vm0, %v2910_v1  ;;  %v2921_v3 = vld [vmem:[#allocation2 + $0xc8] sm:$0xff]  ;;  %v2925_v5 = vld [vmem:[#allocation2 + $0xe0] sm:$0xff] }
  0x41   : > { %464 = vrot.lane.b32.xlu1 %v391_v41, %s2650_s25  ;;  %367 = vst.msk [vmem:[#allocation3 + $0x88] sm:$0xff] %vm197_vm0, %v2921_v3  ;;  %368 = vst.msk [vmem:[#allocation3 + $0x90] sm:$0xff] %vm197_vm0, %v2923_v4  ;;  %v2933_v6 = vld [vmem:[#allocation2 + $0xf0] sm:$0xff]  ;;  %v2935_v7 = vld [vmem:[#allocation2 + $0xf8] sm:$0xff] }
  0x42   : > { %470 = vrot.lane.b32.xlu0 %v394_v42, %s2650_s25  ;;  %369 = vst.msk [vmem:[#allocation3 + $0x98] sm:$0xff] %vm197_vm0, %v2925_v5  ;;  %v2937_v8 = vld [vmem:[#allocation2 + $0x108] sm:$0xff]  ;;  %370 = vst.msk [vmem:[#allocation3 + $0xa0] sm:$0xff] %vm197_vm0, %v2933_v6  ;;  %v2947_v9 = vld [vmem:[#allocation2 + $0x110] sm:$0xff] }
  0x43   : > { %371 = vst.msk [vmem:[#allocation3 + $0xa8] sm:$0xff] %vm197_vm0, %v2935_v7  ;;  %372 = vst.msk [vmem:[#allocation3 + $0xb0] sm:$0xff] %vm197_vm0, %v2937_v8  ;;  %v2949_v10 = vld [vmem:[#allocation2 + $0xf1] sm:$0xff]  ;;  %v2954_v11 = vld [vmem:[#allocation2 + $0x120] sm:$0xff] }
  0x44   : > { %373 = vst.msk [vmem:[#allocation3 + $0xb8] sm:$0xff] %vm197_vm0, %v2947_v9  ;;  %v2956_v12 = vld [vmem:[#allocation2 + $0x128] sm:$0xff]  ;;  %374 = vst.msk [vmem:[#allocation3 + $0xc0] sm:$0xff] %vm197_vm0, %v2954_v11  ;;  %v2970_v15 = vld [vmem:[#allocation2 + $0x138] sm:$0xff] }
  0x45   : > { %468 = vrot.lane.b32.xlu1 %v393_v43, %s2650_s25  ;;  %v2958_v13 = vld [vmem:[#allocation2 + $0xe1] sm:$0xff]  ;;  %375 = vst.msk [vmem:[#allocation3 + $0xc8] sm:$0xff] %vm197_vm0, %v2956_v12  ;;  %v2966_v14 = vld [vmem:[#allocation2 + $0x109] sm:$0xff]  ;;  %v2974_v17 = vld [vmem:[#allocation2 + $0xf9] sm:$0xff] }
  0x46   : > { %474 = vrot.lane.b32.xlu0 %v396_v44, %s2650_s25  ;;  %v2972_v16 = vld [vmem:[#allocation2 + $0x140] sm:$0xff]  ;;  %376 = vst.msk [vmem:[#allocation3 + $0xd0] sm:$0xff] %vm197_vm0, %v2970_v15  ;;  %v2986_v19 = vld [vmem:[#allocation2 + $0x150] sm:$0xff]  ;;  %v2988_v20 = vld [vmem:[#allocation2 + $0x158] sm:$0xff] }
  0x47   : > { %377 = vst.msk [vmem:[#allocation3 + $0xd8] sm:$0xff] %vm197_vm0, %v2972_v16  ;;  %v2982_v18 = vld [vmem:[#allocation2 + $0x121] sm:$0xff]  ;;  %v2990_v21 = vld [vmem:[#allocation2 + $0x111] sm:$0xff]  ;;  %378 = vst.msk [vmem:[#allocation3 + $0xe0] sm:$0xff] %vm197_vm0, %v2986_v19 }
  0x48   : > { %379 = vst.msk [vmem:[#allocation3 + $0xe8] sm:$0xff] %vm197_vm0, %v2988_v20  ;;  %v408_v22 = vld [vmem:[#allocation2 + $0x139] sm:$0xff]  ;;  %v3000_v23 = vld [vmem:[#allocation2 + $0x168] sm:$0xff]  ;;  %v3002_v24 = vld [vmem:[#allocation2 + $0x170] sm:$0xff] }
  0x49   : > { %472 = vrot.lane.b32.xlu1 %v395_v47, %s2650_s25  ;;  %v3004_v28 = vld [vmem:[#allocation2 + $0x129] sm:$0xff]  ;;  %380 = vst.msk [vmem:[#allocation3 + $0xf0] sm:$0xff] %vm197_vm0, %v3000_v23  ;;  %381 = vst.msk [vmem:[#allocation3 + $0xf8] sm:$0xff] %vm197_vm0, %v3002_v24  ;;  %v410_v29 = vld [vmem:[#allocation2 + $0x151] sm:$0xff] }
  0x4a   : > { %478 = vrot.lane.b32.xlu0 %v398_v50, %s2650_s25  ;;  %4134 = vst [vmem:[#allocation4_spill] sm:$0xff] %v3004_v28  ;;  %v409_v32 = vld [vmem:[#allocation2 + $0x141] sm:$0xff]  ;;  %v412_v33 = vld [vmem:[#allocation2 + $0x169] sm:$0xff]  ;;  %v284_v35 = vld [vmem:[%s2755_s21 + $0xf8] sm:$0xff] }
  0x4b   : > { %v283_v34 = vld [vmem:[%s2755_s21 + $0xf0] sm:$0xff]  ;;  %317 = vst.msk [vmem:[#allocation2 + $0x189] sm:$0xff] %vm197_vm0, %v284_v35  ;;  %v411_v36 = vld [vmem:[#allocation2 + $0x159] sm:$0xff]  ;;  %v575_v37 = vld [vmem:[#allocation2 + $0x2] sm:$0xff] }
  0x4c   : > { %316 = vst.msk [vmem:[#allocation2 + $0x181] sm:$0xff] %vm197_vm0, %v283_v34  ;;  %v413_v38 = vld [vmem:[#allocation2 + $0x171] sm:$0xff]  ;;  %v3022_v40 = vld [vmem:[#allocation2 + $0x1a] sm:$0xff]  ;;  %v3030_v43 = vld [vmem:[#allocation2 + $0x22] sm:$0xff] }
  0x4d   : > { %476 = vrot.lane.b32.xlu1 %v397_v53, %s2650_s25  ;;  %v576_v41 = vld [vmem:[#allocation2 + $0xa] sm:$0xff]  ;;  %v3027_v42 = vld [vmem:[#allocation2 + $0x32] sm:$0xff]  ;;  %v3038_v45 = vld [vmem:[#allocation2 + $0x3a] sm:$0xff] }
  0x4e   : > { %482 = vrot.lane.b32.xlu0 %v2877_v56, %s2650_s25  ;;  %v3034_v44 = vld [vmem:[#allocation2 + $0x4a] sm:$0xff]  ;;  %v3042_v47 = vld [vmem:[#allocation2 + $0x62] sm:$0xff]  ;;  %v3046_v48 = vld [vmem:[#allocation2 + $0x52] sm:$0xff] }
  0x4f   : > { %4135 = vst [vmem:[#allocation5_spill] sm:$0xff] %v3042_v47  ;;  %v585_v50 = vld [vmem:[#allocation2 + $0x7a] sm:$0xff]  ;;  %v3052_v53 = vld [vmem:[#allocation2 + $0x6a] sm:$0xff]  ;;  %v590_v34 = vld [vmem:[#allocation2 + $0xb2] sm:$0xff] }
  0x50   : > { %4136 = vst [vmem:[#allocation6_spill] sm:$0xff] %v3052_v53  ;;  %v3062_v35 = vld [vmem:[#allocation2 + $0xda] sm:$0xff] }
  0x51   : > { %480 = vrot.lane.b32.xlu1 %v399_v63, %s2650_s25  ;;  %v587_v63 = vld [vmem:[#allocation2 + $0x92] sm:$0xff] }
  0x52   : > { %486 = vrot.lane.b32.xlu0 %v2949_v10, %s2650_s25 }
  0x55   : > { %484 = vrot.lane.b32.xlu1 %v2958_v13, %s2650_s25 }
  0x56   : > { %490 = vrot.lane.b32.xlu0 %v2966_v14, %s2650_s25 }
  0x59   : > { %488 = vrot.lane.b32.xlu1 %v2974_v17, %s2650_s25 }
  0x5a   : > { %494 = vrot.lane.b32.xlu0 %v2982_v18, %s2650_s25 }
  0x5d   : > { %492 = vrot.lane.b32.xlu1 %v2990_v21, %s2650_s25 }
  0x5e   : > { %498 = vrot.lane.b32.xlu0 %v408_v22, %s2650_s25  ;;  %v586_v22 = vld [vmem:[#allocation2 + $0x82] sm:$0xff] }
  0x61   : > { %496 = vrot.lane.b32.xlu1 %v3004_v28, %s2650_s25 }
  0x62   : > { %502 = vrot.lane.b32.xlu0 %v410_v29, %s2650_s25  ;;  %v589_v29 = vld [vmem:[#allocation2 + $0xaa] sm:$0xff] }
  0x65   : > { %500 = vrot.lane.b32.xlu1 %v409_v32, %s2650_s25  ;;  %v588_v32 = vld [vmem:[#allocation2 + $0x9a] sm:$0xff] }
  0x66   : > { %506 = vrot.lane.b32.xlu0 %v412_v33, %s2650_s25  ;;  %v591_v33 = vld [vmem:[#allocation2 + $0xc2] sm:$0xff] }
  0x69   : > { %504 = vrot.lane.b32.xlu1 %v411_v36, %s2650_s25  ;;  %v592_v36 = vld [vmem:[#allocation2 + $0xca] sm:$0xff] }
  0x6a   : > { %639 = vrot.lane.b32.xlu0 %v575_v37, %s2651_s26  ;;  %v3067_v37 = vld [vmem:[#allocation2 + $0xf2] sm:$0xff] }
  0x6d   : > { %508 = vrot.lane.b32.xlu1 %v413_v38, %s2650_s25  ;;  %v3070_v38 = vld [vmem:[#allocation2 + $0xe2] sm:$0xff] }
  0x6e   : > { %643 = vrot.lane.b32.xlu0 %v3022_v40, %s2651_s26 }
  0x71   : > { %641 = vrot.lane.b32.xlu1 %v576_v41, %s2651_s26  ;;  %v3074_v41 = vld [vmem:[#allocation2 + $0x10a] sm:$0xff] }
  0x72   : > { %647 = vrot.lane.b32.xlu0 %v3027_v42, %s2651_s26 }
  0x75   : > { %645 = vrot.lane.b32.xlu1 %v3030_v43, %s2651_s26 }
  0x76   : > { %651 = vrot.lane.b32.xlu0 %v3034_v44, %s2651_s26 }
  0x79   : > { %649 = vrot.lane.b32.xlu1 %v3038_v45, %s2651_s26 }
  0x7a   : > { %655 = vrot.lane.b32.xlu0 %v3042_v47, %s2651_s26  ;;  %v605_v47 = vld [vmem:[#allocation2 + $0x16a] sm:$0xff] }
  0x7d   : > { %653 = vrot.lane.b32.xlu1 %v3046_v48, %s2651_s26 }
  0x7e   : > { %659 = vrot.lane.b32.xlu0 %v585_v50, %s2651_s26  ;;  %v3078_v50 = vld [vmem:[#allocation2 + $0xfa] sm:$0xff] }
  0x81   : > { %657 = vrot.lane.b32.xlu1 %v3052_v53, %s2651_s26  ;;  %v602_v53 = vld [vmem:[#allocation2 + $0x142] sm:$0xff] }
  0x82   : > { %663 = vrot.lane.b32.xlu0 %v587_v63, %s2651_s26  ;;  %v3082_v63 = vld [vmem:[#allocation2 + $0x122] sm:$0xff] }
  0x83   : > { %4137 = vst [vmem:[#allocation7_spill] sm:$0xff] %v3082_v63 }
  0x85   : > { %661 = vrot.lane.b32.xlu1 %v586_v22, %s2651_s26  ;;  %v3086_v22 = vld [vmem:[#allocation2 + $0x112] sm:$0xff] }
  0x86   : > { %667 = vrot.lane.b32.xlu0 %v589_v29, %s2651_s26  ;;  %v601_v29 = vld [vmem:[#allocation2 + $0x13a] sm:$0xff] }
  0x89   : > { %665 = vrot.lane.b32.xlu1 %v588_v32, %s2651_s26  ;;  %v447_v32 = vpop.permute.xlu0 %446 }
  0x8a   : > { %671 = vrot.lane.b32.xlu0 %v591_v33, %s2651_s26  ;;  %v3092_v33 = vld [vmem:[#allocation2 + $0x12a] sm:$0xff]  ;;  %543 = vst.msk [vmem:[#allocation3] sm:$0xff] %vm542_vm2, %v447_v32  ;;  %v604_v32 = vld [vmem:[#allocation2 + $0x15a] sm:$0xff] }
  0x8b   : > { %4138 = vst [vmem:[#allocation8_spill] sm:$0xff] %v3092_v33 }
  0x8d   : > { %669 = vrot.lane.b32.xlu1 %v590_v34, %s2651_s26  ;;  %v603_v34 = vld [vmem:[#allocation2 + $0x152] sm:$0xff] }
  0x8e   : > { %675 = vrot.lane.b32.xlu0 %v3062_v35, %s2651_s26 }
  0x91   : > { %673 = vrot.lane.b32.xlu1 %v592_v36, %s2651_s26 }
  0x92   : > { %679 = vrot.lane.b32.xlu0 %v3067_v37, %s2651_s26 }
  0x95   : > { %677 = vrot.lane.b32.xlu1 %v3070_v38, %s2651_s26 }
  0x96   : > { %683 = vrot.lane.b32.xlu0 %v3074_v41, %s2651_s26 }
  0x99   : > { %681 = vrot.lane.b32.xlu1 %v3078_v50, %s2651_s26 }
  0x9a   : > { %687 = vrot.lane.b32.xlu0 %v3082_v63, %s2651_s26  ;;  %v449_v36 = vpop.permute.xlu0 %448 }
  0x9b   : > { %544 = vst.msk [vmem:[#allocation3 + $0x8] sm:$0xff] %vm542_vm2, %v449_v36 }
  0x9d   : > { %685 = vrot.lane.b32.xlu1 %v3086_v22, %s2651_s26 }
  0x9e   : > { %691 = vrot.lane.b32.xlu0 %v601_v29, %s2651_s26 }
  0xa1   : > { %689 = vrot.lane.b32.xlu1 %v3092_v33, %s2651_s26  ;;  %v606_v33 = vld [vmem:[#allocation2 + $0x172] sm:$0xff] }
  0xa2   : > { %695 = vrot.lane.b32.xlu0 %v603_v34, %s2651_s26 }
  0xa3   : > { %v451_v63 = vpop.permute.xlu1 %450 }
  0xa4   : > { %545 = vst.msk [vmem:[#allocation3 + $0x10] sm:$0xff] %vm542_vm2, %v451_v63  ;;  %v455_v28 = vpop.permute.xlu0 %454 }
  0xa5   : > { %693 = vrot.lane.b32.xlu1 %v602_v53, %s2651_s26  ;;  %547 = vst.msk [vmem:[#allocation3 + $0x20] sm:$0xff] %vm542_vm2, %v455_v28 }
  0xa6   : > { %699 = vrot.lane.b32.xlu0 %v605_v47, %s2651_s26 }
  0xa7   : > { %v453_v29 = vpop.permute.xlu1 %452 }
  0xa8   : > { %546 = vst.msk [vmem:[#allocation3 + $0x18] sm:$0xff] %vm542_vm2, %v453_v29  ;;  %v459_v36 = vpop.permute.xlu0 %458 }
  0xa9   : > { %697 = vrot.lane.b32.xlu1 %v604_v32, %s2651_s26  ;;  %549 = vst.msk [vmem:[#allocation3 + $0x30] sm:$0xff] %vm542_vm2, %v459_v36 }
  0xaa   : > { %832 = vrot.lane.b32.xlu0 %v2853_v46, %s2652_s27 }
  0xab   : > { %v457_v34 = vpop.permute.xlu1 %456 }
  0xac   : > { %548 = vst.msk [vmem:[#allocation3 + $0x28] sm:$0xff] %vm542_vm2, %v457_v34  ;;  %v463_v28 = vpop.permute.xlu0 %462 }
  0xad   : > { %701 = vrot.lane.b32.xlu1 %v606_v33, %s2651_s26  ;;  %551 = vst.msk [vmem:[#allocation3 + $0x40] sm:$0xff] %vm542_vm2, %v463_v28 }
  0xae   : > { %836 = vrot.lane.b32.xlu0 %v2864_v51, %s2652_s27 }
  0xaf   : > { %v461_v47 = vpop.permute.xlu1 %460 }
  0xb0   : > { %550 = vst.msk [vmem:[#allocation3 + $0x38] sm:$0xff] %vm542_vm2, %v461_v47  ;;  %v467_v53 = vpop.permute.xlu0 %466 }
  0xb1   : > { %834 = vrot.lane.b32.xlu1 %v2860_v49, %s2652_s27  ;;  %553 = vst.msk [vmem:[#allocation3 + $0x50] sm:$0xff] %vm542_vm2, %v467_v53 }
  0xb2   : > { %840 = vrot.lane.b32.xlu0 %v2873_v54, %s2652_s27 }
  0xb3   : > { %v465_v46 = vpop.permute.xlu1 %464 }
  0xb4   : > { %552 = vst.msk [vmem:[#allocation3 + $0x48] sm:$0xff] %vm542_vm2, %v465_v46  ;;  %v471_v63 = vpop.permute.xlu0 %470 }
  0xb5   : > { %838 = vrot.lane.b32.xlu1 %v2866_v52, %s2652_s27  ;;  %555 = vst.msk [vmem:[#allocation3 + $0x60] sm:$0xff] %vm542_vm2, %v471_v63 }
  0xb6   : > { %844 = vrot.lane.b32.xlu0 %v2883_v57, %s2652_s27 }
  0xb7   : > { %v469_v33 = vpop.permute.xlu1 %468 }
  0xb8   : > { %554 = vst.msk [vmem:[#allocation3 + $0x58] sm:$0xff] %vm542_vm2, %v469_v33  ;;  %v475_v49 = vpop.permute.xlu0 %474 }
  0xb9   : > { %842 = vrot.lane.b32.xlu1 %v2875_v55, %s2652_s27  ;;  %557 = vst.msk [vmem:[#allocation3 + $0x70] sm:$0xff] %vm542_vm2, %v475_v49 }
  0xba   : > { %848 = vrot.lane.b32.xlu0 %v2887_v59, %s2652_s27 }
  0xbb   : > { %v473_v32 = vpop.permute.xlu1 %472 }
  0xbc   : > { %556 = vst.msk [vmem:[#allocation3 + $0x68] sm:$0xff] %vm542_vm2, %v473_v32  ;;  %v479_v29 = vpop.permute.xlu0 %478 }
  0xbd   : > { %846 = vrot.lane.b32.xlu1 %v2885_v58, %s2652_s27  ;;  %559 = vst.msk [vmem:[#allocation3 + $0x80] sm:$0xff] %vm542_vm2, %v479_v29 }
  0xbe   : > { %852 = vrot.lane.b32.xlu0 %v2898_v61, %s2652_s27 }
  0xbf   : > { %v477_v36 = vpop.permute.xlu1 %476 }
  0xc0   : > { %558 = vst.msk [vmem:[#allocation3 + $0x78] sm:$0xff] %vm542_vm2, %v477_v36  ;;  %v483_v34 = vpop.permute.xlu0 %482  ;;  %v798_v36 = vld [vmem:[#allocation2 + $0x180] sm:$0xff] }
  0xc1   : > { %850 = vrot.lane.b32.xlu1 %v2896_v60, %s2652_s27  ;;  %561 = vst.msk [vmem:[#allocation3 + $0x90] sm:$0xff] %vm542_vm2, %v483_v34 }
  0xc2   : > { %856 = vrot.lane.b32.xlu0 %v2908_v0, %s2652_s27 }
  0xc3   : > { %v481_v28 = vpop.permute.xlu1 %480 }
  0xc4   : > { %560 = vst.msk [vmem:[#allocation3 + $0x88] sm:$0xff] %vm542_vm2, %v481_v28  ;;  %v487_v47 = vpop.permute.xlu0 %486 }
  0xc5   : > { %854 = vrot.lane.b32.xlu1 %v2900_v62, %s2652_s27  ;;  %563 = vst.msk [vmem:[#allocation3 + $0xa0] sm:$0xff] %vm542_vm2, %v487_v47 }
  0xc6   : > { %860 = vrot.lane.b32.xlu0 %v2912_v2, %s2652_s27 }
  0xc7   : > { %v485_v61 = vpop.permute.xlu1 %484 }
  0xc8   : > { %562 = vst.msk [vmem:[#allocation3 + $0x98] sm:$0xff] %vm542_vm2, %v485_v61  ;;  %v491_v53 = vpop.permute.xlu0 %490  ;;  %v799_v61 = vld [vmem:[#allocation2 + $0x188] sm:$0xff] }
  0xc9   : > { %858 = vrot.lane.b32.xlu1 %v2910_v1, %s2652_s27  ;;  %565 = vst.msk [vmem:[#allocation3 + $0xb0] sm:$0xff] %vm542_vm2, %v491_v53 }
  0xca   : > { %864 = vrot.lane.b32.xlu0 %v2923_v4, %s2652_s27 }
  0xcb   : > { %v489_v0 = vpop.permute.xlu1 %488 }
  0xcc   : > { %564 = vst.msk [vmem:[#allocation3 + $0xa8] sm:$0xff] %vm542_vm2, %v489_v0  ;;  %v495_v62 = vpop.permute.xlu0 %494 }
  0xcd   : > { %862 = vrot.lane.b32.xlu1 %v2921_v3, %s2652_s27  ;;  %567 = vst.msk [vmem:[#allocation3 + $0xc0] sm:$0xff] %vm542_vm2, %v495_v62 }
  0xce   : > { %868 = vrot.lane.b32.xlu0 %v2933_v6, %s2652_s27 }
  0xcf   : > { %v493_v2 = vpop.permute.xlu1 %492 }
  0xd0   : > { %566 = vst.msk [vmem:[#allocation3 + $0xb8] sm:$0xff] %vm542_vm2, %v493_v2  ;;  %v499_v1 = vpop.permute.xlu0 %498 }
  0xd1   : > { %866 = vrot.lane.b32.xlu1 %v2925_v5, %s2652_s27  ;;  %569 = vst.msk [vmem:[#allocation3 + $0xd0] sm:$0xff] %vm542_vm2, %v499_v1 }
  0xd2   : > { %872 = vrot.lane.b32.xlu0 %v2937_v8, %s2652_s27 }
  0xd3   : > { %v497_v4 = vpop.permute.xlu1 %496 }
  0xd4   : > { %568 = vst.msk [vmem:[#allocation3 + $0xc8] sm:$0xff] %vm542_vm2, %v497_v4  ;;  %v503_v3 = vpop.permute.xlu0 %502 }
  0xd5   : > { %870 = vrot.lane.b32.xlu1 %v2935_v7, %s2652_s27  ;;  %571 = vst.msk [vmem:[#allocation3 + $0xe0] sm:$0xff] %vm542_vm2, %v503_v3 }
  0xd6   : > { %876 = vrot.lane.b32.xlu0 %v2954_v11, %s2652_s27 }
  0xd7   : > { %v501_v46 = vpop.permute.xlu1 %500 }
  0xd8   : > { %570 = vst.msk [vmem:[#allocation3 + $0xd8] sm:$0xff] %vm542_vm2, %v501_v46  ;;  %v507_v5 = vpop.permute.xlu0 %506 }
  0xd9   : > { %874 = vrot.lane.b32.xlu1 %v2947_v9, %s2652_s27  ;;  %573 = vst.msk [vmem:[#allocation3 + $0xf0] sm:$0xff] %vm542_vm2, %v507_v5 }
  0xda   : > { %880 = vrot.lane.b32.xlu0 %v2970_v15, %s2652_s27 }
  0xdb   : > { %v505_v63 = vpop.permute.xlu1 %504 }
  0xdc   : > { %572 = vst.msk [vmem:[#allocation3 + $0xe8] sm:$0xff] %vm542_vm2, %v505_v63  ;;  %v640_v33 = vpop.permute.xlu0 %639 }
  0xdd   : > { %878 = vrot.lane.b32.xlu1 %v2956_v12, %s2652_s27  ;;  %736 = vst.msk [vmem:[#allocation3] sm:$0xff] %vm735_vm3, %v640_v33 }
  0xde   : > { %884 = vrot.lane.b32.xlu0 %v2986_v19, %s2652_s27 }
  0xdf   : > { %v509_v49 = vpop.permute.xlu1 %508 }
  0xe0   : > { %574 = vst.msk [vmem:[#allocation3 + $0xf8] sm:$0xff] %vm542_vm2, %v509_v49  ;;  %v644_v32 = vpop.permute.xlu0 %643 }
  0xe1   : > { %882 = vrot.lane.b32.xlu1 %v2972_v16, %s2652_s27  ;;  %738 = vst.msk [vmem:[#allocation3 + $0x10] sm:$0xff] %vm735_vm3, %v644_v32 }
  0xe2   : > { %888 = vrot.lane.b32.xlu0 %v3000_v23, %s2652_s27 }
  0xe3   : > { %v642_v29 = vpop.permute.xlu1 %641 }
  0xe4   : > { %737 = vst.msk [vmem:[#allocation3 + $0x8] sm:$0xff] %vm735_vm3, %v642_v29  ;;  %v648_v34 = vpop.permute.xlu0 %647  ;;  %v2639_v29 = vld [vmem:[%s4125_s1 + $0x18] sm:$0xff]  }
  0xe5   : > { %886 = vrot.lane.b32.xlu1 %v2988_v20, %s2652_s27  ;;  %740 = vst.msk [vmem:[#allocation3 + $0x20] sm:$0xff] %vm735_vm3, %v648_v34 }
  0xe6   : > { %892 = vrot.lane.b32.xlu0 %v798_v36, %s2652_s27 }
  0xe7   : > { %v646_v28 = vpop.permute.xlu1 %645 }
  0xe8   : > { %739 = vst.msk [vmem:[#allocation3 + $0x18] sm:$0xff] %vm735_vm3, %v646_v28  ;;  %v652_v47 = vpop.permute.xlu0 %651 }
  0xe9   : > { %890 = vrot.lane.b32.xlu1 %v3002_v24, %s2652_s27  ;;  %742 = vst.msk [vmem:[#allocation3 + $0x30] sm:$0xff] %vm735_vm3, %v652_v47 }
  0xea   : > { %1025 = vrot.lane.b32.xlu0 %v2805_v25, %s2653_s28 }
  0xeb   : > { %v650_v23 = vpop.permute.xlu1 %649 }
  0xec   : > { %741 = vst.msk [vmem:[#allocation3 + $0x28] sm:$0xff] %vm735_vm3, %v650_v23  ;;  %v656_v53 = vpop.permute.xlu0 %655 }
  0xed   : > { %894 = vrot.lane.b32.xlu1 %v799_v61, %s2652_s27  ;;  %744 = vst.msk [vmem:[#allocation3 + $0x40] sm:$0xff] %vm735_vm3, %v656_v53  ;;  %v965_v61 = vld [vmem:[#allocation2 + $0x49] sm:$0xff] }
  0xee   : > { %1029 = vrot.lane.b32.xlu0 %v2807_v26, %s2653_s28 }
  0xef   : > { %v654_v0 = vpop.permute.xlu1 %653 }
  0xf0   : > { %743 = vst.msk [vmem:[#allocation3 + $0x38] sm:$0xff] %vm735_vm3, %v654_v0  ;;  %v660_v24 = vpop.permute.xlu0 %659  ;;  %v966_v0 = vld [vmem:[#allocation2 + $0x51] sm:$0xff] }
  0xf1   : > { %1027 = vrot.lane.b32.xlu1 %v2814_v27, %s2653_s28  ;;  %746 = vst.msk [vmem:[#allocation3 + $0x50] sm:$0xff] %vm735_vm3, %v660_v24 }
  0xf2   : > { %1057 = vrot.lane.b32.xlu0 %v2877_v56, %s2653_s28 }
  0xf3   : > { %v658_v25 = vpop.permute.xlu1 %657 }
  0xf4   : > { %745 = vst.msk [vmem:[#allocation3 + $0x48] sm:$0xff] %vm735_vm3, %v658_v25  ;;  %v664_v62 = vpop.permute.xlu0 %663  ;;  %v3343_v25 = vld [vmem:[#allocation2 + $0x61] sm:$0xff] }
  0xf5   : > { %1031 = vrot.lane.b32.xlu1 %v2826_v31, %s2653_s28  ;;  %748 = vst.msk [vmem:[#allocation3 + $0x60] sm:$0xff] %vm735_vm3, %v664_v62 }
  0xf6   : > { %1061 = vrot.lane.b32.xlu0 %v2949_v10, %s2653_s28 }
  0xf7   : > { %v662_v2 = vpop.permute.xlu1 %661 }
  0xf8   : > { %747 = vst.msk [vmem:[#allocation3 + $0x58] sm:$0xff] %vm735_vm3, %v662_v2  ;;  %v668_v27 = vpop.permute.xlu0 %667 }
  0xf9   : > { %1059 = vrot.lane.b32.xlu1 %v2958_v13, %s2653_s28  ;;  %750 = vst.msk [vmem:[#allocation3 + $0x70] sm:$0xff] %vm735_vm3, %v668_v27 }
  0xfa   : > { %1218 = vrot.lane.b32.xlu0 %v3022_v40, %s2654_s29 }
  0xfb   : > { %v666_v56 = vpop.permute.xlu1 %665 }
  0xfc   : > { %749 = vst.msk [vmem:[#allocation3 + $0x68] sm:$0xff] %vm735_vm3, %v666_v56  ;;  %v672_v1 = vpop.permute.xlu0 %671 }
  0xfd   : > { %1063 = vrot.lane.b32.xlu1 %v2974_v17, %s2653_s28  ;;  %752 = vst.msk [vmem:[#allocation3 + $0x80] sm:$0xff] %vm735_vm3, %v672_v1 }
  0xfe   : > { %1250 = vrot.lane.b32.xlu0 %v3062_v35, %s2654_s29 }
  0xff   : > { %v670_v4 = vpop.permute.xlu1 %669 }
 0x100   : > { %751 = vst.msk [vmem:[#allocation3 + $0x78] sm:$0xff] %vm735_vm3, %v670_v4  ;;  %v676_v13 = vpop.permute.xlu0 %675 }
 0x101   : > { %1220 = vrot.lane.b32.xlu1 %v3030_v43, %s2654_s29  ;;  %754 = vst.msk [vmem:[#allocation3 + $0x90] sm:$0xff] %vm735_vm3, %v676_v13 }
 0x102   : > { %1222 = vrot.lane.b32.xlu0 %v3027_v42, %s2654_s29 }
 0x103   : > { %v674_v40 = vpop.permute.xlu1 %673 }
 0x104   : > { %753 = vst.msk [vmem:[#allocation3 + $0x88] sm:$0xff] %vm735_vm3, %v674_v40  ;;  %v680_v3 = vpop.permute.xlu0 %679 }
 0x105   : > { %1252 = vrot.lane.b32.xlu1 %v3070_v38, %s2654_s29  ;;  %756 = vst.msk [vmem:[#allocation3 + $0xa0] sm:$0xff] %vm735_vm3, %v680_v3  ;;  %v4140_v3 = vld [vmem:[#allocation5_spill] sm:$0xff] }
 0x106   : > { %1254 = vrot.lane.b32.xlu0 %v3067_v37, %s2654_s29 }
 0x107   : > { %v678_v35 = vpop.permute.xlu1 %677 }
 0x108   : > { %755 = vst.msk [vmem:[#allocation3 + $0x98] sm:$0xff] %vm735_vm3, %v678_v35  ;;  %v684_v43 = vpop.permute.xlu0 %683 }
 0x109   : > { %1224 = vrot.lane.b32.xlu1 %v3038_v45, %s2654_s29  ;;  %758 = vst.msk [vmem:[#allocation3 + $0xb0] sm:$0xff] %vm735_vm3, %v684_v43  ;;  %v4141_v43 = vld [vmem:[#allocation7_spill] sm:$0xff] }
 0x10a   : > { %1412 = vrot.lane.b32.xlu0 %v2864_v51, %s2655_s30 }
 0x10b   : > { %v682_v46 = vpop.permute.xlu1 %681 }
 0x10c   : > { %757 = vst.msk [vmem:[#allocation3 + $0xa8] sm:$0xff] %vm735_vm3, %v682_v46  ;;  %v688_v38 = vpop.permute.xlu0 %687 }
 0x10d   : > { %1256 = vrot.lane.b32.xlu1 %v3078_v50, %s2654_s29  ;;  %760 = vst.msk [vmem:[#allocation3 + $0xc0] sm:$0xff] %vm735_vm3, %v688_v38 }
 0x10e   : > { %1444 = vrot.lane.b32.xlu0 %v2933_v6, %s2655_s30 }
 0x10f   : > { %v686_v5 = vpop.permute.xlu1 %685 }
 0x110   : > { %759 = vst.msk [vmem:[#allocation3 + $0xb8] sm:$0xff] %vm735_vm3, %v686_v5  ;;  %v692_v63 = vpop.permute.xlu0 %691 }
 0x111   : > { %1414 = vrot.lane.b32.xlu1 %v2866_v52, %s2655_s30  ;;  %762 = vst.msk [vmem:[#allocation3 + $0xd0] sm:$0xff] %vm735_vm3, %v692_v63 }
 0x112   : > { %1416 = vrot.lane.b32.xlu0 %v2873_v54, %s2655_s30 }
 0x113   : > { %v690_v51 = vpop.permute.xlu1 %689 }
 0x114   : > { %761 = vst.msk [vmem:[#allocation3 + $0xc8] sm:$0xff] %vm735_vm3, %v690_v51  ;;  %v696_v33 = vpop.permute.xlu0 %695 }
 0x115   : > { %1446 = vrot.lane.b32.xlu1 %v2935_v7, %s2655_s30  ;;  %764 = vst.msk [vmem:[#allocation3 + $0xe0] sm:$0xff] %vm735_vm3, %v696_v33 }
 0x116   : > { %1448 = vrot.lane.b32.xlu0 %v2937_v8, %s2655_s30 }
 0x117   : > { %v694_v6 = vpop.permute.xlu1 %693 }
 0x118   : > { %763 = vst.msk [vmem:[#allocation3 + $0xd8] sm:$0xff] %vm735_vm3, %v694_v6  ;;  %v700_v52 = vpop.permute.xlu0 %699 }
 0x119   : > { %1418 = vrot.lane.b32.xlu1 %v2875_v55, %s2655_s30  ;;  %766 = vst.msk [vmem:[#allocation3 + $0xf0] sm:$0xff] %vm735_vm3, %v700_v52  ;;  %v2636_v55 = vld [vmem:[%s4125_s1] sm:$0xff]  }
 0x11a   : > { %1605 = vrot.lane.b32.xlu0 %v2807_v26, %s2656_s5  ;;  %2564 = vmatprep.subr.bf16.mxu0 %v2636_v55 }
 0x11b   : > { %v698_v54 = vpop.permute.xlu1 %697  ;;  %2606 = vmatprep.subr.bf16.mxu1 %v2636_v55  ;;  %2565 = vmatpush3.bf16.msra.mxu0 %v2636_v55 }
 0x11c   : > { %765 = vst.msk [vmem:[#allocation3 + $0xe8] sm:$0xff] %vm735_vm3, %v698_v54  ;;  %v833_v7 = vpop.permute.xlu0 %832  ;;  %2611 = vmatpush3.bf16.msra.mxu1 %v2636_v55  ;;  %v1562_v54 = vld [vmem:[#allocation2 + $0x129] sm:$0xff]  ;;  %v1548_v55 = vld [vmem:[#allocation2 + $0x81] sm:$0xff] }
 0x11d   : > { %1450 = vrot.lane.b32.xlu1 %v2947_v9, %s2655_s30  ;;  %929 = vst.msk [vmem:[#allocation3] sm:$0xff] %vm928_vm4, %v833_v7 }
 0x11e   : > { %1637 = vrot.lane.b32.xlu0 %v2949_v10, %s2656_s5  ;;  %v2637_v10 = vld [vmem:[%s4125_s1 + $0x8] sm:$0xff]  }
 0x11f   : > { %v702_v8 = vpop.permute.xlu1 %701  ;;  %2566 = vmatprep.subr.bf16.mxu0 %v2637_v10  ;;  %2607 = vmatprep.subr.bf16.mxu1 %v2637_v10 }
 0x120   : > { %767 = vst.msk [vmem:[#allocation3 + $0xf8] sm:$0xff] %vm735_vm3, %v702_v8  ;;  %v837_v26 = vpop.permute.xlu0 %836  ;;  %2567 = vmatpush3.bf16.msra.mxu0 %v2637_v10  ;;  %2612 = vmatpush3.bf16.msra.mxu1 %v2637_v10 }
 0x121   : > { %1607 = vrot.lane.b32.xlu1 %v2826_v31, %s2656_s5  ;;  %931 = vst.msk [vmem:[#allocation3 + $0x10] sm:$0xff] %vm928_vm4, %v837_v26 }
 0x122   : > { %1609 = vrot.lane.b32.xlu0 %v2822_v30, %s2656_s5  ;;  %v2638_v30 = vld [vmem:[%s4125_s1 + $0x10] sm:$0xff]  }
 0x123   : > { %v835_v9 = vpop.permute.xlu1 %834  ;;  %2568 = vmatprep.subr.bf16.mxu0 %v2638_v30  ;;  %2608 = vmatprep.subr.bf16.mxu1 %v2638_v30 }
 0x124   : > { %930 = vst.msk [vmem:[#allocation3 + $0x8] sm:$0xff] %vm928_vm4, %v835_v9  ;;  %v841_v31 = vpop.permute.xlu0 %840  ;;  %2569 = vmatpush3.bf16.msra.mxu0 %v2638_v30  ;;  %2613 = vmatpush3.bf16.msra.mxu1 %v2638_v30  ;;  %v1738_v9 = vld [vmem:[#allocation2 + $0x62] sm:$0xff] }
 0x125   : > { %1639 = vrot.lane.b32.xlu1 %v2974_v17, %s2656_s5  ;;  %933 = vst.msk [vmem:[#allocation3 + $0x20] sm:$0xff] %vm928_vm4, %v841_v31  ;;  %2570 = vmatprep.subr.bf16.mxu0 %v2639_v29  ;;  %v1564_v31 = vld [vmem:[#allocation2 + $0x141] sm:$0xff] }
 0x126   : > { %1641 = vrot.lane.b32.xlu0 %v2966_v14, %s2656_s5  ;;  %2609 = vmatprep.subr.bf16.mxu1 %v2639_v29  ;;  %v1754_v30 = vld [vmem:[#allocation2 + $0x122] sm:$0xff] }
 0x127   : > { %v839_v49 = vpop.permute.xlu1 %838 }
 0x128   : > { %932 = vst.msk [vmem:[#allocation3 + $0x18] sm:$0xff] %vm928_vm4, %v839_v49  ;;  %v845_v17 = vpop.permute.xlu0 %844  ;;  %2571 = vmatpush3.bf16.msra.mxu0 %v2639_v29  ;;  %2614 = vmatpush3.bf16.msra.mxu1 %v2639_v29 }
 0x129   : > { %1611 = vrot.lane.b32.xlu1 %v2841_v39, %s2656_s5  ;;  %935 = vst.msk [vmem:[#allocation3 + $0x30] sm:$0xff] %vm928_vm4, %v845_v17 }
 0x12a   : > { %1798 = vrot.lane.b32.xlu0 %v3027_v42, %s2657_s12  ;;  %v2640_v42 = vld [vmem:[%s4125_s1 + $0x20] ss:$0 sps:$4 sm:$0xff]  }
 0x12b   : > { %v843_v32 = vpop.permute.xlu1 %842  ;;  %2616 = vmatprep.subr.msk.bf16.mxu0 %vm2067_vm5, %v2640_v42  ;;  %v2069_v28 = vsel %vm2067_vm5, %v2640_v42, 0  ;;  %2617 = vmatprep.subr.msk.bf16.mxu1 %vm2067_vm5, %v2640_v42  ;;  %v1755_v42 = vld [vmem:[#allocation2 + $0x12a] sm:$0xff] }
 0x12c   : > { %934 = vst.msk [vmem:[#allocation3 + $0x28] sm:$0xff] %vm928_vm4, %v843_v32  ;;  %v849_v39 = vpop.permute.xlu0 %848  ;;  %2573 = vmatpush3.bf16.msra.mxu0 %v2069_v28  ;;  %2615 = vmatpush3.bf16.msra.mxu1 %v2069_v28  ;;  %v1739_v32 = vld [vmem:[#allocation2 + $0x6a] sm:$0xff]  ;;  %v1756_v28 = vld [vmem:[#allocation2 + $0x13a] sm:$0xff] }
 0x12d   : > { %1643 = vrot.lane.b32.xlu1 %v2990_v21, %s2656_s5  ;;  %937 = vst.msk [vmem:[#allocation3 + $0x40] sm:$0xff] %vm928_vm4, %v849_v39  ;;  %v1740_v39 = vld [vmem:[#allocation2 + $0x7a] sm:$0xff] }
 0x12e   : > { %1830 = vrot.lane.b32.xlu0 %v3067_v37, %s2657_s12 }
 0x12f   : > { %v847_v36 = vpop.permute.xlu1 %846 }
 0x130   : > { %936 = vst.msk [vmem:[#allocation3 + $0x38] sm:$0xff] %vm928_vm4, %v847_v36  ;;  %v853_v34 = vpop.permute.xlu0 %852 }
 0x131   : > { %1800 = vrot.lane.b32.xlu1 %v3038_v45, %s2657_s12  ;;  %939 = vst.msk [vmem:[#allocation3 + $0x50] sm:$0xff] %vm928_vm4, %v853_v34 }
 0x132   : > { %1802 = vrot.lane.b32.xlu0 %v3034_v44, %s2657_s12 }
 0x133   : > { %v851_v47 = vpop.permute.xlu1 %850 }
 0x134   : > { %938 = vst.msk [vmem:[#allocation3 + $0x48] sm:$0xff] %vm928_vm4, %v851_v47  ;;  %v857_v37 = vpop.permute.xlu0 %856 }
 0x135   : > { %1832 = vrot.lane.b32.xlu1 %v3078_v50, %s2657_s12  ;;  %941 = vst.msk [vmem:[#allocation3 + $0x60] sm:$0xff] %vm928_vm4, %v857_v37  ;;  %v1741_v37 = vld [vmem:[#allocation2 + $0x82] sm:$0xff] }
 0x136   : > { %1834 = vrot.lane.b32.xlu0 %v3074_v41, %s2657_s12 }
 0x137   : > { %v855_v45 = vpop.permute.xlu1 %854 }
 0x138   : > { %940 = vst.msk [vmem:[#allocation3 + $0x58] sm:$0xff] %vm928_vm4, %v855_v45  ;;  %v861_v23 = vpop.permute.xlu0 %860 }
 0x139   : > { %1804 = vrot.lane.b32.xlu1 %v3046_v48, %s2657_s12  ;;  %943 = vst.msk [vmem:[#allocation3 + $0x70] sm:$0xff] %vm928_vm4, %v861_v23  ;;  %v1757_v23 = vld [vmem:[#allocation2 + $0x142] sm:$0xff] }
 0x13a   : > { %1033 = vrot.lane.b32.xlu0 %v965_v61, %s2653_s28 }
 0x13b   : > { %v859_v53 = vpop.permute.xlu1 %858 }
 0x13c   : > { %942 = vst.msk [vmem:[#allocation3 + $0x68] sm:$0xff] %vm928_vm4, %v859_v53  ;;  %v865_v50 = vpop.permute.xlu0 %864 }
 0x13d   : > { %1836 = vrot.lane.b32.xlu1 %v3086_v22, %s2657_s12  ;;  %945 = vst.msk [vmem:[#allocation3 + $0x80] sm:$0xff] %vm928_vm4, %v865_v50 }
 0x13e   : > { %1065 = vrot.lane.b32.xlu0 %v2966_v14, %s2653_s28  ;;  %v3352_v14 = vld [vmem:[#allocation2 + $0x69] sm:$0xff] }
 0x13f   : > { %v863_v24 = vpop.permute.xlu1 %862 }
 0x140   : > { %944 = vst.msk [vmem:[#allocation3 + $0x78] sm:$0xff] %vm928_vm4, %v863_v24  ;;  %v869_v62 = vpop.permute.xlu0 %868  ;;  %v3450_v24 = vld [vmem:[#allocation2 + $0x91] sm:$0xff] }
 0x141   : > { %1035 = vrot.lane.b32.xlu1 %v966_v0, %s2653_s28  ;;  %947 = vst.msk [vmem:[#allocation3 + $0x90] sm:$0xff] %vm928_vm4, %v869_v62 }
 0x142   : > { %1037 = vrot.lane.b32.xlu0 %v3343_v25, %s2653_s28 }
 0x143   : > { %v867_v2 = vpop.permute.xlu1 %866 }
 0x144   : > { %946 = vst.msk [vmem:[#allocation3 + $0x88] sm:$0xff] %vm928_vm4, %v867_v2  ;;  %v873_v27 = vpop.permute.xlu0 %872  ;;  %v3457_v2 = vld [vmem:[#allocation2 + $0x151] sm:$0xff] }
 0x145   : > { %1067 = vrot.lane.b32.xlu1 %v2990_v21, %s2653_s28  ;;  %949 = vst.msk [vmem:[#allocation3 + $0xa0] sm:$0xff] %vm928_vm4, %v873_v27  ;;  %v4139_v21 = vld [vmem:[#allocation4_spill] sm:$0xff] }
 0x146   : > { %1069 = vrot.lane.b32.xlu0 %v2982_v18, %s2653_s28 }
 0x147   : > { %v871_v56 = vpop.permute.xlu1 %870 }
 0x148   : > { %948 = vst.msk [vmem:[#allocation3 + $0x98] sm:$0xff] %vm928_vm4, %v871_v56  ;;  %v877_v1 = vpop.permute.xlu0 %876 }
 0x149   : > { %1039 = vrot.lane.b32.xlu1 %v3352_v14, %s2653_s28  ;;  %951 = vst.msk [vmem:[#allocation3 + $0xb0] sm:$0xff] %vm928_vm4, %v877_v1 }
 0x14a   : > { %1226 = vrot.lane.b32.xlu0 %v3034_v44, %s2654_s29 }
 0x14b   : > { %v875_v4 = vpop.permute.xlu1 %874 }
 0x14c   : > { %950 = vst.msk [vmem:[#allocation3 + $0xa8] sm:$0xff] %vm928_vm4, %v875_v4  ;;  %v881_v13 = vpop.permute.xlu0 %880  ;;  %v3468_v4 = vld [vmem:[#allocation2 + $0x159] sm:$0xff] }
 0x14d   : > { %1071 = vrot.lane.b32.xlu1 %v4139_v21, %s2653_s28  ;;  %953 = vst.msk [vmem:[#allocation3 + $0xc0] sm:$0xff] %vm928_vm4, %v881_v13 }
 0x14e   : > { %1258 = vrot.lane.b32.xlu0 %v3074_v41, %s2654_s29 }
 0x14f   : > { %v879_v18 = vpop.permute.xlu1 %878 }
 0x150   : > { %952 = vst.msk [vmem:[#allocation3 + $0xb8] sm:$0xff] %vm928_vm4, %v879_v18  ;;  %v885_v40 = vpop.permute.xlu0 %884 }
 0x151   : > { %1228 = vrot.lane.b32.xlu1 %v3046_v48, %s2654_s29  ;;  %955 = vst.msk [vmem:[#allocation3 + $0xd0] sm:$0xff] %vm928_vm4, %v885_v40  ;;  %v4142_v48 = vld [vmem:[#allocation6_spill] sm:$0xff]  ;;  %v3478_v40 = vld [vmem:[#allocation2 + $0x92] sm:$0xff] }
 0x152   : > { %1230 = vrot.lane.b32.xlu0 %v4140_v3, %s2654_s29 }
 0x153   : > { %v883_v44 = vpop.permute.xlu1 %882 }
 0x154   : > { %954 = vst.msk [vmem:[#allocation3 + $0xc8] sm:$0xff] %vm928_vm4, %v883_v44  ;;  %v889_v35 = vpop.permute.xlu0 %888 }
 0x155   : > { %1260 = vrot.lane.b32.xlu1 %v3086_v22, %s2654_s29  ;;  %957 = vst.msk [vmem:[#allocation3 + $0xe0] sm:$0xff] %vm928_vm4, %v889_v35  ;;  %v4143_v22 = vld [vmem:[#allocation8_spill] sm:$0xff] }
 0x156   : > { %1262 = vrot.lane.b32.xlu0 %v4141_v43, %s2654_s29  ;;  %v3485_v35 = vld [vmem:[#allocation2 + $0x152] sm:$0xff]  ;;  %v3488_v43 = vld [vmem:[#allocation2 + $0x9a] sm:$0xff] }
 0x157   : > { %v887_v41 = vpop.permute.xlu1 %886 }
 0x158   : > { %956 = vst.msk [vmem:[#allocation3 + $0xd8] sm:$0xff] %vm928_vm4, %v887_v41  ;;  %v893_v46 = vpop.permute.xlu0 %892 }
 0x159   : > { %1232 = vrot.lane.b32.xlu1 %v4142_v48, %s2654_s29  ;;  %959 = vst.msk [vmem:[#allocation3 + $0xf0] sm:$0xff] %vm928_vm4, %v893_v46  ;;  %v1356_v46 = vld [vmem:[#allocation2 + $0x90] sm:$0xff] }
 0x15a   : > { %1420 = vrot.lane.b32.xlu0 %v2883_v57, %s2655_s30 }
 0x15b   : > { %v891_v38 = vpop.permute.xlu1 %890 }
 0x15c   : > { %958 = vst.msk [vmem:[#allocation3 + $0xe8] sm:$0xff] %vm928_vm4, %v891_v38  ;;  %v1026_v5 = vpop.permute.xlu0 %1025 }
 0x15d   : > { %1264 = vrot.lane.b32.xlu1 %v4143_v22, %s2654_s29  ;;  %1122 = vst.msk [vmem:[#allocation3] sm:$0xff] %vm1121_vm6, %v1026_v5  ;;  %v3496_v5 = vld [vmem:[#allocation2 + $0x15a] sm:$0xff] }
 0x15e   : > { %1452 = vrot.lane.b32.xlu0 %v2954_v11, %s2655_s30 }
 0x15f   : > { %v895_v63 = vpop.permute.xlu1 %894 }
 0x160   : > { %960 = vst.msk [vmem:[#allocation3 + $0xf8] sm:$0xff] %vm928_vm4, %v895_v63  ;;  %v1030_v51 = vpop.permute.xlu0 %1029 }
 0x161   : > { %1422 = vrot.lane.b32.xlu1 %v2885_v58, %s2655_s30  ;;  %1124 = vst.msk [vmem:[#allocation3 + $0x10] sm:$0xff] %vm1121_vm6, %v1030_v51 }
 0x162   : > { %1424 = vrot.lane.b32.xlu0 %v2887_v59, %s2655_s30 }
 0x163   : > { %v1028_v57 = vpop.permute.xlu1 %1027 }
 0x164   : > { %1123 = vst.msk [vmem:[#allocation3 + $0x8] sm:$0xff] %vm1121_vm6, %v1028_v57  ;;  %v1058_v33 = vpop.permute.xlu0 %1057 }
 0x165   : > { %1454 = vrot.lane.b32.xlu1 %v2956_v12, %s2655_s30  ;;  %1138 = vst.msk [vmem:[#allocation3 + $0x80] sm:$0xff] %vm1121_vm6, %v1058_v33  ;;  %v1561_v12 = vld [vmem:[#allocation2 + $0x121] sm:$0xff] }
 0x166   : > { %1456 = vrot.lane.b32.xlu0 %v2970_v15, %s2655_s30 }
 0x167   : > { %v1032_v11 = vpop.permute.xlu1 %1031 }
 0x168   : > { %1125 = vst.msk [vmem:[#allocation3 + $0x18] sm:$0xff] %vm1121_vm6, %v1032_v11  ;;  %v1062_v58 = vpop.permute.xlu0 %1061 }
 0x169   : > { %1426 = vrot.lane.b32.xlu1 %v2896_v60, %s2655_s30  ;;  %1140 = vst.msk [vmem:[#allocation3 + $0x90] sm:$0xff] %vm1121_vm6, %v1062_v58  ;;  %v1547_v60 = vld [vmem:[#allocation2 + $0x79] sm:$0xff] }
 0x16a   : > { %1613 = vrot.lane.b32.xlu0 %v3343_v25, %s2656_s5  ;;  %v1357_v58 = vld [vmem:[#allocation2 + $0x98] sm:$0xff] }
 0x16b   : > { %v1060_v59 = vpop.permute.xlu1 %1059 }
 0x16c   : > { %1139 = vst.msk [vmem:[#allocation3 + $0x88] sm:$0xff] %vm1121_vm6, %v1060_v59  ;;  %v1219_v15 = vpop.permute.xlu0 %1218 }
 0x16d   : > { %1458 = vrot.lane.b32.xlu1 %v2972_v16, %s2655_s30  ;;  %1315 = vst.msk [vmem:[#allocation3] sm:$0xff] %vm1314_vm7, %v1219_v15  ;;  %v1563_v16 = vld [vmem:[#allocation2 + $0x139] sm:$0xff] }
 0x16e   : > { %1645 = vrot.lane.b32.xlu0 %v1561_v12, %s2656_s5 }
 0x16f   : > { %v1064_v6 = vpop.permute.xlu1 %1063 }
 0x170   : > { %1141 = vst.msk [vmem:[#allocation3 + $0x98] sm:$0xff] %vm1121_vm6, %v1064_v6  ;;  %v1251_v52 = vpop.permute.xlu0 %1250  ;;  %v1358_v6 = vld [vmem:[#allocation2 + $0xa8] sm:$0xff] }
 0x171   : > { %1615 = vrot.lane.b32.xlu1 %v3352_v14, %s2656_s5  ;;  %1331 = vst.msk [vmem:[#allocation3 + $0x80] sm:$0xff] %vm1314_vm7, %v1251_v52  ;;  %v3460_v14 = vld [vmem:[#allocation2 + $0x99] sm:$0xff] }
 0x172   : > { %1617 = vrot.lane.b32.xlu0 %v1547_v60, %s2656_s5 }
 0x173   : > { %v1221_v7 = vpop.permute.xlu1 %1220 }
 0x174   : > { %1316 = vst.msk [vmem:[#allocation3 + $0x8] sm:$0xff] %vm1314_vm7, %v1221_v7  ;;  %v1223_v8 = vpop.permute.xlu0 %1222 }
 0x175   : > { %1647 = vrot.lane.b32.xlu1 %v1562_v54, %s2656_s5  ;;  %1317 = vst.msk [vmem:[#allocation3 + $0x10] sm:$0xff] %vm1314_vm7, %v1223_v8 }
 0x176   : > { %1649 = vrot.lane.b32.xlu0 %v1563_v16, %s2656_s5 }
 0x177   : > { %v1253_v26 = vpop.permute.xlu1 %1252 }
 0x178   : > { %1332 = vst.msk [vmem:[#allocation3 + $0x88] sm:$0xff] %vm1314_vm7, %v1253_v26  ;;  %v1255_v10 = vpop.permute.xlu0 %1254  ;;  %v1359_v26 = vld [vmem:[#allocation2 + $0xb0] sm:$0xff] }
 0x179   : > { %1619 = vrot.lane.b32.xlu1 %v1548_v55, %s2656_s5  ;;  %1333 = vst.msk [vmem:[#allocation3 + $0x90] sm:$0xff] %vm1314_vm7, %v1255_v10 }
 0x17a   : > { %1806 = vrot.lane.b32.xlu0 %v1738_v9, %s2657_s12 }
 0x17b   : > { %v1225_v49 = vpop.permute.xlu1 %1224 }
 0x17c   : > { %1318 = vst.msk [vmem:[#allocation3 + $0x18] sm:$0xff] %vm1314_vm7, %v1225_v49  ;;  %v1413_v17 = vpop.permute.xlu0 %1412 }
 0x17d   : > { %1651 = vrot.lane.b32.xlu1 %v1564_v31, %s2656_s5  ;;  %1509 = vst.msk [vmem:[#allocation3] sm:$0xff] %vm1508_vm8, %v1413_v17 }
 0x17e   : > { %1838 = vrot.lane.b32.xlu0 %v1754_v30, %s2657_s12 }
 0x17f   : > { %v1257_v29 = vpop.permute.xlu1 %1256 }
 0x180   : > { %1334 = vst.msk [vmem:[#allocation3 + $0x98] sm:$0xff] %vm1314_vm7, %v1257_v29  ;;  %v1445_v36 = vpop.permute.xlu0 %1444  ;;  %v1551_v29 = vld [vmem:[#allocation2 + $0xa9] sm:$0xff] }
 0x181   : > { %1808 = vrot.lane.b32.xlu1 %v1739_v32, %s2657_s12  ;;  %1525 = vst.msk [vmem:[#allocation3 + $0x80] sm:$0xff] %vm1508_vm8, %v1445_v36 }
 0x182   : > { %1810 = vrot.lane.b32.xlu0 %v1740_v39, %s2657_s12 }
 0x183   : > { %v1415_v34 = vpop.permute.xlu1 %1414 }
 0x184   : > { %1510 = vst.msk [vmem:[#allocation3 + $0x8] sm:$0xff] %vm1508_vm8, %v1415_v34  ;;  %v1417_v47 = vpop.permute.xlu0 %1416 }
 0x185   : > { %1840 = vrot.lane.b32.xlu1 %v1755_v42, %s2657_s12  ;;  %1511 = vst.msk [vmem:[#allocation3 + $0x10] sm:$0xff] %vm1508_vm8, %v1417_v47  ;;  %v1567_v42 = vld [vmem:[#allocation2 + $0x169] sm:$0xff] }
 0x186   : > { %1842 = vrot.lane.b32.xlu0 %v1756_v28, %s2657_s12 }
 0x187   : > { %v1447_v45 = vpop.permute.xlu1 %1446 }
 0x188   : > { %1526 = vst.msk [vmem:[#allocation3 + $0x88] sm:$0xff] %vm1508_vm8, %v1447_v45  ;;  %v1449_v61 = vpop.permute.xlu0 %1448  ;;  %v1568_v45 = vld [vmem:[#allocation2 + $0x171] sm:$0xff] }
 0x189   : > { %1812 = vrot.lane.b32.xlu1 %v1741_v37, %s2657_s12  ;;  %1527 = vst.msk [vmem:[#allocation3 + $0x90] sm:$0xff] %vm1508_vm8, %v1449_v61 }
 0x18a   : > { %1041 = vrot.lane.b32.xlu0 %v1547_v60, %s2653_s28 }
 0x18b   : > { %v1419_v53 = vpop.permute.xlu1 %1418 }
 0x18c   : > { %1512 = vst.msk [vmem:[#allocation3 + $0x18] sm:$0xff] %vm1508_vm8, %v1419_v53  ;;  %v1606_v50 = vpop.permute.xlu0 %1605 }
 0x18d   : > { %1844 = vrot.lane.b32.xlu1 %v1757_v23, %s2657_s12  ;;  %1702 = vst.msk [vmem:[#allocation3] sm:$0xff] %vm1701_vm9, %v1606_v50  ;;  %v1744_v50 = vld [vmem:[#allocation2 + $0xaa] sm:$0xff] }
 0x18e   : > { %1073 = vrot.lane.b32.xlu0 %v1563_v16, %s2653_s28 }
 0x18f   : > { %v1451_v0 = vpop.permute.xlu1 %1450 }
 0x190   : > { %1528 = vst.msk [vmem:[#allocation3 + $0x98] sm:$0xff] %vm1508_vm8, %v1451_v0  ;;  %v1638_v25 = vpop.permute.xlu0 %1637 }
 0x191   : > { %1043 = vrot.lane.b32.xlu1 %v1548_v55, %s2653_s28  ;;  %1718 = vst.msk [vmem:[#allocation3 + $0x80] sm:$0xff] %vm1701_vm9, %v1638_v25  ;;  %v1760_v25 = vld [vmem:[#allocation2 + $0x16a] sm:$0xff] }
 0x192   : > { %1045 = vrot.lane.b32.xlu0 %v3450_v24, %s2653_s28 }
 0x193   : > { %v1608_v62 = vpop.permute.xlu1 %1607 }
 0x194   : > { %1703 = vst.msk [vmem:[#allocation3 + $0x8] sm:$0xff] %vm1701_vm9, %v1608_v62  ;;  %v1610_v27 = vpop.permute.xlu0 %1609 }
 0x195   : > { %1075 = vrot.lane.b32.xlu1 %v1564_v31, %s2653_s28  ;;  %1704 = vst.msk [vmem:[#allocation3 + $0x10] sm:$0xff] %vm1701_vm9, %v1610_v27 }
 0x196   : > { %1077 = vrot.lane.b32.xlu0 %v3457_v2, %s2653_s28 }
 0x197   : > { %v1640_v56 = vpop.permute.xlu1 %1639 }
 0x198   : > { %1719 = vst.msk [vmem:[#allocation3 + $0x88] sm:$0xff] %vm1701_vm9, %v1640_v56  ;;  %v1642_v1 = vpop.permute.xlu0 %1641  ;;  %v1761_v56 = vld [vmem:[#allocation2 + $0x172] sm:$0xff] }
 0x199   : > { %1047 = vrot.lane.b32.xlu1 %v3460_v14, %s2653_s28  ;;  %1720 = vst.msk [vmem:[#allocation3 + $0x90] sm:$0xff] %vm1701_vm9, %v1642_v1 }
 0x19a   : > { %1234 = vrot.lane.b32.xlu0 %v1740_v39, %s2654_s29 }
 0x19b   : > { %v1612_v21 = vpop.permute.xlu1 %1611 }
 0x19c   : > { %1705 = vst.msk [vmem:[#allocation3 + $0x18] sm:$0xff] %vm1701_vm9, %v1612_v21  ;;  %v1799_v13 = vpop.permute.xlu0 %1798 }
 0x19d   : > { %1079 = vrot.lane.b32.xlu1 %v3468_v4, %s2653_s28  ;;  %1895 = vst.msk [vmem:[#allocation3] sm:$0xff] %vm1894_vm10, %v1799_v13  ;;  %v3568_v13 = vld [vmem:[#allocation2 + $0xc1] sm:$0xff] }
 0x19e   : > { %1266 = vrot.lane.b32.xlu0 %v1756_v28, %s2654_s29  ;;  %v1552_v28 = vld [vmem:[#allocation2 + $0xb1] sm:$0xff] }
 0x19f   : > { %v1644_v18 = vpop.permute.xlu1 %1643 }
 0x1a0   : > { %1721 = vst.msk [vmem:[#allocation3 + $0x98] sm:$0xff] %vm1701_vm9, %v1644_v18  ;;  %v1831_v44 = vpop.permute.xlu0 %1830 }
 0x1a1   : > { %1236 = vrot.lane.b32.xlu1 %v1741_v37, %s2654_s29  ;;  %1911 = vst.msk [vmem:[#allocation3 + $0x80] sm:$0xff] %vm1894_vm10, %v1831_v44  ;;  %v3575_v44 = vld [vmem:[#allocation2 + $0x181] sm:$0xff] }
 0x1a2   : > { %1238 = vrot.lane.b32.xlu0 %v3478_v40, %s2654_s29 }
 0x1a3   : > { %v1801_v3 = vpop.permute.xlu1 %1800 }
 0x1a4   : > { %1896 = vst.msk [vmem:[#allocation3 + $0x8] sm:$0xff] %vm1894_vm10, %v1801_v3  ;;  %v1803_v41 = vpop.permute.xlu0 %1802  ;;  %v1927_v38 = vld [vmem:[#allocation3] sm:$0xff] }
 0x1a5   : > { %1268 = vrot.lane.b32.xlu1 %v1757_v23, %s2654_s29  ;;  %1897 = vst.msk [vmem:[#allocation3 + $0x10] sm:$0xff] %vm1894_vm10, %v1803_v41 }
 0x1a6   : > { %1270 = vrot.lane.b32.xlu0 %v3485_v35, %s2654_s29 }
 0x1a7   : > { %v1833_v48 = vpop.permute.xlu1 %1832 }
 0x1a8   : > { %1912 = vst.msk [vmem:[#allocation3 + $0x88] sm:$0xff] %vm1894_vm10, %v1833_v48  ;;  %v1835_v22 = vpop.permute.xlu0 %1834  ;;  %v1943_v33 = vld [vmem:[#allocation3 + $0x80] sm:$0xff] }
 0x1a9   : > { %1240 = vrot.lane.b32.xlu1 %v3488_v43, %s2654_s29  ;;  %1913 = vst.msk [vmem:[#allocation3 + $0x90] sm:$0xff] %vm1894_vm10, %v1835_v22  ;;  %v3586_v48 = vld [vmem:[#allocation2 + $0x189] sm:$0xff] }
 0x1aa   : > { %1428 = vrot.lane.b32.xlu0 %v1356_v46, %s2655_s30 }
 0x1ab   : > { %v1805_v63 = vpop.permute.xlu1 %1804  ;;  %v1928_v51 = vld [vmem:[#allocation3 + $0x8] sm:$0xff] }
 0x1ac   : > { %1898 = vst.msk [vmem:[#allocation3 + $0x18] sm:$0xff] %vm1894_vm10, %v1805_v63  ;;  %v1959_v57 = vpack.c.bf16 %v1928_v51, %v1927_v38  ;;  %v1034_v11 = vpop.permute.xlu0 %1033  ;;  %v1929_v60 = vld [vmem:[#allocation3 + $0x10] sm:$0xff] }
 0x1ad   : > { %1272 = vrot.lane.b32.xlu1 %v3496_v5, %s2654_s29  ;;  %1126 = vst.msk [vmem:[#allocation3 + $0x20] sm:$0xff] %vm1121_vm6, %v1034_v11  ;;  %v3606_v11 = vld [vmem:[#allocation2 + $0xca] sm:$0xff] }
 0x1ae   : > { %2574 = vmatprep.mubr.msk.bf16.mxu0 %vm2018_vm11, %v1959_v57  ;;  %1460 = vrot.lane.b32.xlu0 %v2986_v19, %s2655_s30  ;;  %v1374_v19 = vld [vmem:[#allocation2 + $0x168] sm:$0xff] }
 0x1af   : > { %v1837_v59 = vpop.permute.xlu1 %1836  ;;  %v1944_v12 = vld [vmem:[#allocation3 + $0x88] sm:$0xff]  ;;  %v3603_v57 = vld [vmem:[#allocation2 + $0x182] sm:$0xff] }
 0x1b0   : > { %1914 = vst.msk [vmem:[#allocation3 + $0x98] sm:$0xff] %vm1894_vm10, %v1837_v59  ;;  %v1967_v15 = vpack.c.bf16 %v1944_v12, %v1943_v33  ;;  %v1066_v52 = vpop.permute.xlu0 %1065  ;;  %v1945_v8 = vld [vmem:[#allocation3 + $0x90] sm:$0xff] }
 0x1b1   : > { %1430 = vrot.lane.b32.xlu1 %v1357_v58, %s2655_s30  ;;  %1142 = vst.msk [vmem:[#allocation3 + $0xa0] sm:$0xff] %vm1121_vm6, %v1066_v52  ;;  %v1360_v59 = vld [vmem:[#allocation2 + $0xc0] sm:$0xff] }
 0x1b2   : > { %2590 = vmatprep.mubr.msk.bf16.mxu1 %vm2018_vm11, %v1967_v15  ;;  %1432 = vrot.lane.b32.xlu0 %v1358_v6, %s2655_s30  ;;  %v3614_v6 = vld [vmem:[#allocation2 + $0x18a] sm:$0xff] }
 0x1b3   : > { %v1036_v54 = vpop.permute.xlu1 %1035  ;;  %v1930_v7 = vld [vmem:[#allocation3 + $0x18] sm:$0xff] }
 0x1b4   : > { %1127 = vst.msk [vmem:[#allocation3 + $0x28] sm:$0xff] %vm1121_vm6, %v1036_v54  ;;  %v1960_v16 = vpack.c.bf16 %v1930_v7, %v1929_v60  ;;  %v1038_v55 = vpop.permute.xlu0 %1037  ;;  %v1376_v7 = vld [vmem:[#allocation2 + $0x180] sm:$0xff] }
 0x1b5   : > { %1462 = vrot.lane.b32.xlu1 %v2988_v20, %s2655_s30  ;;  %1128 = vst.msk [vmem:[#allocation3 + $0x30] sm:$0xff] %vm1121_vm6, %v1038_v55  ;;  %v1375_v20 = vld [vmem:[#allocation2 + $0x170] sm:$0xff] }
 0x1b6   : > { %2575 = vmatmul.mubr.msk.bf16.vlgmr.msra.gmra.mrb[0].mxu0 %vm2018_vm11, %v1960_v16  ;;  %1464 = vrot.lane.b32.xlu0 %v1374_v19, %s2655_s30 }
 0x1b7   : > { %v1068_v9 = vpop.permute.xlu1 %1067  ;;  %v1946_v10 = vld [vmem:[#allocation3 + $0x98] sm:$0xff] }
 0x1b8   : > { %1143 = vst.msk [vmem:[#allocation3 + $0xa8] sm:$0xff] %vm1121_vm6, %v1068_v9  ;;  %v1968_v31 = vpack.c.bf16 %v1946_v10, %v1945_v8  ;;  %v1070_v49 = vpop.permute.xlu0 %1069  ;;  %v1361_v8 = vld [vmem:[#allocation2 + $0xc8] sm:$0xff]  ;;  %v1362_v10 = vld [vmem:[#allocation2 + $0xd8] sm:$0xff] }
 0x1b9   : > { %1434 = vrot.lane.b32.xlu1 %v1359_v26, %s2655_s30  ;;  %1144 = vst.msk [vmem:[#allocation3 + $0xb0] sm:$0xff] %vm1121_vm6, %v1070_v49 }
 0x1ba   : > { %2591 = vmatmul.mubr.msk.bf16.vlgmr.msra.gmra.mrb[0].mxu1 %vm2018_vm11, %v1968_v31  ;;  %1621 = vrot.lane.b32.xlu0 %v3450_v24, %s2656_s5 }
 0x1bb   : > { %v1040_v30 = vpop.permute.xlu1 %1039 }
 0x1bc   : > { %1129 = vst.msk [vmem:[#allocation3 + $0x38] sm:$0xff] %vm1121_vm6, %v1040_v30  ;;  %v1227_v17 = vpop.permute.xlu0 %1226 }
 0x1bd   : > { %1466 = vrot.lane.b32.xlu1 %v1375_v20, %s2655_s30  ;;  %1319 = vst.msk [vmem:[#allocation3 + $0x20] sm:$0xff] %vm1314_vm7, %v1227_v17  ;;  %v1377_v20 = vld [vmem:[#allocation2 + $0x188] sm:$0xff] }
 0x1be   : > { %1653 = vrot.lane.b32.xlu0 %v3457_v2, %s2656_s5  ;;  %v1745_v2 = vld [vmem:[#allocation2 + $0xb2] sm:$0xff] }
 0x1bf   : > { %v1072_v32 = vpop.permute.xlu1 %1071 }
 0x1c0   : > { %1145 = vst.msk [vmem:[#allocation3 + $0xb8] sm:$0xff] %vm1121_vm6, %v1072_v32  ;;  %v1259_v39 = vpop.permute.xlu0 %1258 }
 0x1c1   : > { %1623 = vrot.lane.b32.xlu1 %v3460_v14, %s2656_s5  ;;  %1335 = vst.msk [vmem:[#allocation3 + $0xa0] sm:$0xff] %vm1314_vm7, %v1259_v39 }
 0x1c2   : > { %1625 = vrot.lane.b32.xlu0 %v1551_v29, %s2656_s5 }
 0x1c3   : > { %v1229_v36 = vpop.permute.xlu1 %1228 }
 0x1c4   : > { %1320 = vst.msk [vmem:[#allocation3 + $0x28] sm:$0xff] %vm1314_vm7, %v1229_v36  ;;  %v1231_v34 = vpop.permute.xlu0 %1230 }
 0x1c5   : > { %1655 = vrot.lane.b32.xlu1 %v3468_v4, %s2656_s5  ;;  %1321 = vst.msk [vmem:[#allocation3 + $0x30] sm:$0xff] %vm1314_vm7, %v1231_v34 }
 0x1c6   : > { %1657 = vrot.lane.b32.xlu0 %v1567_v42, %s2656_s5 }
 0x1c7   : > { %v1261_v47 = vpop.permute.xlu1 %1260 }
 0x1c8   : > { %1336 = vst.msk [vmem:[#allocation3 + $0xa8] sm:$0xff] %vm1314_vm7, %v1261_v47  ;;  %v1263_v37 = vpop.permute.xlu0 %1262 }
 0x1c9   : > { %1627 = vrot.lane.b32.xlu1 %v1552_v28, %s2656_s5  ;;  %1337 = vst.msk [vmem:[#allocation3 + $0xb0] sm:$0xff] %vm1314_vm7, %v1263_v37 }
 0x1ca   : > { %1814 = vrot.lane.b32.xlu0 %v3478_v40, %s2657_s12 }
 0x1cb   : > { %v1233_v61 = vpop.permute.xlu1 %1232 }
 0x1cc   : > { %1322 = vst.msk [vmem:[#allocation3 + $0x38] sm:$0xff] %vm1314_vm7, %v1233_v61  ;;  %v1421_v23 = vpop.permute.xlu0 %1420 }
 0x1cd   : > { %1659 = vrot.lane.b32.xlu1 %v1568_v45, %s2656_s5  ;;  %1513 = vst.msk [vmem:[#allocation3 + $0x20] sm:$0xff] %vm1508_vm8, %v1421_v23 }
 0x1ce   : > { %1846 = vrot.lane.b32.xlu0 %v3485_v35, %s2657_s12  ;;  %v3578_v35 = vld [vmem:[#allocation2 + $0xc9] sm:$0xff] }
 0x1cf   : > { %v1265_v53 = vpop.permute.xlu1 %1264 }
 0x1d0   : > { %1338 = vst.msk [vmem:[#allocation3 + $0xb8] sm:$0xff] %vm1314_vm7, %v1265_v53  ;;  %v1453_v0 = vpop.permute.xlu0 %1452 }
 0x1d1   : > { %1816 = vrot.lane.b32.xlu1 %v3488_v43, %s2657_s12  ;;  %1529 = vst.msk [vmem:[#allocation3 + $0xa0] sm:$0xff] %vm1508_vm8, %v1453_v0 }
 0x1d2   : > { %1818 = vrot.lane.b32.xlu0 %v1744_v50, %s2657_s12 }
 0x1d3   : > { %v1423_v24 = vpop.permute.xlu1 %1422 }
 0x1d4   : > { %1514 = vst.msk [vmem:[#allocation3 + $0x28] sm:$0xff] %vm1508_vm8, %v1423_v24  ;;  %v1425_v62 = vpop.permute.xlu0 %1424 }
 0x1d5   : > { %1848 = vrot.lane.b32.xlu1 %v3496_v5, %s2657_s12  ;;  %1515 = vst.msk [vmem:[#allocation3 + $0x30] sm:$0xff] %vm1508_vm8, %v1425_v62  ;;  %v3596_v5 = vld [vmem:[#allocation2 + $0xc2] sm:$0xff] }
 0x1d6   : > { %1850 = vrot.lane.b32.xlu0 %v1760_v25, %s2657_s12 }
 0x1d7   : > { %v1455_v27 = vpop.permute.xlu1 %1454 }
 0x1d8   : > { %1530 = vst.msk [vmem:[#allocation3 + $0xa8] sm:$0xff] %vm1508_vm8, %v1455_v27  ;;  %v1457_v14 = vpop.permute.xlu0 %1456 }
 0x1d9   : > { %1820 = vrot.lane.b32.xlu1 %v1745_v2, %s2657_s12  ;;  %1531 = vst.msk [vmem:[#allocation3 + $0xb0] sm:$0xff] %vm1508_vm8, %v1457_v14 }
 0x1da   : > { %1049 = vrot.lane.b32.xlu0 %v1551_v29, %s2653_s28  ;;  %v1378_v29 = vld [vmem:[#allocation2 + $0x198] sm:$0xff] }
 0x1db   : > { %v1427_v1 = vpop.permute.xlu1 %1426 }
 0x1dc   : > { %1516 = vst.msk [vmem:[#allocation3 + $0x38] sm:$0xff] %vm1508_vm8, %v1427_v1  ;;  %v1614_v4 = vpop.permute.xlu0 %1613 }
 0x1dd   : > { %1852 = vrot.lane.b32.xlu1 %v1761_v56, %s2657_s12  ;;  %1706 = vst.msk [vmem:[#allocation3 + $0x20] sm:$0xff] %vm1701_vm9, %v1614_v4 }
 0x1de   : > { %1081 = vrot.lane.b32.xlu0 %v1567_v42, %s2653_s28  ;;  %v1363_v42 = vld [vmem:[#allocation2 + $0xe0] sm:$0xff] }
 0x1df   : > { %v1459_v21 = vpop.permute.xlu1 %1458 }
 0x1e0   : > { %1532 = vst.msk [vmem:[#allocation3 + $0xb8] sm:$0xff] %vm1508_vm8, %v1459_v21  ;;  %v1646_v18 = vpop.permute.xlu0 %1645 }
 0x1e1   : > { %1051 = vrot.lane.b32.xlu1 %v1552_v28, %s2653_s28  ;;  %1722 = vst.msk [vmem:[#allocation3 + $0xa0] sm:$0xff] %vm1701_vm9, %v1646_v18 }
 0x1e2   : > { %1053 = vrot.lane.b32.xlu0 %v3568_v13, %s2653_s28 }
 0x1e3   : > { %v1616_v40 = vpop.permute.xlu1 %1615 }
 0x1e4   : > { %1707 = vst.msk [vmem:[#allocation3 + $0x28] sm:$0xff] %vm1701_vm9, %v1616_v40  ;;  %v1618_v3 = vpop.permute.xlu0 %1617 }
 0x1e5   : > { %1083 = vrot.lane.b32.xlu1 %v1568_v45, %s2653_s28  ;;  %1708 = vst.msk [vmem:[#allocation3 + $0x30] sm:$0xff] %vm1701_vm9, %v1618_v3  ;;  %v1379_v45 = vld [vmem:[#allocation2 + $0x1a0] sm:$0xff] }
 0x1e6   : > { %1085 = vrot.lane.b32.xlu0 %v3575_v44, %s2653_s28 }
 0x1e7   : > { %v1648_v41 = vpop.permute.xlu1 %1647 }
 0x1e8   : > { %1723 = vst.msk [vmem:[#allocation3 + $0xa8] sm:$0xff] %vm1701_vm9, %v1648_v41  ;;  %v1650_v43 = vpop.permute.xlu0 %1649 }
 0x1e9   : > { %1055 = vrot.lane.b32.xlu1 %v3578_v35, %s2653_s28  ;;  %1724 = vst.msk [vmem:[#allocation3 + $0xb0] sm:$0xff] %vm1701_vm9, %v1650_v43 }
 0x1ea   : > { %1242 = vrot.lane.b32.xlu0 %v1744_v50, %s2654_s29  ;;  %v1555_v50 = vld [vmem:[#allocation2 + $0xd9] sm:$0xff] }
 0x1eb   : > { %v1620_v46 = vpop.permute.xlu1 %1619 }
 0x1ec   : > { %1709 = vst.msk [vmem:[#allocation3 + $0x38] sm:$0xff] %vm1701_vm9, %v1620_v46  ;;  %v1807_v38 = vpop.permute.xlu0 %1806 }
 0x1ed   : > { %1087 = vrot.lane.b32.xlu1 %v3586_v48, %s2653_s28  ;;  %1899 = vst.msk [vmem:[#allocation3 + $0x20] sm:$0xff] %vm1894_vm10, %v1807_v38 }
 0x1ee   : > { %1274 = vrot.lane.b32.xlu0 %v1760_v25, %s2654_s29  ;;  %v1571_v25 = vld [vmem:[#allocation2 + $0x199] sm:$0xff] }
 0x1ef   : > { %v1652_v22 = vpop.permute.xlu1 %1651 }
 0x1f0   : > { %1725 = vst.msk [vmem:[#allocation3 + $0xb8] sm:$0xff] %vm1701_vm9, %v1652_v22  ;;  %v1839_v63 = vpop.permute.xlu0 %1838 }
 0x1f1   : > { %1244 = vrot.lane.b32.xlu1 %v1745_v2, %s2654_s29  ;;  %1915 = vst.msk [vmem:[#allocation3 + $0xa0] sm:$0xff] %vm1894_vm10, %v1839_v63  ;;  %v1556_v2 = vld [vmem:[#allocation2 + $0xe1] sm:$0xff] }
 0x1f2   : > { %1246 = vrot.lane.b32.xlu0 %v3596_v5, %s2654_s29 }
 0x1f3   : > { %v1809_v51 = vpop.permute.xlu1 %1808 }
 0x1f4   : > { %1900 = vst.msk [vmem:[#allocation3 + $0x28] sm:$0xff] %vm1894_vm10, %v1809_v51  ;;  %v1811_v33 = vpop.permute.xlu0 %1810  ;;  %v1931_v12 = vld [vmem:[#allocation3 + $0x20] sm:$0xff] }
 0x1f5   : > { %1276 = vrot.lane.b32.xlu1 %v1761_v56, %s2654_s29  ;;  %1901 = vst.msk [vmem:[#allocation3 + $0x30] sm:$0xff] %vm1894_vm10, %v1811_v33  ;;  %v1572_v56 = vld [vmem:[#allocation2 + $0x1a1] sm:$0xff] }
 0x1f6   : > { %1278 = vrot.lane.b32.xlu0 %v3603_v57, %s2654_s29 }
 0x1f7   : > { %v1841_v58 = vpop.permute.xlu1 %1840 }
 0x1f8   : > { %1916 = vst.msk [vmem:[#allocation3 + $0xa8] sm:$0xff] %vm1894_vm10, %v1841_v58  ;;  %v1843_v15 = vpop.permute.xlu0 %1842  ;;  %v1947_v16 = vld [vmem:[#allocation3 + $0xa0] sm:$0xff] }
 0x1f9   : > { %1248 = vrot.lane.b32.xlu1 %v3606_v11, %s2654_s29  ;;  %1917 = vst.msk [vmem:[#allocation3 + $0xb0] sm:$0xff] %vm1894_vm10, %v1843_v15 }
 0x1fa   : > { %1436 = vrot.lane.b32.xlu0 %v1360_v59, %s2655_s30 }
 0x1fb   : > { %v1813_v60 = vpop.permute.xlu1 %1812  ;;  %v1932_v52 = vld [vmem:[#allocation3 + $0x28] sm:$0xff] }
 0x1fc   : > { %1902 = vst.msk [vmem:[#allocation3 + $0x38] sm:$0xff] %vm1894_vm10, %v1813_v60  ;;  %v1961_v54 = vpack.c.bf16 %v1932_v52, %v1931_v12  ;;  %v1042_v19 = vpop.permute.xlu0 %1041  ;;  %v1933_v31 = vld [vmem:[#allocation3 + $0x30] sm:$0xff] }
 0x1fd   : > { %1280 = vrot.lane.b32.xlu1 %v3614_v6, %s2654_s29  ;;  %1130 = vst.msk [vmem:[#allocation3 + $0x40] sm:$0xff] %vm1121_vm6, %v1042_v19 }
 0x1fe   : > { %2578 = vmatprep.mubr.msk.bf16.mxu0 %vm2018_vm11, %v1961_v54  ;;  %1468 = vrot.lane.b32.xlu0 %v1376_v7, %s2655_s30 }
 0x1ff   : > { %v1845_v55 = vpop.permute.xlu1 %1844  ;;  %v1948_v26 = vld [vmem:[#allocation3 + $0xa8] sm:$0xff] }
 0x200   : > { %1918 = vst.msk [vmem:[#allocation3 + $0xb8] sm:$0xff] %vm1894_vm10, %v1845_v55  ;;  %v1969_v9 = vpack.c.bf16 %v1948_v26, %v1947_v16  ;;  %v1074_v49 = vpop.permute.xlu0 %1073  ;;  %v1949_v39 = vld [vmem:[#allocation3 + $0xb0] sm:$0xff] }
 0x201   : > { %1438 = vrot.lane.b32.xlu1 %v1361_v8, %s2655_s30  ;;  %1146 = vst.msk [vmem:[#allocation3 + $0xc0] sm:$0xff] %vm1121_vm6, %v1074_v49 }
 0x202   : > { %2594 = vmatprep.mubr.msk.bf16.mxu1 %vm2018_vm11, %v1969_v9  ;;  %1440 = vrot.lane.b32.xlu0 %v1362_v10, %s2655_s30 }
 0x203   : > { %v1044_v30 = vpop.permute.xlu1 %1043  ;;  %v1934_v17 = vld [vmem:[#allocation3 + $0x38] sm:$0xff] }
 0x204   : > { %1131 = vst.msk [vmem:[#allocation3 + $0x48] sm:$0xff] %vm1121_vm6, %v1044_v30  ;;  %v1962_v32 = vpack.c.bf16 %v1934_v17, %v1933_v31  ;;  %v1046_v36 = vpop.permute.xlu0 %1045 }
 0x205   : > { %1470 = vrot.lane.b32.xlu1 %v1377_v20, %s2655_s30  ;;  %1132 = vst.msk [vmem:[#allocation3 + $0x50] sm:$0xff] %vm1121_vm6, %v1046_v36 }
 0x206   : > { %2579 = vmatmul.mubr.msk.bf16.gmra.mrb[4].mxu0 %vm2018_vm11, %v1962_v32  ;;  %1472 = vrot.lane.b32.xlu0 %v1378_v29, %s2655_s30 }
 0x207   : > { %v1076_v34 = vpop.permute.xlu1 %1075  ;;  %v1950_v28 = vld [vmem:[#allocation3 + $0xb8] sm:$0xff] }
 0x208   : > { %1147 = vst.msk [vmem:[#allocation3 + $0xc8] sm:$0xff] %vm1121_vm6, %v1076_v34  ;;  %v1970_v47 = vpack.c.bf16 %v1950_v28, %v1949_v39  ;;  %v1078_v37 = vpop.permute.xlu0 %1077 }
 0x209   : > { %1442 = vrot.lane.b32.xlu1 %v1363_v42, %s2655_s30  ;;  %1148 = vst.msk [vmem:[#allocation3 + $0xd0] sm:$0xff] %vm1121_vm6, %v1078_v37 }
 0x20a   : > { %2595 = vmatmul.mubr.msk.bf16.gmra.mrb[4].mxu1 %vm2018_vm11, %v1970_v47  ;;  %1629 = vrot.lane.b32.xlu0 %v3568_v13, %s2656_s5  ;;  %v1748_v13 = vld [vmem:[#allocation2 + $0xda] sm:$0xff] }
 0x20b   : > { %v1048_v61 = vpop.permute.xlu1 %1047 }
 0x20c   : > { %1133 = vst.msk [vmem:[#allocation3 + $0x58] sm:$0xff] %vm1121_vm6, %v1048_v61  ;;  %v1235_v23 = vpop.permute.xlu0 %1234 }
 0x20d   : > { %1474 = vrot.lane.b32.xlu1 %v1379_v45, %s2655_s30  ;;  %1323 = vst.msk [vmem:[#allocation3 + $0x40] sm:$0xff] %vm1314_vm7, %v1235_v23 }
 0x20e   : > { %1661 = vrot.lane.b32.xlu0 %v3575_v44, %s2656_s5  ;;  %v1764_v44 = vld [vmem:[#allocation2 + $0x19a] sm:$0xff] }
 0x20f   : > { %v1080_v53 = vpop.permute.xlu1 %1079 }
 0x210   : > { %1149 = vst.msk [vmem:[#allocation3 + $0xd8] sm:$0xff] %vm1121_vm6, %v1080_v53  ;;  %v1267_v0 = vpop.permute.xlu0 %1266 }
 0x211   : > { %1631 = vrot.lane.b32.xlu1 %v3578_v35, %s2656_s5  ;;  %1339 = vst.msk [vmem:[#allocation3 + $0xc0] sm:$0xff] %vm1314_vm7, %v1267_v0  ;;  %v1749_v35 = vld [vmem:[#allocation2 + $0xe2] sm:$0xff] }
 0x212   : > { %1633 = vrot.lane.b32.xlu0 %v1555_v50, %s2656_s5 }
 0x213   : > { %v1237_v24 = vpop.permute.xlu1 %1236 }
 0x214   : > { %1324 = vst.msk [vmem:[#allocation3 + $0x48] sm:$0xff] %vm1314_vm7, %v1237_v24  ;;  %v1239_v62 = vpop.permute.xlu0 %1238 }
 0x215   : > { %1663 = vrot.lane.b32.xlu1 %v3586_v48, %s2656_s5  ;;  %1325 = vst.msk [vmem:[#allocation3 + $0x50] sm:$0xff] %vm1314_vm7, %v1239_v62  ;;  %v1765_v48 = vld [vmem:[#allocation2 + $0x1a2] sm:$0xff] }
 0x216   : > { %1665 = vrot.lane.b32.xlu0 %v1571_v25, %s2656_s5 }
 0x217   : > { %v1269_v27 = vpop.permute.xlu1 %1268 }
 0x218   : > { %1340 = vst.msk [vmem:[#allocation3 + $0xc8] sm:$0xff] %vm1314_vm7, %v1269_v27  ;;  %v1271_v14 = vpop.permute.xlu0 %1270 }
 0x219   : > { %1635 = vrot.lane.b32.xlu1 %v1556_v2, %s2656_s5  ;;  %1341 = vst.msk [vmem:[#allocation3 + $0xd0] sm:$0xff] %vm1314_vm7, %v1271_v14 }
 0x21a   : > { %1822 = vrot.lane.b32.xlu0 %v3596_v5, %s2657_s12 }
 0x21b   : > { %v1241_v1 = vpop.permute.xlu1 %1240 }
 0x21c   : > { %1326 = vst.msk [vmem:[#allocation3 + $0x58] sm:$0xff] %vm1314_vm7, %v1241_v1  ;;  %v1429_v4 = vpop.permute.xlu0 %1428 }
 0x21d   : > { %1667 = vrot.lane.b32.xlu1 %v1572_v56, %s2656_s5  ;;  %1517 = vst.msk [vmem:[#allocation3 + $0x40] sm:$0xff] %vm1508_vm8, %v1429_v4 }
 0x21e   : > { %1854 = vrot.lane.b32.xlu0 %v3603_v57, %s2657_s12 }
 0x21f   : > { %v1273_v21 = vpop.permute.xlu1 %1272 }
 0x220   : > { %1342 = vst.msk [vmem:[#allocation3 + $0xd8] sm:$0xff] %vm1314_vm7, %v1273_v21  ;;  %v1461_v18 = vpop.permute.xlu0 %1460 }
 0x221   : > { %1824 = vrot.lane.b32.xlu1 %v3606_v11, %s2657_s12  ;;  %1533 = vst.msk [vmem:[#allocation3 + $0xc0] sm:$0xff] %vm1508_vm8, %v1461_v18 }
 0x222   : > { %1826 = vrot.lane.b32.xlu0 %v1748_v13, %s2657_s12 }
 0x223   : > { %v1431_v40 = vpop.permute.xlu1 %1430 }
 0x224   : > { %1518 = vst.msk [vmem:[#allocation3 + $0x48] sm:$0xff] %vm1508_vm8, %v1431_v40  ;;  %v1433_v3 = vpop.permute.xlu0 %1432 }
 0x225   : > { %1856 = vrot.lane.b32.xlu1 %v3614_v6, %s2657_s12  ;;  %1519 = vst.msk [vmem:[#allocation3 + $0x50] sm:$0xff] %vm1508_vm8, %v1433_v3  ;;  %v3732_v3 = vld [vmem:[%s4126_s2] ss:$0 sm:$0xff] }
 0x226   : > { %1858 = vrot.lane.b32.xlu0 %v1764_v44, %s2657_s12 }
 0x227   : > { %v1463_v41 = vpop.permute.xlu1 %1462 }
 0x228   : > { %1534 = vst.msk [vmem:[#allocation3 + $0xc8] sm:$0xff] %vm1508_vm8, %v1463_v41  ;;  %v1465_v43 = vpop.permute.xlu0 %1464 }
 0x229   : > { %1828 = vrot.lane.b32.xlu1 %v1749_v35, %s2657_s12  ;;  %1535 = vst.msk [vmem:[#allocation3 + $0xd0] sm:$0xff] %vm1508_vm8, %v1465_v43 }
 0x22b   : > { %v1435_v46 = vpop.permute.xlu1 %1434 }
 0x22c   : > { %1520 = vst.msk [vmem:[#allocation3 + $0x58] sm:$0xff] %vm1508_vm8, %v1435_v46  ;;  %v1622_v38 = vpop.permute.xlu0 %1621 }
 0x22d   : > { %1860 = vrot.lane.b32.xlu1 %v1765_v48, %s2657_s12  ;;  %1710 = vst.msk [vmem:[#allocation3 + $0x40] sm:$0xff] %vm1701_vm9, %v1622_v38 }
 0x22f   : > { %v1467_v22 = vpop.permute.xlu1 %1466 }
 0x230   : > { %1536 = vst.msk [vmem:[#allocation3 + $0xd8] sm:$0xff] %vm1508_vm8, %v1467_v22  ;;  %v1654_v5 = vpop.permute.xlu0 %1653 }
 0x231   : > { %1726 = vst.msk [vmem:[#allocation3 + $0xc0] sm:$0xff] %vm1701_vm9, %v1654_v5 }
 0x233   : > { %v1624_v63 = vpop.permute.xlu1 %1623 }
 0x234   : > { %1711 = vst.msk [vmem:[#allocation3 + $0x48] sm:$0xff] %vm1701_vm9, %v1624_v63  ;;  %v1626_v51 = vpop.permute.xlu0 %1625 }
 0x235   : > { %1712 = vst.msk [vmem:[#allocation3 + $0x50] sm:$0xff] %vm1701_vm9, %v1626_v51 }
 0x237   : > { %v1656_v57 = vpop.permute.xlu1 %1655 }
 0x238   : > { %1727 = vst.msk [vmem:[#allocation3 + $0xc8] sm:$0xff] %vm1701_vm9, %v1656_v57  ;;  %v1658_v33 = vpop.permute.xlu0 %1657 }
 0x239   : > { %1728 = vst.msk [vmem:[#allocation3 + $0xd0] sm:$0xff] %vm1701_vm9, %v1658_v33 }
 0x23b   : > { %v1628_v11 = vpop.permute.xlu1 %1627 }
 0x23c   : > { %1713 = vst.msk [vmem:[#allocation3 + $0x58] sm:$0xff] %vm1701_vm9, %v1628_v11  ;;  %v1815_v58 = vpop.permute.xlu0 %1814 }
 0x23d   : > { %1903 = vst.msk [vmem:[#allocation3 + $0x40] sm:$0xff] %vm1894_vm10, %v1815_v58 }
 0x23f   : > { %v1660_v59 = vpop.permute.xlu1 %1659 }
 0x240   : > { %1729 = vst.msk [vmem:[#allocation3 + $0xd8] sm:$0xff] %vm1701_vm9, %v1660_v59  ;;  %v1847_v12 = vpop.permute.xlu0 %1846 }
 0x241   : > { %1919 = vst.msk [vmem:[#allocation3 + $0xc0] sm:$0xff] %vm1894_vm10, %v1847_v12 }
 0x243   : > { %v1817_v15 = vpop.permute.xlu1 %1816 }
 0x244   : > { %1904 = vst.msk [vmem:[#allocation3 + $0x48] sm:$0xff] %vm1894_vm10, %v1817_v15  ;;  %v1819_v6 = vpop.permute.xlu0 %1818  ;;  %v1935_v52 = vld [vmem:[#allocation3 + $0x40] sm:$0xff] }
 0x245   : > { %1905 = vst.msk [vmem:[#allocation3 + $0x50] sm:$0xff] %vm1894_vm10, %v1819_v6 }
 0x247   : > { %v1849_v60 = vpop.permute.xlu1 %1848 }
 0x248   : > { %1920 = vst.msk [vmem:[#allocation3 + $0xc8] sm:$0xff] %vm1894_vm10, %v1849_v60  ;;  %v1851_v54 = vpop.permute.xlu0 %1850  ;;  %v1951_v8 = vld [vmem:[#allocation3 + $0xc0] sm:$0xff] }
 0x249   : > { %1921 = vst.msk [vmem:[#allocation3 + $0xd0] sm:$0xff] %vm1894_vm10, %v1851_v54 }
 0x24b   : > { %v1821_v7 = vpop.permute.xlu1 %1820  ;;  %v1936_v16 = vld [vmem:[#allocation3 + $0x48] sm:$0xff] }
 0x24c   : > { %1906 = vst.msk [vmem:[#allocation3 + $0x58] sm:$0xff] %vm1894_vm10, %v1821_v7  ;;  %v1963_v19 = vpack.c.bf16 %v1936_v16, %v1935_v52  ;;  %v1050_v55 = vpop.permute.xlu0 %1049  ;;  %v1937_v31 = vld [vmem:[#allocation3 + $0x50] sm:$0xff] }
 0x24d   : > { %1134 = vst.msk [vmem:[#allocation3 + $0x60] sm:$0xff] %vm1121_vm6, %v1050_v55 }
 0x24e   : > { %2582 = vmatprep.mubr.msk.bf16.mxu0 %vm2018_vm11, %v1963_v19 }
 0x24f   : > { %v1853_v26 = vpop.permute.xlu1 %1852  ;;  %v1952_v9 = vld [vmem:[#allocation3 + $0xc8] sm:$0xff] }
 0x250   : > { %1922 = vst.msk [vmem:[#allocation3 + $0xd8] sm:$0xff] %vm1894_vm10, %v1853_v26  ;;  %v1971_v10 = vpack.c.bf16 %v1952_v9, %v1951_v8  ;;  %v1082_v49 = vpop.permute.xlu0 %1081  ;;  %v1953_v32 = vld [vmem:[#allocation3 + $0xd0] sm:$0xff] }
 0x251   : > { %1150 = vst.msk [vmem:[#allocation3 + $0xe0] sm:$0xff] %vm1121_vm6, %v1082_v49 }
 0x252   : > { %2598 = vmatprep.mubr.msk.bf16.mxu1 %vm2018_vm11, %v1971_v10 }
 0x253   : > { %v1052_v20 = vpop.permute.xlu1 %1051  ;;  %v1938_v30 = vld [vmem:[#allocation3 + $0x58] sm:$0xff] }
 0x254   : > { %1135 = vst.msk [vmem:[#allocation3 + $0x68] sm:$0xff] %vm1121_vm6, %v1052_v20  ;;  %v1964_v17 = vpack.c.bf16 %v1938_v30, %v1937_v31  ;;  %v1054_v29 = vpop.permute.xlu0 %1053 }
 0x255   : > { %1136 = vst.msk [vmem:[#allocation3 + $0x70] sm:$0xff] %vm1121_vm6, %v1054_v29 }
 0x256   : > { %2583 = vmatmul.mubr.msk.bf16.gmra.mrb[8].mxu0 %vm2018_vm11, %v1964_v17 }
 0x257   : > { %v1084_v39 = vpop.permute.xlu1 %1083  ;;  %v1954_v36 = vld [vmem:[#allocation3 + $0xd8] sm:$0xff] }
 0x258   : > { %1151 = vst.msk [vmem:[#allocation3 + $0xe8] sm:$0xff] %vm1121_vm6, %v1084_v39  ;;  %v1972_v42 = vpack.c.bf16 %v1954_v36, %v1953_v32  ;;  %v1086_v34 = vpop.permute.xlu0 %1085 }
 0x259   : > { %1152 = vst.msk [vmem:[#allocation3 + $0xf0] sm:$0xff] %vm1121_vm6, %v1086_v34 }
 0x25a   : > { %2599 = vmatmul.mubr.msk.bf16.gmra.mrb[8].mxu1 %vm2018_vm11, %v1972_v42 }
 0x25b   : > { %v1056_v28 = vpop.permute.xlu1 %1055 }
 0x25c   : > { %1137 = vst.msk [vmem:[#allocation3 + $0x78] sm:$0xff] %vm1121_vm6, %v1056_v28  ;;  %v1243_v47 = vpop.permute.xlu0 %1242 }
 0x25d   : > { %1327 = vst.msk [vmem:[#allocation3 + $0x60] sm:$0xff] %vm1314_vm7, %v1243_v47 }
 0x25f   : > { %v1088_v37 = vpop.permute.xlu1 %1087 }
 0x260   : > { %1153 = vst.msk [vmem:[#allocation3 + $0xf8] sm:$0xff] %vm1121_vm6, %v1088_v37  ;;  %v1275_v45 = vpop.permute.xlu0 %1274 }
 0x261   : > { %1343 = vst.msk [vmem:[#allocation3 + $0xe0] sm:$0xff] %vm1314_vm7, %v1275_v45 }
 0x263   : > { %v1245_v61 = vpop.permute.xlu1 %1244 }
 0x264   : > { %1328 = vst.msk [vmem:[#allocation3 + $0x68] sm:$0xff] %vm1314_vm7, %v1245_v61  ;;  %v1247_v23 = vpop.permute.xlu0 %1246 }
 0x265   : > { %1329 = vst.msk [vmem:[#allocation3 + $0x70] sm:$0xff] %vm1314_vm7, %v1247_v23 }
 0x267   : > { %v1277_v53 = vpop.permute.xlu1 %1276 }
 0x268   : > { %1344 = vst.msk [vmem:[#allocation3 + $0xe8] sm:$0xff] %vm1314_vm7, %v1277_v53  ;;  %v1279_v50 = vpop.permute.xlu0 %1278 }
 0x269   : > { %1345 = vst.msk [vmem:[#allocation3 + $0xf0] sm:$0xff] %vm1314_vm7, %v1279_v50 }
 0x26b   : > { %v1249_v0 = vpop.permute.xlu1 %1248 }
 0x26c   : > { %1330 = vst.msk [vmem:[#allocation3 + $0x78] sm:$0xff] %vm1314_vm7, %v1249_v0  ;;  %v1437_v24 = vpop.permute.xlu0 %1436 }
 0x26d   : > { %1521 = vst.msk [vmem:[#allocation3 + $0x60] sm:$0xff] %vm1508_vm8, %v1437_v24 }
 0x26f   : > { %v1281_v25 = vpop.permute.xlu1 %1280 }
 0x270   : > { %1346 = vst.msk [vmem:[#allocation3 + $0xf8] sm:$0xff] %vm1314_vm7, %v1281_v25  ;;  %v1469_v62 = vpop.permute.xlu0 %1468 }
 0x271   : > { %1537 = vst.msk [vmem:[#allocation3 + $0xe0] sm:$0xff] %vm1508_vm8, %v1469_v62 }
 0x273   : > { %v1439_v2 = vpop.permute.xlu1 %1438 }
 0x274   : > { %1522 = vst.msk [vmem:[#allocation3 + $0x68] sm:$0xff] %vm1508_vm8, %v1439_v2  ;;  %v1441_v27 = vpop.permute.xlu0 %1440 }
 0x275   : > { %1523 = vst.msk [vmem:[#allocation3 + $0x70] sm:$0xff] %vm1508_vm8, %v1441_v27 }
 0x277   : > { %v1471_v14 = vpop.permute.xlu1 %1470 }
 0x278   : > { %1538 = vst.msk [vmem:[#allocation3 + $0xe8] sm:$0xff] %vm1508_vm8, %v1471_v14  ;;  %v1473_v56 = vpop.permute.xlu0 %1472 }
 0x279   : > { %1539 = vst.msk [vmem:[#allocation3 + $0xf0] sm:$0xff] %vm1508_vm8, %v1473_v56 }
 0x27b   : > { %v1443_v1 = vpop.permute.xlu1 %1442 }
 0x27c   : > { %1524 = vst.msk [vmem:[#allocation3 + $0x78] sm:$0xff] %vm1508_vm8, %v1443_v1  ;;  %v1630_v4 = vpop.permute.xlu0 %1629 }
 0x27d   : > { %1714 = vst.msk [vmem:[#allocation3 + $0x60] sm:$0xff] %vm1701_vm9, %v1630_v4 }
 0x27f   : > { %v1475_v21 = vpop.permute.xlu1 %1474 }
 0x280   : > { %1540 = vst.msk [vmem:[#allocation3 + $0xf8] sm:$0xff] %vm1508_vm8, %v1475_v21  ;;  %v1662_v13 = vpop.permute.xlu0 %1661 }
 0x281   : > { %1730 = vst.msk [vmem:[#allocation3 + $0xe0] sm:$0xff] %vm1701_vm9, %v1662_v13 }
 0x283   : > { %v1632_v18 = vpop.permute.xlu1 %1631 }
 0x284   : > { %1715 = vst.msk [vmem:[#allocation3 + $0x68] sm:$0xff] %vm1701_vm9, %v1632_v18  ;;  %v1634_v40 = vpop.permute.xlu0 %1633 }
 0x285   : > { %1716 = vst.msk [vmem:[#allocation3 + $0x70] sm:$0xff] %vm1701_vm9, %v1634_v40 }
 0x287   : > { %v1664_v44 = vpop.permute.xlu1 %1663 }
 0x288   : > { %1731 = vst.msk [vmem:[#allocation3 + $0xe8] sm:$0xff] %vm1701_vm9, %v1664_v44  ;;  %v1666_v41 = vpop.permute.xlu0 %1665 }
 0x289   : > { %v2576_v35 = vpop.f32.mrb[0].mxu0  ;;  %1732 = vst.msk [vmem:[#allocation3 + $0xf0] sm:$0xff] %vm1701_vm9, %v1666_v41 }
 0x28a   : > { %v3736_v43 = vadd.f32 %v2576_v35, %v3732_v3  ;;  %v2105_v48 = vpop.f32.mrb[1].mxu0 }
 0x28b   : > { %v3740_v46 = vadd.f32 %v3732_v3, %v2105_v48  ;;  %v1636_v38 = vpop.permute.xlu1 %1635  ;;  %v2577_v22 = vpop.f32.mrb[2].mxu0 }
 0x28c   : > { %1717 = vst.msk [vmem:[#allocation3 + $0x78] sm:$0xff] %vm1701_vm9, %v1636_v38  ;;  %v3744_v5 = vadd.f32 %v2577_v22, %v3732_v3  ;;  %v2108_v63 = vpop.f32.mrb[3].mxu0  ;;  %v1823_v33 = vpop.permute.xlu0 %1822 }
 0x28d   : > { %v3747_v51 = vadd.f32 %v3732_v3, %v2108_v63  ;;  %v2592_v57 = vpop.f32.mrb[0].mxu1  ;;  %1907 = vst.msk [vmem:[#allocation3 + $0x60] sm:$0xff] %vm1894_vm10, %v1823_v33 }
 0x28e   : > { %v3750_v11 = vadd.f32 %v2592_v57, %v3732_v3  ;;  %v2169_v58 = vpop.f32.mrb[1].mxu1 }
 0x28f   : > { %v3754_v59 = vadd.f32 %v3732_v3, %v2169_v58  ;;  %v2593_v12 = vpop.f32.mrb[2].mxu1  ;;  %v1668_v15 = vpop.permute.xlu1 %1667 }
 0x290   : > { %v3757_v6 = vadd.f32 %v2593_v12, %v3732_v3  ;;  %1733 = vst.msk [vmem:[#allocation3 + $0xf8] sm:$0xff] %vm1701_vm9, %v1668_v15  ;;  %v2172_v60 = vpop.f32.mrb[3].mxu1  ;;  %v1855_v54 = vpop.permute.xlu0 %1854 }
 0x291   : > { %v3761_v52 = vadd.f32 %v3732_v3, %v2172_v60  ;;  %1923 = vst.msk [vmem:[#allocation3 + $0xe0] sm:$0xff] %vm1894_vm10, %v1855_v54 }
 0x293   : > { %v1825_v7 = vpop.permute.xlu1 %1824 }
 0x294   : > { %1908 = vst.msk [vmem:[#allocation3 + $0x68] sm:$0xff] %vm1894_vm10, %v1825_v7  ;;  %v1827_v16 = vpop.permute.xlu0 %1826  ;;  %v1939_v8 = vld [vmem:[#allocation3 + $0x60] sm:$0xff] }
 0x295   : > { %1909 = vst.msk [vmem:[#allocation3 + $0x70] sm:$0xff] %vm1894_vm10, %v1827_v16 }
 0x297   : > { %v1857_v19 = vpop.permute.xlu1 %1856 }
 0x298   : > { %1924 = vst.msk [vmem:[#allocation3 + $0xe8] sm:$0xff] %vm1894_vm10, %v1857_v19  ;;  %v1859_v55 = vpop.permute.xlu0 %1858  ;;  %v1955_v31 = vld [vmem:[#allocation3 + $0xe0] sm:$0xff] }
 0x299   : > { %1925 = vst.msk [vmem:[#allocation3 + $0xf0] sm:$0xff] %vm1894_vm10, %v1859_v55 }
 0x29b   : > { %v1829_v26 = vpop.permute.xlu1 %1828  ;;  %v1940_v9 = vld [vmem:[#allocation3 + $0x68] sm:$0xff] }
 0x29c   : > { %1910 = vst.msk [vmem:[#allocation3 + $0x78] sm:$0xff] %vm1894_vm10, %v1829_v26  ;;  %v1965_v10 = vpack.c.bf16 %v1940_v9, %v1939_v8  ;;  %v1941_v17 = vld [vmem:[#allocation3 + $0x70] sm:$0xff] }
 0x29e   : > { %2586 = vmatprep.mubr.msk.bf16.mxu0 %vm2018_vm11, %v1965_v10 }
 0x29f   : > { %v1861_v49 = vpop.permute.xlu1 %1860  ;;  %v1956_v20 = vld [vmem:[#allocation3 + $0xe8] sm:$0xff] }
 0x2a0   : > { %1926 = vst.msk [vmem:[#allocation3 + $0xf8] sm:$0xff] %vm1894_vm10, %v1861_v49  ;;  %v1973_v30 = vpack.c.bf16 %v1956_v20, %v1955_v31  ;;  %v1957_v39 = vld [vmem:[#allocation3 + $0xf0] sm:$0xff] }
 0x2a2   : > { %2602 = vmatprep.mubr.msk.bf16.mxu1 %vm2018_vm11, %v1973_v30  ;;  %v2658_v30 = vmov (!%p2538_p4), 0.0  }
 0x2a3   : > { %v1942_v32 = vld [vmem:[#allocation3 + $0x78] sm:$0xff]  ;;  %2236 = vst.msk [vmem:[%s4128_s4] sm:$0x3] (!%p2538_p4), %vm200_vm1, %v2658_v30 }
 0x2a4   : > { %v1966_v29 = vpack.c.bf16 %v1942_v32, %v1941_v17 }
 0x2a6   : > { %2587 = vmatmul.mubr.msk.bf16.gmra.mrb[12].mxu0 %vm2018_vm11, %v1966_v29 }
 0x2a7   : > { %v1958_v36 = vld [vmem:[#allocation3 + $0xf8] sm:$0xff] }
 0x2a8   : > { %v1974_v42 = vpack.c.bf16 %v1958_v36, %v1957_v39 }
 0x2aa   : > { %2603 = vmatmul.mubr.msk.bf16.gmra.mrb[12].mxu1 %vm2018_vm11, %v1974_v42 }
 0x2d9   : > { %v2580_v34 = vpop.f32.mrb[4].mxu0 }
 0x2da   : > { %v3775_v28 = vadd.f32 %v2580_v34, %v3732_v3  ;;  %v2121_v47 = vpop.f32.mrb[5].mxu0 }
 0x2db   : > { %v3778_v37 = vadd.f32 %v3732_v3, %v2121_v47  ;;  %v2581_v45 = vpop.f32.mrb[6].mxu0 }
 0x2dc   : > { %v3781_v61 = vadd.f32 %v2581_v45, %v3732_v3  ;;  %v2124_v23 = vpop.f32.mrb[7].mxu0 }
 0x2dd   : > { %v3784_v53 = vadd.f32 %v3732_v3, %v2124_v23  ;;  %v2596_v50 = vpop.f32.mrb[4].mxu1 }
 0x2de   : > { %v3787_v0 = vadd.f32 %v2596_v50, %v3732_v3  ;;  %v2185_v24 = vpop.f32.mrb[5].mxu1 }
 0x2df   : > { %v3790_v25 = vadd.f32 %v3732_v3, %v2185_v24  ;;  %v2597_v62 = vpop.f32.mrb[6].mxu1 }
 0x2e0   : > { %v3793_v2 = vadd.f32 %v2597_v62, %v3732_v3  ;;  %v2188_v27 = vpop.f32.mrb[7].mxu1 }
 0x2e1   : > { %v3796_v14 = vadd.f32 %v3732_v3, %v2188_v27 }
 0x329   : > { %v2584_v56 = vpop.f32.mrb[8].mxu0 }
 0x32a   : > { %v3799_v1 = vadd.f32 %v2584_v56, %v3732_v3  ;;  %v2137_v4 = vpop.f32.mrb[9].mxu0 }
 0x32b   : > { %v3802_v21 = vadd.f32 %v3732_v3, %v2137_v4  ;;  %v2585_v13 = vpop.f32.mrb[10].mxu0 }
 0x32c   : > { %v3805_v18 = vadd.f32 %v2585_v13, %v3732_v3  ;;  %v2140_v40 = vpop.f32.mrb[11].mxu0 }
 0x32d   : > { %v3808_v44 = vadd.f32 %v3732_v3, %v2140_v40  ;;  %v2600_v35 = vpop.f32.mrb[8].mxu1 }
 0x32e   : > { %v3811_v41 = vadd.f32 %v2600_v35, %v3732_v3  ;;  %v2201_v48 = vpop.f32.mrb[9].mxu1 }
 0x32f   : > { %v3814_v38 = vadd.f32 %v3732_v3, %v2201_v48  ;;  %v2601_v22 = vpop.f32.mrb[10].mxu1 }
 0x330   : > { %v3817_v63 = vadd.f32 %v2601_v22, %v3732_v3  ;;  %v2204_v57 = vpop.f32.mrb[11].mxu1 }
 0x331   : > { %v3820_v33 = vadd.f32 %v3732_v3, %v2204_v57 }
 0x379   : > { %v2588_v58 = vpop.f32.mrb[12].mxu0 }
 0x37a   : > { %v3823_v12 = vadd.f32 %v2588_v58, %v3732_v3  ;;  %v2153_v15 = vpop.f32.mrb[13].mxu0 }
 0x37b   : > { %v3826_v60 = vadd.f32 %v3732_v3, %v2153_v15  ;;  %v2589_v54 = vpop.f32.mrb[14].mxu0  ;;  %2235 = sbr.rel (%p2538_p4) target bundleno = 898 (0x382), region = 36 }
 0x37c   : > { %v3829_v7 = vadd.f32 %v2589_v54, %v3732_v3  ;;  %v2156_v16 = vpop.f32.mrb[15].mxu0 }
 0x37d   : > { %v3832_v19 = vadd.f32 %v3732_v3, %v2156_v16  ;;  %v2604_v8 = vpop.f32.mrb[12].mxu1 }
 0x37e   : > { %v3835_v55 = vadd.f32 %v2604_v8, %v3732_v3  ;;  %v2217_v26 = vpop.f32.mrb[13].mxu1 }
 0x37f   : > { %v3838_v9 = vadd.f32 %v3732_v3, %v2217_v26  ;;  %v2605_v10 = vpop.f32.mrb[14].mxu1 }
 0x380   : > { %v3841_v31 = vadd.f32 %v2605_v10, %v3732_v3  ;;  %v2220_v49 = vpop.f32.mrb[15].mxu1 }
 0x381   : > { %v3844_v20 = vadd.f32 %v3732_v3, %v2220_v49 }
 0x382 PF: > { %v2238_v3 = vsel %vm197_vm0, %v3740_v46, 0.0  ;;  %v2239_v17 = vsel %vm197_vm0, %v3747_v51, 0.0  ;;  %v2241_v32 = vsel %vm197_vm0, %v3736_v43, 0.0  ;;  %2414 = vst.msk [vmem:[%s2760_s24] sm:$0xff] %vm197_vm0, %v3740_v46  ;;  %2415 = vst.msk [vmem:[%s2760_s24 + $0x8] sm:$0xff] %vm197_vm0, %v3747_v51  ;;  %v2243_v39 = vsel %vm197_vm0, %v3744_v5, 0.0 }
 0x383   : > { %2416 = vst.msk [vmem:[%s2760_s24 + $0x10] sm:$0xff] %vm197_vm0, %v3736_v43  ;;  %2417 = vst.msk [vmem:[%s2760_s24 + $0x18] sm:$0xff] %vm197_vm0, %v3744_v5  ;;  %v2240_v29 = vadd.f32 %v2239_v17, %v2238_v3  ;;  %v2245_v42 = vsel %vm197_vm0, %v3778_v37, 0.0  ;;  %v2247_v47 = vsel %vm197_vm0, %v3784_v53, 0.0  ;;  %v2249_v23 = vsel %vm197_vm0, %v3775_v28, 0.0 }
 0x384   : > { %2418 = vst.msk [vmem:[%s2760_s24 + $0x20] sm:$0xff] %vm197_vm0, %v3778_v37  ;;  %2419 = vst.msk [vmem:[%s2760_s24 + $0x28] sm:$0xff] %vm197_vm0, %v3784_v53  ;;  %v2251_v24 = vsel %vm197_vm0, %v3781_v61, 0.0  ;;  %v2253_v27 = vsel %vm197_vm0, %v3802_v21, 0.0  ;;  %v2255_v4 = vsel %vm197_vm0, %v3808_v44, 0.0  ;;  %v2311_v13 = vmul.f32 %v3740_v46, %v3740_v46 }
 0x385   : > { %2420 = vst.msk [vmem:[%s2760_s24 + $0x30] sm:$0xff] %vm197_vm0, %v3775_v28  ;;  %2421 = vst.msk [vmem:[%s2760_s24 + $0x38] sm:$0xff] %vm197_vm0, %v3781_v61  ;;  %v2242_v36 = vadd.f32 %v2241_v32, %v2240_v29  ;;  %v2312_v40 = vmul.f32 %v3747_v51, %v3747_v51  ;;  %v2313_v48 = vmul.f32 %v3736_v43, %v3736_v43  ;;  %v2257_v22 = vsel %vm197_vm0, %v3799_v1, 0.0 }
 0x386   : > { %2422 = vst.msk [vmem:[%s2760_s24 + $0x40] sm:$0xff] %vm197_vm0, %v3802_v21  ;;  %2423 = vst.msk [vmem:[%s2760_s24 + $0x48] sm:$0xff] %vm197_vm0, %v3808_v44  ;;  %v2314_v57 = vmul.f32 %v3744_v5, %v3744_v5  ;;  %v2259_v15 = vsel %vm197_vm0, %v3805_v18, 0.0  ;;  %v2315_v46 = vmul.f32 %v3778_v37, %v3778_v37  ;;  %v2343_v54 = vsel %vm197_vm0, %v2311_v13, 0.0 }
 0x387   : > { %2424 = vst.msk [vmem:[%s2760_s24 + $0x50] sm:$0xff] %vm197_vm0, %v3799_v1  ;;  %2425 = vst.msk [vmem:[%s2760_s24 + $0x58] sm:$0xff] %vm197_vm0, %v3805_v18  ;;  %v2244_v34 = vadd.f32 %v2243_v39, %v2242_v36  ;;  %v2344_v51 = vsel %vm197_vm0, %v2312_v40, 0.0  ;;  %v2346_v43 = vsel %vm197_vm0, %v2313_v48, 0.0  ;;  %v2261_v26 = vsel %vm197_vm0, %v3826_v60, 0.0 }
 0x388   : > { %2426 = vst.msk [vmem:[%s2760_s24 + $0x60] sm:$0xff] %vm197_vm0, %v3826_v60  ;;  %2427 = vst.msk [vmem:[%s2760_s24 + $0x68] sm:$0xff] %vm197_vm0, %v3832_v19  ;;  %v2345_v8 = vadd.f32 %v2344_v51, %v2343_v54  ;;  %v2316_v5 = vmul.f32 %v3784_v53, %v3784_v53  ;;  %v2348_v10 = vsel %vm197_vm0, %v2314_v57, 0.0  ;;  %v2263_v37 = vsel %vm197_vm0, %v3832_v19, 0.0 }
 0x389   : > { %2428 = vst.msk [vmem:[%s2760_s24 + $0x70] sm:$0xff] %vm197_vm0, %v3823_v12  ;;  %2429 = vst.msk [vmem:[%s2760_s24 + $0x78] sm:$0xff] %vm197_vm0, %v3829_v7  ;;  %v2246_v45 = vadd.f32 %v2245_v42, %v2244_v34  ;;  %v2317_v3 = vmul.f32 %v3775_v28, %v3775_v28  ;;  %v2350_v17 = vsel %vm197_vm0, %v2315_v46, 0.0  ;;  %v2265_v39 = vsel %vm197_vm0, %v3823_v12, 0.0 }
 0x38a   : > { %2430 = vst.msk [vmem:[%s2760_s24 + $0x80] sm:$0xff] %vm197_vm0, %v3754_v59  ;;  %2431 = vst.msk [vmem:[%s2760_s24 + $0x88] sm:$0xff] %vm197_vm0, %v3761_v52  ;;  %v2347_v30 = vadd.f32 %v2346_v43, %v2345_v8  ;;  %v2318_v53 = vmul.f32 %v3781_v61, %v3781_v61  ;;  %v2352_v36 = vsel %vm197_vm0, %v2316_v5, 0.0  ;;  %v2319_v28 = vmul.f32 %v3802_v21, %v3802_v21 }
 0x38b   : > { %2432 = vst.msk [vmem:[%s2760_s24 + $0x90] sm:$0xff] %vm197_vm0, %v3750_v11  ;;  %2433 = vst.msk [vmem:[%s2760_s24 + $0x98] sm:$0xff] %vm197_vm0, %v3757_v6  ;;  %v2248_v50 = vadd.f32 %v2247_v47, %v2246_v45  ;;  %v2267_v47 = vsel %vm197_vm0, %v3829_v7, 0.0  ;;  %v2354_v45 = vsel %vm197_vm0, %v2317_v3, 0.0  ;;  %v2320_v61 = vmul.f32 %v3808_v44, %v3808_v44 }
 0x38c   : > { %2434 = vst.msk [vmem:[%s2760_s24 + $0xa0] sm:$0xff] %vm197_vm0, %v3790_v25  ;;  %2435 = vst.msk [vmem:[%s2760_s24 + $0xa8] sm:$0xff] %vm197_vm0, %v3796_v14  ;;  %v2349_v29 = vadd.f32 %v2348_v10, %v2347_v30  ;;  %v2321_v21 = vmul.f32 %v3799_v1, %v3799_v1  ;;  %v2358_v13 = vsel %vm197_vm0, %v2319_v28, 0.0  ;;  %v2273_v48 = vsel %vm197_vm0, %v3750_v11, 0.0 }
 0x38d   : > { %2436 = vst.msk [vmem:[%s2760_s24 + $0xb0] sm:$0xff] %vm197_vm0, %v3787_v0  ;;  %2437 = vst.msk [vmem:[%s2760_s24 + $0xb8] sm:$0xff] %vm197_vm0, %v3793_v2  ;;  %v2250_v62 = vadd.f32 %v2249_v23, %v2248_v50  ;;  %v2322_v44 = vmul.f32 %v3805_v18, %v3805_v18  ;;  %v2323_v1 = vmul.f32 %v3826_v60, %v3826_v60  ;;  %v2279_v5 = vsel %vm197_vm0, %v3796_v14, 0.0 }
 0x38e   : > { %2438 = vst.msk [vmem:[%s2760_s24 + $0xc0] sm:$0xff] %vm197_vm0, %v3814_v38  ;;  %2439 = vst.msk [vmem:[%s2760_s24 + $0xc8] sm:$0xff] %vm197_vm0, %v3820_v33  ;;  %v2351_v34 = vadd.f32 %v2350_v17, %v2349_v29  ;;  %v2362_v46 = vsel %vm197_vm0, %v2321_v21, 0.0  ;;  %v2324_v18 = vmul.f32 %v3832_v19, %v3832_v19  ;;  %v2325_v60 = vmul.f32 %v3823_v12, %v3823_v12 }
 0x38f   : > { %2440 = vst.msk [vmem:[%s2760_s24 + $0xd0] sm:$0xff] %vm197_vm0, %v3811_v41  ;;  %2441 = vst.msk [vmem:[%s2760_s24 + $0xd8] sm:$0xff] %vm197_vm0, %v3817_v63  ;;  %v2252_v56 = vadd.f32 %v2251_v24, %v2250_v62  ;;  %v2269_v24 = vsel %vm197_vm0, %v3754_v59, 0.0  ;;  %v2356_v62 = vsel %vm197_vm0, %v2318_v53, 0.0  ;;  %v2364_v8 = vsel %vm197_vm0, %v2322_v44, 0.0 }
 0x390   : > { %2442 = vst.msk [vmem:[%s2760_s24 + $0xe0] sm:$0xff] %vm197_vm0, %v3838_v9  ;;  %2443 = vst.msk [vmem:[%s2760_s24 + $0xe8] sm:$0xff] %vm197_vm0, %v3844_v20  ;;  %v2353_v50 = vadd.f32 %v2352_v36, %v2351_v34  ;;  %v2366_v10 = vsel %vm197_vm0, %v2323_v1, 0.0  ;;  %v2326_v19 = vmul.f32 %v3829_v7, %v3829_v7  ;;  %v2368_v3 = vsel %vm197_vm0, %v2324_v18, 0.0 }
 0x391   : > { %2444 = vst.msk [vmem:[%s2760_s24 + $0xf0] sm:$0xff] %vm197_vm0, %v3835_v55  ;;  %2445 = vst.msk [vmem:[%s2760_s24 + $0xf8] sm:$0xff] %vm197_vm0, %v3841_v31  ;;  %v2254_v35 = vadd.f32 %v2253_v27, %v2252_v56  ;;  %v2283_v29 = vsel %vm197_vm0, %v3793_v2, 0.0  ;;  %v2327_v12 = vmul.f32 %v3754_v59, %v3754_v59  ;;  %v2328_v7 = vmul.f32 %v3761_v52, %v3761_v52 }
 0x392   : > { %v2355_v56 = vadd.f32 %v2354_v45, %v2353_v50  ;;  %v2372_v34 = vsel %vm197_vm0, %v2326_v19, 0.0  ;;  %v2287_v45 = vsel %vm197_vm0, %v3820_v33, 0.0  ;;  %v2329_v59 = vmul.f32 %v3750_v11, %v3750_v11 }
 0x393   : > { %v2256_v58 = vadd.f32 %v2255_v4, %v2254_v35  ;;  %v2271_v4 = vsel %vm197_vm0, %v3761_v52, 0.0  ;;  %v2330_v52 = vmul.f32 %v3757_v6, %v3757_v6  ;;  %v2331_v11 = vmul.f32 %v3790_v25, %v3790_v25 }
 0x394   : > { %v2357_v35 = vadd.f32 %v2356_v62, %v2355_v56  ;;  %v2376_v62 = vsel %vm197_vm0, %v2328_v7, 0.0  ;;  %v2378_v21 = vsel %vm197_vm0, %v2329_v59, 0.0  ;;  %v2299_v18 = vsel %vm197_vm0, %v3841_v31, 0.0 }
 0x395   : > { %v2258_v16 = vadd.f32 %v2257_v22, %v2256_v58  ;;  %v2360_v22 = vsel %vm197_vm0, %v2320_v61, 0.0  ;;  %v2289_v61 = vsel %vm197_vm0, %v3811_v41, 0.0  ;;  %vm2308_vm12 = vcmask 57344  }
 0x396   : > { %v2359_v58 = vadd.f32 %v2358_v13, %v2357_v35  ;;  %v2293_v35 = vsel %vm197_vm0, %v3838_v9, 0.0 }
 0x397   : > { %v2260_v49 = vadd.f32 %v2259_v15, %v2258_v16  ;;  %v2275_v15 = vsel %vm197_vm0, %v3757_v6, 0.0  ;;  %v2277_v16 = vsel %vm197_vm0, %v3790_v25, 0.0  ;;  %v2332_v6 = vmul.f32 %v3796_v14, %v3796_v14 }
 0x398   : > { %v2361_v51 = vadd.f32 %v2360_v22, %v2359_v58  ;;  %v2333_v25 = vmul.f32 %v3787_v0, %v3787_v0  ;;  %v2382_v58 = vsel %vm197_vm0, %v2331_v11, 0.0  ;;  %v2334_v14 = vmul.f32 %v3793_v2, %v3793_v2  ;;  %v2310_v11 = vld [vmem:[%s4128_s4 + $0x1] sm:$0x1] }
 0x399   : > { %v2262_v32 = vadd.f32 %v2261_v26, %v2260_v49 }
 0x39a   : > { %v2363_v26 = vadd.f32 %v2362_v46, %v2361_v51  ;;  %v2297_v46 = vsel %vm197_vm0, %v3835_v55, 0.0 }
 0x39b   : > { %v2264_v42 = vadd.f32 %v2263_v37, %v2262_v32  ;;  %v2281_v37 = vsel %vm197_vm0, %v3787_v0, 0.0  ;;  %v2335_v0 = vmul.f32 %v3814_v38, %v3814_v38 }
 0x39c   : > { %v2365_v30 = vadd.f32 %v2364_v8, %v2363_v26  ;;  %v2386_v8 = vsel %vm197_vm0, %v2333_v25, 0.0 }
 0x39d   : > { %v2266_v23 = vadd.f32 %v2265_v39, %v2264_v42  ;;  %v2370_v39 = vsel %vm197_vm0, %v2325_v60, 0.0  ;;  %v2285_v42 = vsel %vm197_vm0, %v3814_v38, 0.0  ;;  %v2388_v60 = vsel %vm197_vm0, %v2334_v14, 0.0 }
 0x39e   : > { %v2367_v32 = vadd.f32 %v2366_v10, %v2365_v30  ;;  %v2390_v30 = vsel %vm197_vm0, %v2335_v0, 0.0  ;;  %v2338_v38 = vmul.f32 %v3817_v63, %v3817_v63 }
 0x39f   : > { %v2268_v27 = vadd.f32 %v2267_v47, %v2266_v23  ;;  %v2374_v23 = vsel %vm197_vm0, %v2327_v12, 0.0 }
 0x3a0   : > { %v2369_v36 = vadd.f32 %v2368_v3, %v2367_v32 }
 0x3a1   : > { %v2270_v40 = vadd.f32 %v2269_v24, %v2268_v27 }
 0x3a2   : > { %v2371_v28 = vadd.f32 %v2370_v39, %v2369_v36 }
 0x3a3   : > { %v2272_v57 = vadd.f32 %v2271_v4, %v2270_v40  ;;  %v2291_v4 = vsel %vm197_vm0, %v3817_v63, 0.0  ;;  %v2341_v63 = vmul.f32 %v3835_v55, %v3835_v55 }
 0x3a4   : > { %v2373_v24 = vadd.f32 %v2372_v34, %v2371_v28  ;;  %v2342_v28 = vmul.f32 %v3841_v31, %v3841_v31 }
 0x3a5   : > { %v2274_v54 = vadd.f32 %v2273_v48, %v2272_v57  ;;  %v2380_v48 = vsel %vm197_vm0, %v2330_v52, 0.0  ;;  %v2295_v57 = vsel %vm197_vm0, %v3844_v20, 0.0 }
 0x3a6   : > { %v2375_v56 = vadd.f32 %v2374_v23, %v2373_v24  ;;  %v2402_v23 = vsel %vm197_vm0, %v2341_v63, 0.0  ;;  %v2404_v24 = vsel %vm197_vm0, %v2342_v28, 0.0 }
 0x3a7   : > { %v2276_v43 = vadd.f32 %v2275_v15, %v2274_v54  ;;  %v2384_v54 = vsel %vm197_vm0, %v2332_v6, 0.0 }
 0x3a8   : > { %v2377_v40 = vadd.f32 %v2376_v62, %v2375_v56 }
 0x3a9   : > { %v2278_v49 = vadd.f32 %v2277_v16, %v2276_v43 }
 0x3aa   : > { %v2379_v22 = vadd.f32 %v2378_v21, %v2377_v40 }
 0x3ab   : > { %v2280_v17 = vadd.f32 %v2279_v5, %v2278_v49  ;;  %v2336_v5 = vmul.f32 %v3820_v33, %v3820_v33  ;;  %v2337_v49 = vmul.f32 %v3811_v41, %v3811_v41  ;;  %v2339_v33 = vmul.f32 %v3838_v9, %v3838_v9  ;;  %v2237_v9 = vld [vmem:[%s4128_s4] sm:$0x1] }
 0x3ac   : > { %v2381_v1 = vadd.f32 %v2380_v48, %v2379_v22  ;;  %v2340_v41 = vmul.f32 %v3844_v20, %v3844_v20 }
 0x3ad   : > { %v2282_v53 = vadd.f32 %v2281_v37, %v2280_v17  ;;  %v2392_v3 = vsel %vm197_vm0, %v2336_v5, 0.0  ;;  %v2398_v7 = vsel %vm197_vm0, %v2339_v33, 0.0 }
 0x3ae   : > { %v2383_v16 = vadd.f32 %v2382_v58, %v2381_v1  ;;  %v2400_v20 = vsel %vm197_vm0, %v2340_v41, 0.0 }
 0x3af   : > { %v2284_v47 = vadd.f32 %v2283_v29, %v2282_v53  ;;  %v2394_v29 = vsel %vm197_vm0, %v2337_v49, 0.0  ;;  %v2396_v53 = vsel %vm197_vm0, %v2338_v38, 0.0 }
 0x3b0   : > { %v2385_v26 = vadd.f32 %v2384_v54, %v2383_v16 }
 0x3b1   : > { %v2286_v50 = vadd.f32 %v2285_v42, %v2284_v47 }
 0x3b2   : > { %v2387_v10 = vadd.f32 %v2386_v8, %v2385_v26 }
 0x3b3   : > { %v2288_v27 = vadd.f32 %v2287_v45, %v2286_v50 }
 0x3b4   : > { %v2389_v19 = vadd.f32 %v2388_v60, %v2387_v10 }
 0x3b5   : > { %v2290_v13 = vadd.f32 %v2289_v61, %v2288_v27 }
 0x3b6   : > { %v2391_v32 = vadd.f32 %v2390_v30, %v2389_v19 }
 0x3b7   : > { %v2292_v44 = vadd.f32 %v2291_v4, %v2290_v13 }
 0x3b8   : > { %v2393_v39 = vadd.f32 %v2392_v3, %v2391_v32 }
 0x3b9   : > { %v2294_v15 = vadd.f32 %v2293_v35, %v2292_v44 }
 0x3ba   : > { %v2395_v42 = vadd.f32 %v2394_v29, %v2393_v39 }
 0x3bb   : > { %v2296_v51 = vadd.f32 %v2295_v57, %v2294_v15 }
 0x3bc   : > { %v2397_v47 = vadd.f32 %v2396_v53, %v2395_v42 }
 0x3bd   : > { %v2298_v43 = vadd.f32 %v2297_v46, %v2296_v51 }
 0x3be   : > { %v2399_v59 = vadd.f32 %v2398_v7, %v2397_v47 }
 0x3bf   : > { %v2300_v2 = vadd.f32 %v2299_v18, %v2298_v43 }
 0x3c0   : > { %v2401_v55 = vadd.f32 %v2400_v20, %v2399_v59 }
 0x3c1   : > { %v2301_v37 = vrot.slane %v2300_v2, 4 }
 0x3c2   : > { %v2403_v61 = vadd.f32 %v2402_v23, %v2401_v55 }
 0x3c3   : > { %v2302_v17 = vadd.f32 %v2301_v37, %v2300_v2 }
 0x3c4   : > { %v2405_v52 = vadd.f32 %v2404_v24, %v2403_v61 }
 0x3c5   : > { %v2303_v12 = vrot.slane %v2302_v17, 2 }
 0x3c6   : > { %v2406_v62 = vrot.slane %v2405_v52, 4 }
 0x3c7   : > { %v2304_v36 = vadd.f32 %v2303_v12, %v2302_v17 }
 0x3c8   : > { %v2407_v31 = vadd.f32 %v2406_v62, %v2405_v52 }
 0x3c9   : > { %v2305_v34 = vrot.slane %v2304_v36, 1 }
 0x3ca   : > { %v2408_v27 = vrot.slane %v2407_v31, 2 }
 0x3cb   : > { %v2306_v45 = vadd.f32 %v2305_v34, %v2304_v36 }
 0x3cc   : > { %v2409_v56 = vadd.f32 %v2408_v27, %v2407_v31 }
 0x3cd   : > { %v2307_v50 = vadd.f32 %v2306_v45, %v2237_v9 }
 0x3ce   : > { %v2410_v4 = vrot.slane %v2409_v56, 1 }
 0x3cf   : > { %2309 = vst.msk [vmem:[%s4128_s4] sm:$0x1] %vm2308_vm12, %v2307_v50 }
 0x3d0   : > { %v2411_v21 = vadd.f32 %v2410_v4, %v2409_v56 }
 0x3d2   : > { %v2412_v13 = vadd.f32 %v2411_v21, %v2310_v11 }
 0x3d4   : > { %2413 = vst.msk [vmem:[%s4128_s4 + $0x1] sm:$0x1] %vm2308_vm12, %v2412_v13 }
 0x3d5 PF: > { %s15_s15 = sadd.s32 1, %s2647_s15  }
 0x3d6   : > { %p12_p5 = scmp.ge.s32.totalorder %s15_s15, 4  }
 0x3d8   :  { %14 = sbr.rel (!%p12_p5) target bundleno = 1 (0x1), region = 76 }

</bundles_post_ra>
